<compile_context>
chip_gen: v6e
topology: v6e:2x2x1
jax: 0.10.0
libtpu: 0.0.40
codegen_flags: <defaults>
</compile_context>

<pallas_src>
import functools

import jax
import jax.numpy as jnp
from jax.experimental import pallas as pl
from jax.experimental.pallas import tpu as pltpu

IGNORE_INDEX = -100


def _default_vmem_limit_bytes():
    """Pick a scoped-VMEM limit that is generous but safe across v5e/v6e/v7x."""
    try:
        cap = pltpu.get_tpu_info().vmem_capacity_bytes
        return int(cap * 3 // 4)
    except Exception:
        # 48 MiB fits v7x's 64 MiB/TC and is well above the 16/32 MiB defaults.
        return 48 * 1024 * 1024


def _ce_kernel(tgt_ref, h_ref, w_ref, loss_ref, m_sc, l_sc, t_sc, *, ignore_index):
    """One (token-tile, vocab-tile) step of fused linear + cross-entropy.

    tgt_ref : [TN, 1] int32   target ids for this token tile
    h_ref   : [TN, D] bf16    hidden states for this token tile
    w_ref   : [TV, D] bf16    projection weight rows for this vocab tile
    loss_ref: [TN, 1] f32     per-token loss (written on the last vocab tile)
    m_sc/l_sc/t_sc : [TN, 1] f32 running max / running sum-exp / target logit
    """
    j = pl.program_id(1)

    @pl.when(j == 0)
    def _():
        m_sc[...] = jnp.full_like(m_sc, -jnp.inf)
        l_sc[...] = jnp.zeros_like(l_sc)
        t_sc[...] = jnp.zeros_like(t_sc)

    # Linear projection for this tile: contract h dim 1 with w dim 1, i.e.
    # [TN, D] x [TV, D] -> [TN, TV] on the MXU with f32 accumulation.
    # No explicit transpose of the weight tile.
    logits = jax.lax.dot_general(
        h_ref[...],
        w_ref[...],
        dimension_numbers=(((1,), (1,)), ((), ())),
        preferred_element_type=jnp.float32,
    )

    tv = logits.shape[1]
    tgt = tgt_ref[...]  # [TN, 1] int32

    # Gather the logit at the target index via selection: compare a block-local
    # iota against the block-local target index (cheap [TN, 1] subtract instead
    # of a full-tile add of j*tv).
    tgt_local = tgt - j * tv
    col = jax.lax.broadcasted_iota(jnp.int32, logits.shape, 1)
    t_sc[...] += jnp.where(col == tgt_local, logits, 0.0).sum(axis=1, keepdims=True)

    # Online logsumexp across vocab tiles (all in f32).
    m_new = jnp.maximum(m_sc[...], logits.max(axis=1, keepdims=True))
    l_sc[...] = l_sc[...] * jnp.exp(m_sc[...] - m_new) + jnp.exp(
        logits - m_new
    ).sum(axis=1, keepdims=True)
    m_sc[...] = m_new

    @pl.when(j == pl.num_programs(1) - 1)
    def _():
        lse = m_sc[...] + jnp.log(l_sc[...])
        per_token = lse - t_sc[...]
        valid = tgt != ignore_index
        loss_ref[...] = jnp.where(valid, per_token, 0.0)


def linear_cross_entropy_loss(
    hidden,
    targets,
    weight,
    *,
    ignore_index=IGNORE_INDEX,
    tn=256,
    tv=512,
    compute_dtype=jnp.bfloat16,
    vmem_limit_bytes=None,
):
    """hidden: [B, S, D], targets: [B, S] int, weight: [V, D].

    Returns a scalar: sum of CE over non-ignored tokens / number of non-ignored
    tokens (or 0.0 if every token is ignored), matching the PyTorch module.
    """
    B, S, D = hidden.shape
    V, Dw = weight.shape
    assert D == Dw
    N = B * S

    # Clamp tiles to the problem size; keep the even-tiling assumption.
    tn = min(tn, N)
    tv = min(tv, V)
    assert N % tn == 0 and V % tv == 0, "shapes must tile evenly"

    # Keep operands in bf16 (MXU-native, half the HBM/VMEM traffic); the
    # matmul accumulates in f32 and the softmax state stays f32.
    h = hidden.reshape(N, D).astype(compute_dtype)
    t = targets.reshape(N, 1).astype(jnp.int32)
    w = weight.astype(compute_dtype)

    if vmem_limit_bytes is None:
        vmem_limit_bytes = _default_vmem_limit_bytes()

    kernel = functools.partial(_ce_kernel, ignore_index=ignore_index)

    num_vocab_tiles = V // tv
    w_spec_kwargs = {}
    if num_vocab_tiles >= 3:
        # The weight tile is the only operand that changes every inner step;
        # deeper buffering hides its DMA behind the matmul when it fits VMEM.
        w_spec_kwargs["pipeline_mode"] = pl.Buffered(3)
    w_spec = pl.BlockSpec((tv, D), lambda i, j: (j, 0), **w_spec_kwargs)

    per_token_loss = pl.pallas_call(
        kernel,
        out_shape=jax.ShapeDtypeStruct((N, 1), jnp.float32),
        grid_spec=pltpu.PrefetchScalarGridSpec(
            num_scalar_prefetch=0,
            grid=(N // tn, num_vocab_tiles),
            in_specs=[
                pl.BlockSpec((tn, 1), lambda i, j: (i, 0)),  # targets
                pl.BlockSpec((tn, D), lambda i, j: (i, 0)),  # hidden (resident over j)
                w_spec,                                      # weight rows
            ],
            out_specs=pl.BlockSpec((tn, 1), lambda i, j: (i, 0)),
            scratch_shapes=[
                pltpu.VMEM((tn, 1), jnp.float32),  # running max
                pltpu.VMEM((tn, 1), jnp.float32),  # running sum-exp
                pltpu.VMEM((tn, 1), jnp.float32),  # target logit
            ],
        ),
        compiler_params=pltpu.CompilerParams(
            dimension_semantics=("parallel", "arbitrary"),
            vmem_limit_bytes=vmem_limit_bytes,
        ),
    )(t, h, w)

    total_loss = per_token_loss.sum()
    total_elements = (t != ignore_index).sum()
    # When every token is ignored, total_loss is exactly 0, so dividing by
    # max(count, 1) reproduces the PyTorch "return total_loss" branch without
    # ever forming a NaN.
    denom = jnp.maximum(total_elements, 1).astype(jnp.float32)
    return total_loss / denom


def _reference_loss(
    hidden, targets, weight, ignore_index=IGNORE_INDEX, compute_dtype=jnp.bfloat16
):
    """Plain-JAX reference matching the PyTorch forward semantics (same
    operand precision as the kernel: bf16 projection inputs, f32 math)."""
    B, S, D = hidden.shape
    h = hidden.reshape(-1, D).astype(compute_dtype).astype(jnp.float32)
    w = weight.astype(compute_dtype).astype(jnp.float32)
    t = targets.reshape(-1)
    logits = h @ w.T
    lse = jax.nn.logsumexp(logits, axis=-1)
    tgt_logit = jnp.take_along_axis(
        logits, jnp.clip(t, 0, weight.shape[0] - 1)[:, None], axis=-1
    )[:, 0]
    mask = t != ignore_index
    per_tok = jnp.where(mask, lse - tgt_logit, 0.0)
    count = mask.sum()
    total = per_tok.sum()
    return total / jnp.maximum(count, 1).astype(jnp.float32)


if __name__ == "__main__":
    # Small, deterministic setup.
    B, S, D, V = 2, 128, 64, 512
    key = jax.random.PRNGKey(0)
    k_h, k_w, k_t = jax.random.split(key, 3)

    hidden = jax.random.normal(k_h, (B, S, D), dtype=jnp.float32)
    # Deterministic "linear projection" weight (nn.Linear(D, V, bias=False)).
    weight = jax.random.normal(k_w, (V, D), dtype=jnp.float32) * 0.02
    targets = jax.random.randint(k_t, (B, S), 0, V, dtype=jnp.int32)
    # Mark some tokens as ignored, like padded labels.
    targets = targets.at[:, :16].set(IGNORE_INDEX)

    loss = linear_cross_entropy_loss(hidden, targets, weight)
    loss = jax.block_until_ready(loss)

    ref = jax.block_until_ready(_reference_loss(hidden, targets, weight))
    assert jnp.allclose(loss, ref, rtol=1e-4, atol=1e-4), (loss, ref)

    print("KERNEL_OK")
</pallas_src>

<mosaic_0001>
module attributes {stable_mosaic.version = 11 : i64} {
  func.func @_ce_kernel(%arg0: i32, %arg1: i32, %arg2: memref<256x1xi32, #tpu.memory_space<vmem>>, %arg3: memref<256x64xbf16, #tpu.memory_space<vmem>>, %arg4: memref<512x64xbf16, #tpu.memory_space<vmem>>, %arg5: memref<256x1xf32, #tpu.memory_space<vmem>>, %arg6: memref<256x1xf32, #tpu.memory_space<vmem>>, %arg7: memref<256x1xf32, #tpu.memory_space<vmem>>, %arg8: memref<256x1xf32, #tpu.memory_space<vmem>>) attributes {dimension_semantics = [#tpu.dimension_semantics<parallel>, #tpu.dimension_semantics<arbitrary>], iteration_bounds = array<i64: 1, 1>, scalar_prefetch = 0 : i64, scratch_operands = 3 : i64, tpu.core_type = #tpu.core_type<tc>, window_params = [{transform_indices = @transform_0, window_bounds = array<i64: 256, 1>}, {transform_indices = @transform_1, window_bounds = array<i64: 256, 64>}, {transform_indices = @transform_2, window_bounds = array<i64: 512, 64>}, {transform_indices = @transform_3, window_bounds = array<i64: 256, 1>}]} {
    %c0_i32 = arith.constant 0 : i32
    %0 = arith.cmpi eq, %arg1, %c0_i32 : i32
    %1 = arith.extui %0 : i1 to i32
    %c0_i32_0 = arith.constant 0 : i32
    %2 = arith.cmpi ne, %1, %c0_i32_0 : i32
    scf.if %2 {
      %cst_26 = arith.constant 0xFF800000 : f32
      %40 = vector.broadcast %cst_26 : f32 to vector<256x1xf32>
      %c0_27 = arith.constant 0 : index
      %c0_28 = arith.constant 0 : index
      %41 = vector.load %arg6[%c0_27, %c0_28] : memref<256x1xf32, #tpu.memory_space<vmem>>, vector<256x1xf32>
      tpu.vector_store %arg6[%c0_27, %c0_28], %40 {strides = array<i32>} : memref<256x1xf32, #tpu.memory_space<vmem>>, vector<256x1xf32>,
      %cst_29 = arith.constant 0.000000e+00 : f32
      %42 = vector.broadcast %cst_29 : f32 to vector<256x1xf32>
      %c0_30 = arith.constant 0 : index
      %c0_31 = arith.constant 0 : index
      %43 = vector.load %arg7[%c0_30, %c0_31] : memref<256x1xf32, #tpu.memory_space<vmem>>, vector<256x1xf32>
      tpu.vector_store %arg7[%c0_30, %c0_31], %42 {strides = array<i32>} : memref<256x1xf32, #tpu.memory_space<vmem>>, vector<256x1xf32>,
      %cst_32 = arith.constant 0.000000e+00 : f32
      %44 = vector.broadcast %cst_32 : f32 to vector<256x1xf32>
      %c0_33 = arith.constant 0 : index
      %c0_34 = arith.constant 0 : index
      %45 = vector.load %arg8[%c0_33, %c0_34] : memref<256x1xf32, #tpu.memory_space<vmem>>, vector<256x1xf32>
      tpu.vector_store %arg8[%c0_33, %c0_34], %44 {strides = array<i32>} : memref<256x1xf32, #tpu.memory_space<vmem>>, vector<256x1xf32>,
    } else {
    }
    %c0 = arith.constant 0 : index
    %c0_1 = arith.constant 0 : index
    %3 = vector.load %arg3[%c0, %c0_1] : memref<256x64xbf16, #tpu.memory_space<vmem>>, vector<256x64xbf16>
    %c0_2 = arith.constant 0 : index
    %c0_3 = arith.constant 0 : index
    %4 = vector.load %arg4[%c0_2, %c0_3] : memref<512x64xbf16, #tpu.memory_space<vmem>>, vector<512x64xbf16>
    %cst = arith.constant dense<0.000000e+00> : vector<256x512xf32>
    %5 = tpu.matmul %3, %4, %cst {dimension_numbers = #tpu.dot_dimension_numbers<[1], [1], [0], [0], [0, 0, 1, 0], [], []>} : vector<256x64xbf16>, vector<512x64xbf16>, vector<256x512xf32> -> vector<256x512xf32>
    %c0_4 = arith.constant 0 : index
    %c0_5 = arith.constant 0 : index
    %6 = vector.load %arg2[%c0_4, %c0_5] : memref<256x1xi32, #tpu.memory_space<vmem>>, vector<256x1xi32>
    %c512_i32 = arith.constant 512 : i32
    %7 = arith.muli %arg1, %c512_i32 : i32
    %8 = vector.broadcast %7 : i32 to vector<256x1xi32>
    %9 = arith.subi %6, %8 : vector<256x1xi32>
    %10 = tpu.iota {dimensions = array<i32: 1>} : vector<256x512xi32>
    %c0_6 = arith.constant 0 : index
    %c0_7 = arith.constant 0 : index
    %11 = vector.load %arg8[%c0_6, %c0_7] : memref<256x1xf32, #tpu.memory_space<vmem>>, vector<256x1xf32>
    %12 = vector.broadcast %9 : vector<256x1xi32> to vector<256x512xi32>
    %13 = arith.cmpi eq, %10, %12 : vector<256x512xi32>
    %cst_8 = arith.constant 0.000000e+00 : f32
    %14 = vector.broadcast %cst_8 : f32 to vector<256x512xf32>
    %15 = arith.select %13, %5, %14 : vector<256x512xi1>, vector<256x512xf32>
    %cst_9 = arith.constant dense<0.000000e+00> : vector<256xf32>
    %16 = vector.multi_reduction <add>, %15, %cst_9 [1] : vector<256x512xf32> to vector<256xf32>
    %17 = vector.shape_cast %16 : vector<256xf32> to vector<256x1xf32>
    %18 = arith.addf %11, %17 : vector<256x1xf32>
    %c0_10 = arith.constant 0 : index
    %c0_11 = arith.constant 0 : index
    %19 = vector.load %arg8[%c0_10, %c0_11] : memref<256x1xf32, #tpu.memory_space<vmem>>, vector<256x1xf32>
    tpu.vector_store %arg8[%c0_10, %c0_11], %18 {strides = array<i32>} : memref<256x1xf32, #tpu.memory_space<vmem>>, vector<256x1xf32>,
    %c0_12 = arith.constant 0 : index
    %c0_13 = arith.constant 0 : index
    %20 = vector.load %arg6[%c0_12, %c0_13] : memref<256x1xf32, #tpu.memory_space<vmem>>, vector<256x1xf32>
    %cst_14 = arith.constant dense<0xFF800000> : vector<256xf32>
    %21 = vector.multi_reduction <maximumf>, %5, %cst_14 [1] : vector<256x512xf32> to vector<256xf32>
    %22 = vector.shape_cast %21 : vector<256xf32> to vector<256x1xf32>
    %23 = arith.maximumf %20, %22 : vector<256x1xf32>
    %c0_15 = arith.constant 0 : index
    %c0_16 = arith.constant 0 : index
    %24 = vector.load %arg7[%c0_15, %c0_16] : memref<256x1xf32, #tpu.memory_space<vmem>>, vector<256x1xf32>
    %c0_17 = arith.constant 0 : index
    %c0_18 = arith.constant 0 : index
    %25 = vector.load %arg6[%c0_17, %c0_18] : memref<256x1xf32, #tpu.memory_space<vmem>>, vector<256x1xf32>
    %26 = arith.subf %25, %23 : vector<256x1xf32>
    %27 = math.exp %26 : vector<256x1xf32>
    %28 = arith.mulf %24, %27 : vector<256x1xf32>
    %29 = vector.broadcast %23 : vector<256x1xf32> to vector<256x512xf32>
    %30 = arith.subf %5, %29 : vector<256x512xf32>
    %31 = math.exp %30 : vector<256x512xf32>
    %cst_19 = arith.constant dense<0.000000e+00> : vector<256xf32>
    %32 = vector.multi_reduction <add>, %31, %cst_19 [1] : vector<256x512xf32> to vector<256xf32>
    %33 = vector.shape_cast %32 : vector<256xf32> to vector<256x1xf32>
    %34 = arith.addf %28, %33 : vector<256x1xf32>
    %c0_20 = arith.constant 0 : index
    %c0_21 = arith.constant 0 : index
    %35 = vector.load %arg7[%c0_20, %c0_21] : memref<256x1xf32, #tpu.memory_space<vmem>>, vector<256x1xf32>
    tpu.vector_store %arg7[%c0_20, %c0_21], %34 {strides = array<i32>} : memref<256x1xf32, #tpu.memory_space<vmem>>, vector<256x1xf32>,
    %c0_22 = arith.constant 0 : index
    %c0_23 = arith.constant 0 : index
    %36 = vector.load %arg6[%c0_22, %c0_23] : memref<256x1xf32, #tpu.memory_space<vmem>>, vector<256x1xf32>
    tpu.vector_store %arg6[%c0_22, %c0_23], %23 {strides = array<i32>} : memref<256x1xf32, #tpu.memory_space<vmem>>, vector<256x1xf32>,
    %c0_i32_24 = arith.constant 0 : i32
    %37 = arith.cmpi eq, %arg1, %c0_i32_24 : i32
    %38 = arith.extui %37 : i1 to i32
    %c0_i32_25 = arith.constant 0 : i32
    %39 = arith.cmpi ne, %38, %c0_i32_25 : i32
    scf.if %39 {
      %c0_26 = arith.constant 0 : index
      %c0_27 = arith.constant 0 : index
      %40 = vector.load %arg6[%c0_26, %c0_27] : memref<256x1xf32, #tpu.memory_space<vmem>>, vector<256x1xf32>
      %c0_28 = arith.constant 0 : index
      %c0_29 = arith.constant 0 : index
      %41 = vector.load %arg7[%c0_28, %c0_29] : memref<256x1xf32, #tpu.memory_space<vmem>>, vector<256x1xf32>
      %42 = math.log %41 : vector<256x1xf32>
      %43 = arith.addf %40, %42 : vector<256x1xf32>
      %c0_30 = arith.constant 0 : index
      %c0_31 = arith.constant 0 : index
      %44 = vector.load %arg8[%c0_30, %c0_31] : memref<256x1xf32, #tpu.memory_space<vmem>>, vector<256x1xf32>
      %45 = arith.subf %43, %44 : vector<256x1xf32>
      %c-100_i32 = arith.constant -100 : i32
      %46 = vector.broadcast %c-100_i32 : i32 to vector<256x1xi32>
      %47 = arith.cmpi ne, %6, %46 : vector<256x1xi32>
      %cst_32 = arith.constant 0.000000e+00 : f32
      %48 = vector.broadcast %cst_32 : f32 to vector<256x1xf32>
      %49 = arith.select %47, %45, %48 : vector<256x1xi1>, vector<256x1xf32>
      %c0_33 = arith.constant 0 : index
      %c0_34 = arith.constant 0 : index
      %50 = vector.load %arg5[%c0_33, %c0_34] : memref<256x1xf32, #tpu.memory_space<vmem>>, vector<256x1xf32>
      tpu.vector_store %arg5[%c0_33, %c0_34], %49 {strides = array<i32>} : memref<256x1xf32, #tpu.memory_space<vmem>>, vector<256x1xf32>,
    } else {
    }
    return
  }
  func.func @transform_0(%arg0: i32, %arg1: i32) -> (i32, i32) {
    %c0_i32 = arith.constant 0 : i32
    %c0_i32_0 = arith.constant 0 : i32
    return %arg0, %c0_i32 : i32, i32
  }
  func.func @transform_1(%arg0: i32, %arg1: i32) -> (i32, i32) {
    %c0_i32 = arith.constant 0 : i32
    %c0_i32_0 = arith.constant 0 : i32
    return %arg0, %c0_i32 : i32, i32
  }
  func.func @transform_2(%arg0: i32, %arg1: i32) -> (i32, i32) {
    %c0_i32 = arith.constant 0 : i32
    %c0_i32_0 = arith.constant 0 : i32
    return %arg1, %c0_i32 : i32, i32
  }
  func.func @transform_3(%arg0: i32, %arg1: i32) -> (i32, i32) {
    %c0_i32 = arith.constant 0 : i32
    %c0_i32_0 = arith.constant 0 : i32
    return %arg0, %c0_i32 : i32, i32
  }
}

</mosaic_0001>

<bundles_post_ra>
// kernel: tpu_custom_call.1
= control target key start
LH: loop header
LB: loop body
LE: loop exit
PB: predicated region body
PF: predicated region fallthrough
CT: control target
= control target key end

     0   :  { %vm452_vm0 = vcmask 523264   ;;  %v3835_v1 = vmov 0   ;;  %vm19_vm13 = vcmask 7168   ;;  %s5885_s2 = inlined_call_operand.vmem [shape: bf16[512,64], index: 2, kind: input, shape index: {}]   ;;  %s5886_s1 = inlined_call_operand.vmem [shape: bf16[256,64], index: 1, kind: input, shape index: {}]   ;;  %s5887_s0 = inlined_call_operand.vmem [shape: s32[256,1], index: 0, kind: input, shape index: {}]   ;;  %s5888_s3 = inlined_call_operand.vmem [shape: f32[256,1], index: 3, kind: output, shape index: {}]  }
   0x1   :  { %v3371_v0 = vld [vmem:[%s5885_s2 + $0x78] sm:$0xff]   ;;  %3369 = vset.pattern.permute.xlu0 %v3835_v1  ;;  %3370 = vset.pattern.permute.xlu1 %v3835_v1  ;;  %v3375_v6 = vld [vmem:[%s5885_s2 + $0x70] sm:$0xff]   ;;  %v3379_v12 = vld [vmem:[%s5885_s2 + $0x68] sm:$0xff]  }
   0x2   :  { %v3372_v2 = vld [vmem:[%s5885_s2 + $0xf8] sm:$0xff]   ;;  %3350 = vmatprep.subr.msk.bf16.mxu0 %vm452_vm0, %v3371_v0  ;;  %v3376_v8 = vld [vmem:[%s5885_s2 + $0xf0] sm:$0xff]   ;;  %v3380_v14 = vld [vmem:[%s5885_s2 + $0xe8] sm:$0xff]  }
   0x3   :  { %v3373_v3 = vld [vmem:[%s5885_s2 + $0x38] sm:$0xff]   ;;  %3358 = vmatprep.subr.msk.bf16.mxu1 %vm452_vm0, %v3372_v2  ;;  %v3377_v9 = vld [vmem:[%s5885_s2 + $0x30] sm:$0xff]   ;;  %v3381_v15 = vld [vmem:[%s5885_s2 + $0x28] sm:$0xff]  }
   0x4   :  { %v3374_v4 = vld [vmem:[%s5885_s2 + $0xb8] sm:$0xff]   ;;  %v523_v5 = vsel %vm452_vm0, %v3373_v3, 0  ;;  %v3378_v10 = vld [vmem:[%s5885_s2 + $0xb0] sm:$0xff]   ;;  %v520_v11 = vsel %vm452_vm0, %v3377_v9, 0  ;;  %v3382_v16 = vld [vmem:[%s5885_s2 + $0xa8] sm:$0xff]   ;;  %v517_v17 = vsel %vm452_vm0, %v3381_v15, 0 }
   0x5   :  { %3255 = vmatpush3.bf16.xpose.msra.mxu0 %v523_v5  ;;  %v571_v7 = vsel %vm452_vm0, %v3374_v4, 0  ;;  %v568_v13 = vsel %vm452_vm0, %v3378_v10, 0  ;;  %v3383_v18 = vld [vmem:[%s5885_s2 + $0x60] sm:$0xff]   ;;  %v565_v19 = vsel %vm452_vm0, %v3382_v16, 0  ;;  %v3387_v24 = vld [vmem:[%s5885_s2 + $0x58] sm:$0xff]   ;;  %v3391_v31 = vld [vmem:[%s5885_s2 + $0x50] sm:$0xff]  }
   0x6   :  { %3303 = vmatpush3.bf16.xpose.msra.mxu1 %v571_v7  ;;  %3351 = vmatprep.subr.msk.bf16.mxu0 %vm452_vm0, %v3375_v6  ;;  %v3384_v20 = vld [vmem:[%s5885_s2 + $0xe0] sm:$0xff]   ;;  %v3388_v26 = vld [vmem:[%s5885_s2 + $0xd8] sm:$0xff]   ;;  %v3392_v34 = vld [vmem:[%s5885_s2 + $0xd0] sm:$0xff]  }
   0x7   :  { %3359 = vmatprep.subr.msk.bf16.mxu1 %vm452_vm0, %v3376_v8  ;;  %v3385_v21 = vld [vmem:[%s5885_s2 + $0x20] sm:$0xff]   ;;  %v3389_v27 = vld [vmem:[%s5885_s2 + $0x18] sm:$0xff]   ;;  %v985_v35 = vld [vmem:[%s5887_s0 + $0x10] sm:$0xff] }
   0x8   :  { %v3386_v22 = vld [vmem:[%s5885_s2 + $0xa0] sm:$0xff]   ;;  %v514_v23 = vsel %vm452_vm0, %v3385_v21, 0  ;;  %v3390_v28 = vld [vmem:[%s5885_s2 + $0x98] sm:$0xff]   ;;  %v511_v30 = vsel %vm452_vm0, %v3389_v27, 0  ;;  %v984_v36 = vld [vmem:[%s5887_s0 + $0x8] sm:$0xff]  ;;  %1093 = vperm.xlu1 %3370, %v985_v35  }
   0x9   :  { %v562_v25 = vsel %vm452_vm0, %v3386_v22, 0  ;;  %v3939_v29 = vld [vmem:[%s5886_s1] sm:$0xff]   ;;  %v559_v33 = vsel %vm452_vm0, %v3390_v28, 0  ;;  %v986_v37 = vld [vmem:[%s5887_s0 + $0x18] sm:$0xff]  ;;  %v3393_v38 = vld [vmem:[%s5885_s2 + $0x10] sm:$0xff]  }
   0xa   :  { %3270 = vmatprep.mubr.msk.bf16.mxu0 %vm452_vm0, %v3939_v29  ;;  %3318 = vmatprep.mubr.msk.bf16.mxu1 %vm452_vm0, %v3939_v29  ;;  %v983_v32 = vld [vmem:[%s5887_s0] sm:$0xff]  ;;  %v3394_v39 = vld [vmem:[%s5885_s2 + $0x90] sm:$0xff]   ;;  %v988_v41 = vld [vmem:[%s5887_s0 + $0x28] sm:$0xff]  ;;  %v508_v42 = vsel %vm452_vm0, %v3393_v38, 0 }
   0xb   :  { %1087 = vperm.xlu0 %3369, %v983_v32   ;;  %v987_v40 = vld [vmem:[%s5887_s0 + $0x20] sm:$0xff]  ;;  %v3395_v43 = vld [vmem:[%s5885_s2 + $0x48] sm:$0xff]   ;;  %v556_v44 = vsel %vm452_vm0, %v3394_v39, 0  ;;  %v989_v46 = vld [vmem:[%s5887_s0 + $0x30] sm:$0xff] }
   0xc   :  { %1096 = vperm.xlu1 %3370, %v986_v37   ;;  %v3396_v45 = vld [vmem:[%s5885_s2 + $0xc8] sm:$0xff]   ;;  %v990_v47 = vld [vmem:[%s5887_s0 + $0x38] sm:$0xff]  ;;  %v991_v50 = vld [vmem:[%s5887_s0 + $0x40] sm:$0xff] }
   0xd   :  { %3257 = vmatpush3.bf16.xpose.msra.mxu0 %v520_v11  ;;  %v3397_v48 = vld [vmem:[%s5885_s2 + $0x8] sm:$0xff]   ;;  %v3399_v53 = vld [vmem:[%s5885_s2 + $0x40] sm:$0xff]   ;;  %v993_v56 = vld [vmem:[%s5887_s0 + $0x50] sm:$0xff] }
   0xe   :  { %3305 = vmatpush3.bf16.xpose.msra.mxu1 %v568_v13  ;;  %3352 = vmatprep.subr.msk.bf16.mxu0 %vm452_vm0, %v3379_v12  ;;  %v3398_v49 = vld [vmem:[%s5885_s2 + $0x88] sm:$0xff]   ;;  %v505_v52 = vsel %vm452_vm0, %v3397_v48, 0  ;;  %v3400_v55 = vld [vmem:[%s5885_s2 + $0xc0] sm:$0xff]   ;;  %v994_v57 = vld [vmem:[%s5887_s0 + $0x58] sm:$0xff] }
   0xf   :  { %3360 = vmatprep.subr.msk.bf16.mxu1 %vm452_vm0, %v3380_v14  ;;  %1090 = vperm.xlu0 %3369, %v984_v36   ;;  %v992_v51 = vld [vmem:[%s5887_s0 + $0x48] sm:$0xff]  ;;  %v553_v54 = vsel %vm452_vm0, %v3398_v49, 0  ;;  %v3401_v58 = vld [vmem:[%s5885_s2] sm:$0xff]   ;;  %v997_v0 = vld [vmem:[%s5887_s0 + $0x70] sm:$0xff] }
  0x10   :  { %1102 = vperm.xlu1 %3370, %v988_v41   ;;  %v3402_v59 = vld [vmem:[%s5885_s2 + $0x80] sm:$0xff]   ;;  %v996_v61 = vld [vmem:[%s5887_s0 + $0x68] sm:$0xff]  ;;  %v502_v62 = vsel %vm452_vm0, %v3401_v58, 0  ;;  %v998_v1 = vld [vmem:[%s5887_s0 + $0x78] sm:$0xff] }
  0x11   :  { %v995_v60 = vld [vmem:[%s5887_s0 + $0x60] sm:$0xff]  ;;  %v550_v63 = vsel %vm452_vm0, %v3402_v59, 0  ;;  %v3404_v3 = vld [vmem:[%s5886_s1 + $0x8] sm:$0xff]   ;;  %v1001_v5 = vld [vmem:[%s5887_s0 + $0x90] sm:$0xff] }
  0x12   :  { %v999_v2 = vld [vmem:[%s5887_s0 + $0x80] sm:$0xff]  ;;  %v1000_v4 = vld [vmem:[%s5887_s0 + $0x88] sm:$0xff]  ;;  %v1002_v6 = vld [vmem:[%s5887_s0 + $0x98] sm:$0xff] }
  0x13   :  { %1099 = vperm.xlu0 %3369, %v987_v40   ;;  %v1003_v7 = vld [vmem:[%s5887_s0 + $0xa0] sm:$0xff]  ;;  %v3405_v8 = vld [vmem:[%s5886_s1 + $0x10] sm:$0xff]   ;;  %v1004_v9 = vld [vmem:[%s5887_s0 + $0xa8] sm:$0xff] }
  0x14   :  { %1108 = vperm.xlu1 %3370, %v990_v47   ;;  %v1005_v10 = vld [vmem:[%s5887_s0 + $0xb0] sm:$0xff]  ;;  %v1006_v11 = vld [vmem:[%s5887_s0 + $0xb8] sm:$0xff]  ;;  %v1007_v12 = vld [vmem:[%s5887_s0 + $0xc0] sm:$0xff] }
  0x15   :  { %3259 = vmatpush3.bf16.xpose.msra.mxu0 %v517_v17  ;;  %v3406_v13 = vld [vmem:[%s5886_s1 + $0x18] sm:$0xff]   ;;  %v1008_v14 = vld [vmem:[%s5887_s0 + $0xc8] sm:$0xff]  ;;  %v1009_v15 = vld [vmem:[%s5887_s0 + $0xd0] sm:$0xff] }
  0x16   :  { %3307 = vmatpush3.bf16.xpose.msra.mxu1 %v565_v19  ;;  %3353 = vmatprep.subr.msk.bf16.mxu0 %vm452_vm0, %v3383_v18  ;;  %v1010_v16 = vld [vmem:[%s5887_s0 + $0xd8] sm:$0xff]  ;;  %v1011_v17 = vld [vmem:[%s5887_s0 + $0xe0] sm:$0xff]  ;;  %v1012_v19 = vld [vmem:[%s5887_s0 + $0xe8] sm:$0xff] }
  0x17   :  { %3361 = vmatprep.subr.msk.bf16.mxu1 %vm452_vm0, %v3384_v20  ;;  %1105 = vperm.xlu0 %3369, %v989_v46   ;;  %v3407_v18 = vld [vmem:[%s5886_s1 + $0x20] sm:$0xff]   ;;  %v1013_v20 = vld [vmem:[%s5887_s0 + $0xf0] sm:$0xff]  ;;  %v1014_v21 = vld [vmem:[%s5887_s0 + $0xf8] sm:$0xff] }
  0x18   :  { %1114 = vperm.xlu1 %3370, %v992_v51   ;;  %v3408_v22 = vld [vmem:[%s5886_s1 + $0x28] sm:$0xff]   ;;  %v3413_v27 = vld [vmem:[%s5886_s1 + $0x50] sm:$0xff]   ;;  %v3414_v28 = vld [vmem:[%s5886_s1 + $0x58] sm:$0xff]  }
  0x19   :  { %v3418_v32 = vld [vmem:[%s5886_s1 + $0x78] sm:$0xff]  }
  0x1b   :  { %1111 = vperm.xlu0 %3369, %v991_v50  }
  0x1c   :  { %1120 = vperm.xlu1 %3370, %v994_v57  }
  0x1d   :  { %3261 = vmatpush3.bf16.xpose.msra.mxu0 %v514_v23  ;;  %v3409_v23 = vld [vmem:[%s5886_s1 + $0x30] sm:$0xff]  }
  0x1e   :  { %3309 = vmatpush3.bf16.xpose.msra.mxu1 %v562_v25  ;;  %3354 = vmatprep.subr.msk.bf16.mxu0 %vm452_vm0, %v3387_v24  ;;  %v3410_v24 = vld [vmem:[%s5886_s1 + $0x38] sm:$0xff]   ;;  %v3411_v25 = vld [vmem:[%s5886_s1 + $0x40] sm:$0xff]  }
  0x1f   :  { %3362 = vmatprep.subr.msk.bf16.mxu1 %vm452_vm0, %v3388_v26  ;;  %1117 = vperm.xlu0 %3369, %v993_v56   ;;  %v3412_v26 = vld [vmem:[%s5886_s1 + $0x48] sm:$0xff]  }
  0x20   :  { %1126 = vperm.xlu1 %3370, %v996_v61  }
  0x23   :  { %1123 = vperm.xlu0 %3369, %v995_v60  }
  0x24   :  { %1132 = vperm.xlu1 %3370, %v998_v1  }
  0x25   :  { %3263 = vmatpush3.bf16.xpose.msra.mxu0 %v511_v30  ;;  %v3416_v30 = vld [vmem:[%s5886_s1 + $0x68] sm:$0xff]  }
  0x26   :  { %3311 = vmatpush3.bf16.xpose.msra.mxu1 %v559_v33  ;;  %3355 = vmatprep.subr.msk.bf16.mxu0 %vm452_vm0, %v3391_v31  ;;  %v3417_v31 = vld [vmem:[%s5886_s1 + $0x70] sm:$0xff]   ;;  %v1049_v33 = vlaneseq }
  0x27   :  { %3363 = vmatprep.subr.msk.bf16.mxu1 %vm452_vm0, %v3392_v34  ;;  %1129 = vperm.xlu0 %3369, %v997_v0  }
  0x28   :  { %1138 = vperm.xlu1 %3370, %v1000_v4   ;;  %v4200_v34 = vand.u32 127, %v1049_v33 }
  0x2a   :  { %v4203_v35 = vadd.s32 128, %v4200_v34  ;;  %v4206_v36 = vadd.s32 256, %v4200_v34  ;;  %v4209_v38 = vadd.s32 384, %v4200_v34 }
  0x2b   :  { %1135 = vperm.xlu0 %3369, %v999_v2  }
  0x2c   :  { %1144 = vperm.xlu1 %3370, %v1002_v6  }
  0x2d   :  { %3265 = vmatpush3.bf16.xpose.msra.mxu0 %v508_v42 }
  0x2e   :  { %3313 = vmatpush3.bf16.xpose.msra.mxu1 %v556_v44  ;;  %3356 = vmatprep.subr.msk.bf16.mxu0 %vm452_vm0, %v3395_v43 }
  0x2f   :  { %3364 = vmatprep.subr.msk.bf16.mxu1 %vm452_vm0, %v3396_v45  ;;  %1141 = vperm.xlu0 %3369, %v1001_v5  }
  0x30   :  { %1150 = vperm.xlu1 %3370, %v1004_v9  }
  0x33   :  { %1147 = vperm.xlu0 %3369, %v1003_v7  }
  0x34   :  { %1156 = vperm.xlu1 %3370, %v1006_v11   ;;  %v3836_v11 = vmov -inf  }
  0x35   :  { %3267 = vmatpush3.bf16.xpose.msra.mxu0 %v505_v52  ;;  %20 = vst.msk [vmem:[#allocation2] sm:$0xff] %vm19_vm13, %v3836_v11  ;;  %21 = vst.msk [vmem:[#allocation2 + $0x8] sm:$0xff] %vm19_vm13, %v3836_v11 }
  0x36   :  { %3315 = vmatpush3.bf16.xpose.msra.mxu1 %v553_v54  ;;  %3357 = vmatprep.subr.msk.bf16.mxu0 %vm452_vm0, %v3399_v53  ;;  %22 = vst.msk [vmem:[#allocation2 + $0x10] sm:$0xff] %vm19_vm13, %v3836_v11  ;;  %23 = vst.msk [vmem:[#allocation2 + $0x18] sm:$0xff] %vm19_vm13, %v3836_v11 }
  0x37   :  { %3365 = vmatprep.subr.msk.bf16.mxu1 %vm452_vm0, %v3400_v55  ;;  %1153 = vperm.xlu0 %3369, %v1005_v10   ;;  %24 = vst.msk [vmem:[#allocation2 + $0x20] sm:$0xff] %vm19_vm13, %v3836_v11  ;;  %25 = vst.msk [vmem:[#allocation2 + $0x28] sm:$0xff] %vm19_vm13, %v3836_v11 }
  0x38   :  { %1162 = vperm.xlu1 %3370, %v1008_v14   ;;  %26 = vst.msk [vmem:[#allocation2 + $0x30] sm:$0xff] %vm19_vm13, %v3836_v11  ;;  %27 = vst.msk [vmem:[#allocation2 + $0x38] sm:$0xff] %vm19_vm13, %v3836_v11 }
  0x39   :  { %28 = vst.msk [vmem:[#allocation2 + $0x40] sm:$0xff] %vm19_vm13, %v3836_v11  ;;  %29 = vst.msk [vmem:[#allocation2 + $0x48] sm:$0xff] %vm19_vm13, %v3836_v11 }
  0x3a   :  { %30 = vst.msk [vmem:[#allocation2 + $0x50] sm:$0xff] %vm19_vm13, %v3836_v11  ;;  %31 = vst.msk [vmem:[#allocation2 + $0x58] sm:$0xff] %vm19_vm13, %v3836_v11 }
  0x3b   :  { %1159 = vperm.xlu0 %3369, %v1007_v12   ;;  %32 = vst.msk [vmem:[#allocation2 + $0x60] sm:$0xff] %vm19_vm13, %v3836_v11  ;;  %33 = vst.msk [vmem:[#allocation2 + $0x68] sm:$0xff] %vm19_vm13, %v3836_v11 }
  0x3c   :  { %1168 = vperm.xlu1 %3370, %v1010_v16   ;;  %34 = vst.msk [vmem:[#allocation2 + $0x70] sm:$0xff] %vm19_vm13, %v3836_v11  ;;  %35 = vst.msk [vmem:[#allocation2 + $0x78] sm:$0xff] %vm19_vm13, %v3836_v11 }
  0x3d   :  { %3269 = vmatpush3.bf16.xpose.msra.mxu0 %v502_v62  ;;  %36 = vst.msk [vmem:[#allocation2 + $0x80] sm:$0xff] %vm19_vm13, %v3836_v11  ;;  %37 = vst.msk [vmem:[#allocation2 + $0x88] sm:$0xff] %vm19_vm13, %v3836_v11 }
  0x3e   :  { %3317 = vmatpush3.bf16.xpose.msra.mxu1 %v550_v63  ;;  %38 = vst.msk [vmem:[#allocation2 + $0x90] sm:$0xff] %vm19_vm13, %v3836_v11  ;;  %39 = vst.msk [vmem:[#allocation2 + $0x98] sm:$0xff] %vm19_vm13, %v3836_v11 }
  0x3f   :  { %1165 = vperm.xlu0 %3369, %v1009_v15   ;;  %40 = vst.msk [vmem:[#allocation2 + $0xa0] sm:$0xff] %vm19_vm13, %v3836_v11  ;;  %41 = vst.msk [vmem:[#allocation2 + $0xa8] sm:$0xff] %vm19_vm13, %v3836_v11 }
  0x40   :  { %1174 = vperm.xlu1 %3370, %v1012_v19   ;;  %42 = vst.msk [vmem:[#allocation2 + $0xb0] sm:$0xff] %vm19_vm13, %v3836_v11  ;;  %43 = vst.msk [vmem:[#allocation2 + $0xb8] sm:$0xff] %vm19_vm13, %v3836_v11  ;;  %v3837_v19 = vmov 0.0  }
  0x41   :  { %44 = vst.msk [vmem:[#allocation2 + $0xc0] sm:$0xff] %vm19_vm13, %v3836_v11  ;;  %45 = vst.msk [vmem:[#allocation2 + $0xc8] sm:$0xff] %vm19_vm13, %v3836_v11 }
  0x42   :  { %46 = vst.msk [vmem:[#allocation2 + $0xd0] sm:$0xff] %vm19_vm13, %v3836_v11  ;;  %47 = vst.msk [vmem:[#allocation2 + $0xd8] sm:$0xff] %vm19_vm13, %v3836_v11 }
  0x43   :  { %1171 = vperm.xlu0 %3369, %v1011_v17   ;;  %48 = vst.msk [vmem:[#allocation2 + $0xe0] sm:$0xff] %vm19_vm13, %v3836_v11  ;;  %49 = vst.msk [vmem:[#allocation2 + $0xe8] sm:$0xff] %vm19_vm13, %v3836_v11 }
  0x44   :  { %3271 = vmatmul.mubr.msk.bf16.vlgmr.msra.gmra.mxu0 %vm452_vm0, %v3939_v29  ;;  %1180 = vperm.xlu1 %3370, %v1014_v21   ;;  %50 = vst.msk [vmem:[#allocation2 + $0xf0] sm:$0xff] %vm19_vm13, %v3836_v11  ;;  %51 = vst.msk [vmem:[#allocation2 + $0xf8] sm:$0xff] %vm19_vm13, %v3836_v11 }
  0x45   :  { %3319 = vmatmul.mubr.msk.bf16.vlgmr.msra.gmra.mxu1 %vm452_vm0, %v3939_v29  ;;  %3272 = vmatprep.mubr.msk.bf16.mxu0 %vm452_vm0, %v3404_v3  ;;  %v3415_v29 = vld [vmem:[%s5886_s1 + $0x60] sm:$0xff]   ;;  %84 = vst.msk [vmem:[#allocation4] sm:$0xff] %vm19_vm13, %v3837_v19  ;;  %52 = vst.msk [vmem:[#allocation3] sm:$0xff] %vm19_vm13, %v3837_v19 }
  0x46   :  { %3320 = vmatprep.mubr.msk.bf16.mxu1 %vm452_vm0, %v3404_v3  ;;  %53 = vst.msk [vmem:[#allocation3 + $0x8] sm:$0xff] %vm19_vm13, %v3837_v19  ;;  %54 = vst.msk [vmem:[#allocation3 + $0x10] sm:$0xff] %vm19_vm13, %v3837_v19 }
  0x47   :  { %1177 = vperm.xlu0 %3369, %v1013_v20   ;;  %55 = vst.msk [vmem:[#allocation3 + $0x18] sm:$0xff] %vm19_vm13, %v3837_v19  ;;  %56 = vst.msk [vmem:[#allocation3 + $0x20] sm:$0xff] %vm19_vm13, %v3837_v19 }
  0x48   :  { %57 = vst.msk [vmem:[#allocation3 + $0x28] sm:$0xff] %vm19_vm13, %v3837_v19  ;;  %58 = vst.msk [vmem:[#allocation3 + $0x30] sm:$0xff] %vm19_vm13, %v3837_v19 }
  0x49   :  { %59 = vst.msk [vmem:[#allocation3 + $0x38] sm:$0xff] %vm19_vm13, %v3837_v19  ;;  %60 = vst.msk [vmem:[#allocation3 + $0x40] sm:$0xff] %vm19_vm13, %v3837_v19 }
  0x4a   :  { %61 = vst.msk [vmem:[#allocation3 + $0x48] sm:$0xff] %vm19_vm13, %v3837_v19  ;;  %62 = vst.msk [vmem:[#allocation3 + $0x50] sm:$0xff] %vm19_vm13, %v3837_v19 }
  0x4b   :  { %63 = vst.msk [vmem:[#allocation3 + $0x58] sm:$0xff] %vm19_vm13, %v3837_v19  ;;  %64 = vst.msk [vmem:[#allocation3 + $0x60] sm:$0xff] %vm19_vm13, %v3837_v19 }
  0x4c   :  { %3273 = vmatmul.mubr.msk.bf16.gmra.mxu0 %vm452_vm0, %v3404_v3  ;;  %65 = vst.msk [vmem:[#allocation3 + $0x68] sm:$0xff] %vm19_vm13, %v3837_v19  ;;  %66 = vst.msk [vmem:[#allocation3 + $0x70] sm:$0xff] %vm19_vm13, %v3837_v19 }
  0x4d   :  { %3321 = vmatmul.mubr.msk.bf16.gmra.mxu1 %vm452_vm0, %v3404_v3  ;;  %3274 = vmatprep.mubr.msk.bf16.mxu0 %vm452_vm0, %v3405_v8  ;;  %67 = vst.msk [vmem:[#allocation3 + $0x78] sm:$0xff] %vm19_vm13, %v3837_v19  ;;  %68 = vst.msk [vmem:[#allocation3 + $0x80] sm:$0xff] %vm19_vm13, %v3837_v19 }
  0x4e   :  { %3322 = vmatprep.mubr.msk.bf16.mxu1 %vm452_vm0, %v3405_v8  ;;  %69 = vst.msk [vmem:[#allocation3 + $0x88] sm:$0xff] %vm19_vm13, %v3837_v19  ;;  %70 = vst.msk [vmem:[#allocation3 + $0x90] sm:$0xff] %vm19_vm13, %v3837_v19 }
  0x4f   :  { %71 = vst.msk [vmem:[#allocation3 + $0x98] sm:$0xff] %vm19_vm13, %v3837_v19  ;;  %72 = vst.msk [vmem:[#allocation3 + $0xa0] sm:$0xff] %vm19_vm13, %v3837_v19 }
  0x50   :  { %73 = vst.msk [vmem:[#allocation3 + $0xa8] sm:$0xff] %vm19_vm13, %v3837_v19  ;;  %74 = vst.msk [vmem:[#allocation3 + $0xb0] sm:$0xff] %vm19_vm13, %v3837_v19 }
  0x51   :  { %75 = vst.msk [vmem:[#allocation3 + $0xb8] sm:$0xff] %vm19_vm13, %v3837_v19  ;;  %76 = vst.msk [vmem:[#allocation3 + $0xc0] sm:$0xff] %vm19_vm13, %v3837_v19 }
  0x52   :  { %77 = vst.msk [vmem:[#allocation3 + $0xc8] sm:$0xff] %vm19_vm13, %v3837_v19  ;;  %78 = vst.msk [vmem:[#allocation3 + $0xd0] sm:$0xff] %vm19_vm13, %v3837_v19 }
  0x53   :  { %79 = vst.msk [vmem:[#allocation3 + $0xd8] sm:$0xff] %vm19_vm13, %v3837_v19  ;;  %80 = vst.msk [vmem:[#allocation3 + $0xe0] sm:$0xff] %vm19_vm13, %v3837_v19 }
  0x54   :  { %3275 = vmatmul.mubr.msk.bf16.gmra.mxu0 %vm452_vm0, %v3405_v8  ;;  %81 = vst.msk [vmem:[#allocation3 + $0xe8] sm:$0xff] %vm19_vm13, %v3837_v19  ;;  %82 = vst.msk [vmem:[#allocation3 + $0xf0] sm:$0xff] %vm19_vm13, %v3837_v19 }
  0x55   :  { %3323 = vmatmul.mubr.msk.bf16.gmra.mxu1 %vm452_vm0, %v3405_v8  ;;  %3276 = vmatprep.mubr.msk.bf16.mxu0 %vm452_vm0, %v3406_v13  ;;  %83 = vst.msk [vmem:[#allocation3 + $0xf8] sm:$0xff] %vm19_vm13, %v3837_v19  ;;  %85 = vst.msk [vmem:[#allocation4 + $0x8] sm:$0xff] %vm19_vm13, %v3837_v19 }
  0x56   :  { %3324 = vmatprep.mubr.msk.bf16.mxu1 %vm452_vm0, %v3406_v13  ;;  %86 = vst.msk [vmem:[#allocation4 + $0x10] sm:$0xff] %vm19_vm13, %v3837_v19  ;;  %87 = vst.msk [vmem:[#allocation4 + $0x18] sm:$0xff] %vm19_vm13, %v3837_v19 }
  0x57   :  { %88 = vst.msk [vmem:[#allocation4 + $0x20] sm:$0xff] %vm19_vm13, %v3837_v19  ;;  %89 = vst.msk [vmem:[#allocation4 + $0x28] sm:$0xff] %vm19_vm13, %v3837_v19 }
  0x58   :  { %90 = vst.msk [vmem:[#allocation4 + $0x30] sm:$0xff] %vm19_vm13, %v3837_v19  ;;  %91 = vst.msk [vmem:[#allocation4 + $0x38] sm:$0xff] %vm19_vm13, %v3837_v19 }
  0x59   :  { %92 = vst.msk [vmem:[#allocation4 + $0x40] sm:$0xff] %vm19_vm13, %v3837_v19  ;;  %93 = vst.msk [vmem:[#allocation4 + $0x48] sm:$0xff] %vm19_vm13, %v3837_v19 }
  0x5a   :  { %94 = vst.msk [vmem:[#allocation4 + $0x50] sm:$0xff] %vm19_vm13, %v3837_v19  ;;  %95 = vst.msk [vmem:[#allocation4 + $0x58] sm:$0xff] %vm19_vm13, %v3837_v19 }
  0x5b   :  { %96 = vst.msk [vmem:[#allocation4 + $0x60] sm:$0xff] %vm19_vm13, %v3837_v19  ;;  %97 = vst.msk [vmem:[#allocation4 + $0x68] sm:$0xff] %vm19_vm13, %v3837_v19 }
  0x5c   :  { %3277 = vmatmul.mubr.msk.bf16.gmra.mxu0 %vm452_vm0, %v3406_v13  ;;  %98 = vst.msk [vmem:[#allocation4 + $0x70] sm:$0xff] %vm19_vm13, %v3837_v19  ;;  %99 = vst.msk [vmem:[#allocation4 + $0x78] sm:$0xff] %vm19_vm13, %v3837_v19 }
  0x5d   :  { %3325 = vmatmul.mubr.msk.bf16.gmra.mxu1 %vm452_vm0, %v3406_v13  ;;  %3278 = vmatprep.mubr.msk.bf16.mxu0 %vm452_vm0, %v3407_v18  ;;  %100 = vst.msk [vmem:[#allocation4 + $0x80] sm:$0xff] %vm19_vm13, %v3837_v19  ;;  %101 = vst.msk [vmem:[#allocation4 + $0x88] sm:$0xff] %vm19_vm13, %v3837_v19 }
  0x5e   :  { %3326 = vmatprep.mubr.msk.bf16.mxu1 %vm452_vm0, %v3407_v18  ;;  %102 = vst.msk [vmem:[#allocation4 + $0x90] sm:$0xff] %vm19_vm13, %v3837_v19  ;;  %103 = vst.msk [vmem:[#allocation4 + $0x98] sm:$0xff] %vm19_vm13, %v3837_v19 }
  0x5f   :  { %104 = vst.msk [vmem:[#allocation4 + $0xa0] sm:$0xff] %vm19_vm13, %v3837_v19  ;;  %105 = vst.msk [vmem:[#allocation4 + $0xa8] sm:$0xff] %vm19_vm13, %v3837_v19 }
  0x60   :  { %106 = vst.msk [vmem:[#allocation4 + $0xb0] sm:$0xff] %vm19_vm13, %v3837_v19  ;;  %107 = vst.msk [vmem:[#allocation4 + $0xb8] sm:$0xff] %vm19_vm13, %v3837_v19 }
  0x61   :  { %108 = vst.msk [vmem:[#allocation4 + $0xc0] sm:$0xff] %vm19_vm13, %v3837_v19  ;;  %109 = vst.msk [vmem:[#allocation4 + $0xc8] sm:$0xff] %vm19_vm13, %v3837_v19 }
  0x62   :  { %110 = vst.msk [vmem:[#allocation4 + $0xd0] sm:$0xff] %vm19_vm13, %v3837_v19  ;;  %111 = vst.msk [vmem:[#allocation4 + $0xd8] sm:$0xff] %vm19_vm13, %v3837_v19 }
  0x63   :  { %112 = vst.msk [vmem:[#allocation4 + $0xe0] sm:$0xff] %vm19_vm13, %v3837_v19  ;;  %113 = vst.msk [vmem:[#allocation4 + $0xe8] sm:$0xff] %vm19_vm13, %v3837_v19 }
  0x64   :  { %3279 = vmatmul.mubr.msk.bf16.gmra.mxu0 %vm452_vm0, %v3407_v18  ;;  %114 = vst.msk [vmem:[#allocation4 + $0xf0] sm:$0xff] %vm19_vm13, %v3837_v19  ;;  %115 = vst.msk [vmem:[#allocation4 + $0xf8] sm:$0xff] %vm19_vm13, %v3837_v19 }
  0x65   :  { %3327 = vmatmul.mubr.msk.bf16.gmra.mxu1 %vm452_vm0, %v3407_v18  ;;  %3280 = vmatprep.mubr.msk.bf16.mxu0 %vm452_vm0, %v3408_v22 }
  0x66   :  { %3328 = vmatprep.mubr.msk.bf16.mxu1 %vm452_vm0, %v3408_v22 }
  0x6c   :  { %3281 = vmatmul.mubr.msk.bf16.gmra.mxu0 %vm452_vm0, %v3408_v22 }
  0x6d   :  { %3329 = vmatmul.mubr.msk.bf16.gmra.mxu1 %vm452_vm0, %v3408_v22  ;;  %3282 = vmatprep.mubr.msk.bf16.mxu0 %vm452_vm0, %v3409_v23 }
  0x6e   :  { %3330 = vmatprep.mubr.msk.bf16.mxu1 %vm452_vm0, %v3409_v23 }
  0x74   :  { %3283 = vmatmul.mubr.msk.bf16.gmra.mxu0 %vm452_vm0, %v3409_v23 }
  0x75   :  { %3331 = vmatmul.mubr.msk.bf16.gmra.mxu1 %vm452_vm0, %v3409_v23  ;;  %3284 = vmatprep.mubr.msk.bf16.mxu0 %vm452_vm0, %v3410_v24 }
  0x76   :  { %3332 = vmatprep.mubr.msk.bf16.mxu1 %vm452_vm0, %v3410_v24 }
  0x7c   :  { %3285 = vmatmul.mubr.msk.bf16.gmra.mxu0 %vm452_vm0, %v3410_v24 }
  0x7d   :  { %3333 = vmatmul.mubr.msk.bf16.gmra.mxu1 %vm452_vm0, %v3410_v24  ;;  %3286 = vmatprep.mubr.msk.bf16.mxu0 %vm452_vm0, %v3411_v25 }
  0x7e   :  { %3334 = vmatprep.mubr.msk.bf16.mxu1 %vm452_vm0, %v3411_v25 }
  0x83   :  { %v4227_v46 = vpop.permute.xlu1 %1093 }
  0x84   :  { %3287 = vmatmul.mubr.msk.bf16.gmra.mxu0 %vm452_vm0, %v3411_v25  ;;  %vm1190_vm5 = vcmp.eq.s32.totalorder %v4200_v34, %v4227_v46  ;;  %vm1192_vm6 = vcmp.eq.s32.totalorder %v4206_v36, %v4227_v46  ;;  %vm1191_vm10 = vcmp.eq.s32.totalorder %v4203_v35, %v4227_v46  ;;  %vm1193_vm12 = vcmp.eq.s32.totalorder %v4209_v38, %v4227_v46 }
  0x85   :  { %3335 = vmatmul.mubr.msk.bf16.gmra.mxu1 %vm452_vm0, %v3411_v25  ;;  %3288 = vmatprep.mubr.msk.bf16.mxu0 %vm452_vm0, %v3412_v26 }
  0x86   :  { %3336 = vmatprep.mubr.msk.bf16.mxu1 %vm452_vm0, %v3412_v26  ;;  %v1088_v37 = vpop.permute.xlu0 %1087 }
  0x87   :  { %vm1182_vm1 = vcmp.eq.s32.totalorder %v4200_v34, %v1088_v37  ;;  %vm1183_vm2 = vcmp.eq.s32.totalorder %v4203_v35, %v1088_v37  ;;  %vm1184_vm3 = vcmp.eq.s32.totalorder %v4206_v36, %v1088_v37  ;;  %vm1185_vm4 = vcmp.eq.s32.totalorder %v4209_v38, %v1088_v37  ;;  %v4317_v15 = vpop.permute.xlu1 %1096 }
  0x88   :  { %vm1194_vm14 = vcmp.eq.s32.totalorder %v4200_v34, %v4317_v15  ;;  %vm1195_vm15 = vcmp.eq.s32.totalorder %v4203_v35, %v4317_v15 }
  0x8a   :  { %v1091_v49 = vpop.permute.xlu0 %1090 }
  0x8b   :  { %vm1186_vm7 = vcmp.eq.s32.totalorder %v4200_v34, %v1091_v49  ;;  %vm1187_vm8 = vcmp.eq.s32.totalorder %v4203_v35, %v1091_v49  ;;  %vm1188_vm9 = vcmp.eq.s32.totalorder %v4206_v36, %v1091_v49  ;;  %vm1189_vm11 = vcmp.eq.s32.totalorder %v4209_v38, %v1091_v49 }
  0x8c   :  { %3289 = vmatmul.mubr.msk.bf16.gmra.mxu0 %vm452_vm0, %v3412_v26 }
  0x8d   :  { %3337 = vmatmul.mubr.msk.bf16.gmra.mxu1 %vm452_vm0, %v3412_v26  ;;  %3290 = vmatprep.mubr.msk.bf16.mxu0 %vm452_vm0, %v3413_v27 }
  0x8e   :  { %3338 = vmatprep.mubr.msk.bf16.mxu1 %vm452_vm0, %v3413_v27 }
  0x94   :  { %3291 = vmatmul.mubr.msk.bf16.gmra.mxu0 %vm452_vm0, %v3413_v27 }
  0x95   :  { %3339 = vmatmul.mubr.msk.bf16.gmra.mxu1 %vm452_vm0, %v3413_v27  ;;  %3292 = vmatprep.mubr.msk.bf16.mxu0 %vm452_vm0, %v3414_v28 }
  0x96   :  { %3340 = vmatprep.mubr.msk.bf16.mxu1 %vm452_vm0, %v3414_v28 }
  0x9c   :  { %3293 = vmatmul.mubr.msk.bf16.gmra.mxu0 %vm452_vm0, %v3414_v28 }
  0x9d   :  { %3341 = vmatmul.mubr.msk.bf16.gmra.mxu1 %vm452_vm0, %v3414_v28  ;;  %3294 = vmatprep.mubr.msk.bf16.mxu0 %vm452_vm0, %v3415_v29 }
  0x9e   :  { %3342 = vmatprep.mubr.msk.bf16.mxu1 %vm452_vm0, %v3415_v29 }
  0xa4   :  { %3295 = vmatmul.mubr.msk.bf16.gmra.mxu0 %vm452_vm0, %v3415_v29 }
  0xa5   :  { %3343 = vmatmul.mubr.msk.bf16.gmra.mxu1 %vm452_vm0, %v3415_v29  ;;  %3296 = vmatprep.mubr.msk.bf16.mxu0 %vm452_vm0, %v3416_v30 }
  0xa6   :  { %3344 = vmatprep.mubr.msk.bf16.mxu1 %vm452_vm0, %v3416_v30 }
  0xac   :  { %3297 = vmatmul.mubr.msk.bf16.gmra.mxu0 %vm452_vm0, %v3416_v30 }
  0xad   :  { %3345 = vmatmul.mubr.msk.bf16.gmra.mxu1 %vm452_vm0, %v3416_v30  ;;  %3298 = vmatprep.mubr.msk.bf16.mxu0 %vm452_vm0, %v3417_v31 }
  0xae   :  { %3346 = vmatprep.mubr.msk.bf16.mxu1 %vm452_vm0, %v3417_v31 }
  0xb4   :  { %3299 = vmatmul.mubr.msk.bf16.gmra.mxu0 %vm452_vm0, %v3417_v31 }
  0xb5   :  { %3347 = vmatmul.mubr.msk.bf16.gmra.mxu1 %vm452_vm0, %v3417_v31  ;;  %3300 = vmatprep.mubr.msk.bf16.mxu0 %vm452_vm0, %v3418_v32  ;;  %v1100_v31 = vpop.permute.xlu0 %1099 }
  0xb6   :  { %3348 = vmatprep.mubr.msk.bf16.mxu1 %vm452_vm0, %v3418_v32 }
  0xb9   :  { %v1106_v11 = vpop.permute.xlu0 %1105 }
  0xbc   :  { %3301 = vmatmul.mubr.msk.bf16.gmra.mxu0 %vm452_vm0, %v3418_v32 }
  0xbd   :  { %3349 = vmatmul.mubr.msk.bf16.gmra.mxu1 %vm452_vm0, %v3418_v32  ;;  %vm1196_vm0 = vcmp.eq.s32.totalorder %v4206_v36, %v4317_v15 }
 0x104   :  { %v4211_v39 = vpop.f32.mrf.mxu0 }
 0x105   :  { %v4215_v40 = vpop.f32.mrf.mxu1  ;;  %v1310_v42 = vsel %vm1182_vm1, %v4211_v39, 0.0  ;;  %vm1198_vm1 = vcmp.eq.s32.totalorder %v4200_v34, %v1100_v31 }
 0x106   :  { %v4218_v41 = vpop.f32.mrf.mxu0  ;;  %v1312_v50 = vsel %vm1184_vm3, %v4215_v40, 0.0  ;;  %vm1200_vm3 = vcmp.eq.s32.totalorder %v4206_v36, %v1100_v31 }
 0x107   :  { %v1311_v43 = vsel %vm1183_vm2, %v4218_v41, 0.0  ;;  %v1695_v44 = vmax.f32 %v4211_v39, %v4218_v41  ;;  %v4224_v45 = vpop.f32.mrf.mxu1  ;;  %vm1199_vm2 = vcmp.eq.s32.totalorder %v4203_v35, %v1100_v31 }
 0x108   :  { %v1438_v47 = vadd.f32 %v1311_v43, %v1310_v42  ;;  %v4229_v48 = vpop.f32.mrf.mxu0  ;;  %v1313_v54 = vsel %vm1185_vm4, %v4224_v45, 0.0  ;;  %vm1197_vm4 = vcmp.eq.s32.totalorder %v4209_v38, %v4317_v15 }
 0x109   :  { %v4232_v51 = vpop.f32.mrf.mxu1  ;;  %v1696_v52 = vmax.f32 %v1695_v44, %v4215_v40  ;;  %v1314_v56 = vsel %vm1186_vm7, %v4229_v48, 0.0  ;;  %vm1201_vm7 = vcmp.eq.s32.totalorder %v4209_v38, %v1100_v31 }
 0x10a   :  { %v4240_v53 = vpop.f32.mrf.mxu0  ;;  %v1439_v55 = vadd.f32 %v1438_v47, %v1312_v50  ;;  %v1316_v0 = vsel %vm1188_vm9, %v4232_v51, 0.0  ;;  %vm1206_vm9 = vcmp.eq.s32.totalorder %v4200_v34, %v1106_v11 }
 0x10b   :  { %v1315_v57 = vsel %vm1187_vm8, %v4240_v53, 0.0  ;;  %v1700_v58 = vmax.f32 %v4229_v48, %v4240_v53  ;;  %v4248_v59 = vpop.f32.mrf.mxu1  ;;  %v1697_v60 = vmax.f32 %v1696_v52, %v4224_v45 }
 0x10c   :  { %v1443_v61 = vadd.f32 %v1315_v57, %v1314_v56  ;;  %v4252_v62 = vpop.f32.mrf.mxu0  ;;  %v1440_v63 = vadd.f32 %v1439_v55, %v1313_v54  ;;  %v1317_v4 = vsel %vm1189_vm11, %v4248_v59, 0.0  ;;  %v1103_v55 = vpop.permute.xlu1 %1102  ;;  %vm1208_vm11 = vcmp.eq.s32.totalorder %v4206_v36, %v1106_v11 }
 0x10d   :  { %v4257_v1 = vpop.f32.mrf.mxu1  ;;  %1698 = vmax.xlane.f32.xlu1 %v1697_v60  ;;  %v4260_v2 = vmax.f32 %v1700_v58, %v4232_v51  ;;  %v1318_v6 = vsel %vm1190_vm5, %v4252_v62, 0.0  ;;  %vm1202_vm5 = vcmp.eq.s32.totalorder %v4200_v34, %v1103_v55  ;;  %vm1204_vm8 = vcmp.eq.s32.totalorder %v4206_v36, %v1103_v55 }
 0x10e   :  { %v4265_v3 = vpop.f32.mrf.mxu0  ;;  %1441 = vadd.xlane.f32.xlu0 %v1440_v63  ;;  %v1444_v5 = vadd.f32 %v1443_v61, %v1316_v0  ;;  %v4323_v16 = vsel %vm1192_vm6, %v4257_v1, 0.0  ;;  %vm1203_vm6 = vcmp.eq.s32.totalorder %v4203_v35, %v1103_v55 }
 0x10f   :  { %v1319_v7 = vsel %vm1191_vm10, %v4265_v3, 0.0  ;;  %v1705_v8 = vmax.f32 %v4252_v62, %v4265_v3  ;;  %v4275_v9 = vpop.f32.mrf.mxu1  ;;  %v1702_v10 = vmax.f32 %v4260_v2, %v4248_v59  ;;  %vm1207_vm10 = vcmp.eq.s32.totalorder %v4203_v35, %v1106_v11 }
 0x110   :  { %v4311_v12 = vadd.f32 %v1319_v7, %v1318_v6  ;;  %v4313_v13 = vpop.f32.mrf.mxu0  ;;  %v4315_v14 = vadd.f32 %v1444_v5, %v1317_v4  ;;  %v1321_v21 = vsel %vm1193_vm12, %v4275_v9, 0.0  ;;  %v1109_v31 = vpop.permute.xlu1 %1108  ;;  %vm1205_vm12 = vcmp.eq.s32.totalorder %v4209_v38, %v1103_v55 }
 0x111   :  { %v4325_v17 = vpop.f32.mrf.mxu1  ;;  %v4328_v18 = vmax.f32 %v1705_v8, %v4257_v1  ;;  %v1322_v23 = vsel %vm1194_vm14, %v4313_v13, 0.0  ;;  %vm1210_vm14 = vcmp.eq.s32.totalorder %v4200_v34, %v1109_v31 }
 0x112   :  { %v4460_v20 = vpop.f32.mrf.mxu0  ;;  %1703 = vmax.xlane.f32.xlu0 %v1702_v10  ;;  %1446 = vadd.xlane.f32.xlu1 %v4315_v14  ;;  %v1449_v22 = vadd.f32 %v4311_v12, %v4323_v16  ;;  %v1324_v37 = vsel %vm1196_vm0, %v4325_v17, 0.0  ;;  %vm1209_vm0 = vcmp.eq.s32.totalorder %v4209_v38, %v1106_v11 }
 0x113   :  { %v1323_v24 = vsel %vm1195_vm15, %v4460_v20, 0.0  ;;  %v1710_v25 = vmax.f32 %v4313_v13, %v4460_v20  ;;  %v4478_v26 = vpop.f32.mrf.mxu1  ;;  %v1707_v27 = vmax.f32 %v4328_v18, %v4275_v9  ;;  %vm1211_vm15 = vcmp.eq.s32.totalorder %v4203_v35, %v1109_v31 }
 0x114   :  { %v1453_v28 = vadd.f32 %v1323_v24, %v1322_v23  ;;  %v4482_v29 = vpop.f32.mrf.mxu0  ;;  %v1450_v30 = vadd.f32 %v1449_v22, %v1321_v21  ;;  %v1325_v61 = vsel %vm1197_vm4, %v4478_v26, 0.0 }
 0x115   :  { %v4486_v32 = vpop.f32.mrf.mxu1  ;;  %v1711_v33 = vmax.f32 %v1710_v25, %v4325_v17  ;;  %v1326_v43 = vsel %vm1198_vm1, %v4482_v29, 0.0  ;;  %vm1212_vm1 = vcmp.eq.s32.totalorder %v4206_v36, %v1109_v31 }
 0x116   :  { %v4491_v42 = vpop.f32.mrf.mxu0  ;;  %1451 = vadd.xlane.f32.xlu0 %v1450_v30  ;;  %1708 = vmax.xlane.f32.xlu1 %v1707_v27  ;;  %v1454_v54 = vadd.f32 %v1453_v28, %v1324_v37  ;;  %v1328_v56 = vsel %vm1200_vm3, %v4486_v32, 0.0 }
 0x117   :  { %v1327_v44 = vsel %vm1199_vm2, %v4491_v42, 0.0  ;;  %v1715_v46 = vmax.f32 %v4482_v29, %v4491_v42  ;;  %v4498_v47 = vpop.f32.mrf.mxu1  ;;  %v1712_v49 = vmax.f32 %v1711_v33, %v4478_v26 }
 0x118   :  { %v1458_v50 = vadd.f32 %v1327_v44, %v1326_v43  ;;  %v4502_v52 = vpop.f32.mrf.mxu0  ;;  %v1455_v10 = vadd.f32 %v1454_v54, %v1325_v61  ;;  %v1329_v14 = vsel %vm1201_vm7, %v4498_v47, 0.0 }
 0x119   :  { %v4505_v57 = vpop.f32.mrf.mxu1  ;;  %v1716_v58 = vmax.f32 %v1715_v46, %v4486_v32  ;;  %v1330_v0 = vsel %vm1202_vm5, %v4502_v52, 0.0  ;;  %vm1213_vm5 = vcmp.eq.s32.totalorder %v4209_v38, %v1109_v31 }
 0x11a   :  { %v4511_v60 = vpop.f32.mrf.mxu0  ;;  %1713 = vmax.xlane.f32.xlu0 %v1712_v49  ;;  %v1459_v63 = vadd.f32 %v1458_v50, %v1328_v56  ;;  %v1332_v16 = vsel %vm1204_vm8, %v4505_v57, 0.0 }
 0x11b   :  { %v1331_v2 = vsel %vm1203_vm6, %v4511_v60, 0.0  ;;  %v1720_v4 = vmax.f32 %v4502_v52, %v4511_v60  ;;  %v4519_v5 = vpop.f32.mrf.mxu1  ;;  %v1717_v6 = vmax.f32 %v1716_v58, %v4498_v47 }
 0x11c   :  { %v1463_v7 = vadd.f32 %v1331_v2, %v1330_v0  ;;  %v4522_v8 = vpop.f32.mrf.mxu0  ;;  %v1460_v19 = vadd.f32 %v1459_v63, %v1329_v14  ;;  %v1333_v46 = vsel %vm1205_vm12, %v4519_v5, 0.0  ;;  %v1112_v2 = vpop.permute.xlu0 %1111 }
 0x11d   :  { %v4526_v12 = vpop.f32.mrf.mxu1  ;;  %1718 = vmax.xlane.f32.xlu1 %v1717_v6  ;;  %v1721_v15 = vmax.f32 %v1720_v4, %v4505_v57  ;;  %v1334_v21 = vsel %vm1206_vm9, %v4522_v8, 0.0  ;;  %vm1214_vm2 = vcmp.eq.s32.totalorder %v4200_v34, %v1112_v2  ;;  %vm1215_vm3 = vcmp.eq.s32.totalorder %v4203_v35, %v1112_v2 }
 0x11e   :  { %v4532_v18 = vpop.f32.mrf.mxu0  ;;  %1456 = vadd.xlane.f32.xlu0 %v1455_v10  ;;  %v1464_v30 = vadd.f32 %v1463_v7, %v1332_v16  ;;  %v1336_v33 = vsel %vm1208_vm11, %v4526_v12, 0.0  ;;  %vm1216_vm4 = vcmp.eq.s32.totalorder %v4206_v36, %v1112_v2  ;;  %vm1217_vm8 = vcmp.eq.s32.totalorder %v4209_v38, %v1112_v2 }
 0x11f   :  { %v1335_v22 = vsel %vm1207_vm10, %v4532_v18, 0.0  ;;  %v1725_v23 = vmax.f32 %v4522_v8, %v4532_v18  ;;  %v4539_v24 = vpop.f32.mrf.mxu1  ;;  %v1722_v25 = vmax.f32 %v1721_v15, %v4519_v5 }
 0x120   :  { %v1468_v27 = vadd.f32 %v1335_v22, %v1334_v21  ;;  %v4543_v28 = vpop.f32.mrf.mxu0  ;;  %v1465_v0 = vadd.f32 %v1464_v30, %v1333_v46  ;;  %v1337_v6 = vsel %vm1209_vm0, %v4539_v24, 0.0  ;;  %v1115_v30 = vpop.permute.xlu1 %1114 }
 0x121   :  { %v4546_v37 = vpop.f32.mrf.mxu1  ;;  %1461 = vadd.xlane.f32.xlu1 %v1460_v19  ;;  %v1726_v43 = vmax.f32 %v1725_v23, %v4526_v12  ;;  %v1338_v50 = vsel %vm1210_vm14, %v4543_v28, 0.0  ;;  %vm1218_vm6 = vcmp.eq.s32.totalorder %v4200_v34, %v1115_v30  ;;  %vm1219_vm7 = vcmp.eq.s32.totalorder %v4203_v35, %v1115_v30 }
 0x122   :  { %v4551_v44 = vpop.f32.mrf.mxu0  ;;  %1723 = vmax.xlane.f32.xlu0 %v1722_v25  ;;  %v1469_v49 = vadd.f32 %v1468_v27, %v1336_v33  ;;  %v1340_v10 = vsel %vm1212_vm1, %v4546_v37, 0.0  ;;  %vm1220_vm9 = vcmp.eq.s32.totalorder %v4206_v36, %v1115_v30  ;;  %vm1221_vm14 = vcmp.eq.s32.totalorder %v4209_v38, %v1115_v30 }
 0x123   :  { %v1339_v54 = vsel %vm1211_vm15, %v4551_v44, 0.0  ;;  %v1730_v56 = vmax.f32 %v4543_v28, %v4551_v44  ;;  %v4559_v58 = vpop.f32.mrf.mxu1  ;;  %v1727_v55 = vmax.f32 %v1726_v43, %v4539_v24 }
 0x124   :  { %v1473_v61 = vadd.f32 %v1339_v54, %v1338_v50  ;;  %v4562_v63 = vpop.f32.mrf.mxu0  ;;  %v1470_v11 = vadd.f32 %v1469_v49, %v1337_v6  ;;  %v1341_v50 = vsel %vm1213_vm5, %v4559_v58, 0.0 }
 0x125   :  { %v4566_v4 = vpop.f32.mrf.mxu1  ;;  %1728 = vmax.xlane.f32.xlu1 %v1727_v55  ;;  %v1731_v7 = vmax.f32 %v1730_v56, %v4546_v37  ;;  %v1342_v15 = vsel %vm1214_vm2, %v4562_v63, 0.0 }
 0x126   :  { %v4572_v14 = vpop.f32.mrf.mxu0  ;;  %1466 = vadd.xlane.f32.xlu0 %v1465_v0  ;;  %v1474_v27 = vadd.f32 %v1473_v61, %v1340_v10  ;;  %v1344_v33 = vsel %vm1216_vm4, %v4566_v4, 0.0 }
 0x127   :  { %v1343_v16 = vsel %vm1215_vm3, %v4572_v14, 0.0  ;;  %v1735_v19 = vmax.f32 %v4562_v63, %v4572_v14  ;;  %v4579_v21 = vpop.f32.mrf.mxu1  ;;  %v1732_v22 = vmax.f32 %v1731_v7, %v4559_v58 }
 0x128   :  { %v1478_v23 = vadd.f32 %v1343_v16, %v1342_v15  ;;  %v4583_v25 = vpop.f32.mrf.mxu0  ;;  %v1475_v10 = vadd.f32 %v1474_v27, %v1341_v50  ;;  %v1345_v16 = vsel %vm1217_vm8, %v4579_v21, 0.0 }
 0x129   :  { %v4586_v43 = vpop.f32.mrf.mxu1  ;;  %1471 = vadd.xlane.f32.xlu1 %v1470_v11  ;;  %v1736_v46 = vmax.f32 %v1735_v19, %v4566_v4  ;;  %v1346_v56 = vsel %vm1218_vm6, %v4583_v25, 0.0  ;;  %v1118_v11 = vpop.permute.xlu0 %1117 }
 0x12a   :  { %6030 = vst [vmem:[#allocation5_spill] sm:$0xff] %v4586_v43  ;;  %v4591_v49 = vpop.f32.mrf.mxu0  ;;  %1733 = vmax.xlane.f32.xlu0 %v1732_v22  ;;  %v1479_v54 = vadd.f32 %v1478_v23, %v1344_v33  ;;  %v1348_v22 = vsel %vm1220_vm9, %v4586_v43, 0.0  ;;  %vm1222_vm10 = vcmp.eq.s32.totalorder %v4200_v34, %v1118_v11  ;;  %vm1223_vm11 = vcmp.eq.s32.totalorder %v4203_v35, %v1118_v11 }
 0x12b   :  { %v1347_v55 = vsel %vm1219_vm7, %v4591_v49, 0.0  ;;  %v1740_v61 = vmax.f32 %v4583_v25, %v4591_v49  ;;  %v4599_v0 = vpop.f32.mrf.mxu1  ;;  %v1737_v31 = vmax.f32 %v1736_v46, %v4579_v21  ;;  %vm1224_vm12 = vcmp.eq.s32.totalorder %v4206_v36, %v1118_v11 }
 0x12c   :  { %6031 = vst [vmem:[#allocation6_spill] sm:$0xff] %v4599_v0  ;;  %v1483_v6 = vadd.f32 %v1347_v55, %v1346_v56  ;;  %v4602_v7 = vpop.f32.mrf.mxu0  ;;  %v1480_v2 = vadd.f32 %v1479_v54, %v1345_v16  ;;  %vm1225_vm1 = vcmp.eq.s32.totalorder %v4209_v38, %v1118_v11 }
 0x12d   :  { %6032 = vst [vmem:[#allocation7_spill] sm:$0xff] %v4602_v7  ;;  %v4606_v15 = vpop.f32.mrf.mxu1  ;;  %1738 = vmax.xlane.f32.xlu1 %v1737_v31  ;;  %v1741_v19 = vmax.f32 %v1740_v61, %v4586_v43  ;;  %v1350_v27 = vsel %vm1222_vm10, %v4602_v7, 0.0  ;;  %v1121_v43 = vpop.permute.xlu1 %1120 }
 0x12e   :  { %6033 = vst [vmem:[#allocation8_spill] sm:$0xff] %v4606_v15  ;;  %v4612_v23 = vpop.f32.mrf.mxu0  ;;  %1476 = vadd.xlane.f32.xlu0 %v1475_v10  ;;  %v1484_v31 = vadd.f32 %v1483_v6, %v1348_v22  ;;  %v1352_v54 = vsel %vm1224_vm12, %v4606_v15, 0.0  ;;  %vm1226_vm15 = vcmp.eq.s32.totalorder %v4200_v34, %v1121_v43  ;;  %vm1227_vm0 = vcmp.eq.s32.totalorder %v4203_v35, %v1121_v43 }
 0x12f   :  { %6034 = vst [vmem:[#allocation9_spill] sm:$0xff] %v4612_v23  ;;  %v1351_v33 = vsel %vm1223_vm11, %v4612_v23, 0.0  ;;  %v1745_v46 = vmax.f32 %v4602_v7, %v4612_v23  ;;  %v4619_v50 = vpop.f32.mrf.mxu1  ;;  %v1742_v56 = vmax.f32 %v1741_v19, %v4599_v0  ;;  %v1349_v19 = vsel %vm1221_vm14, %v4599_v0, 0.0 }
 0x130   :  { %6035 = vst [vmem:[#allocation10_spill] sm:$0xff] %v4619_v50  ;;  %v1488_v55 = vadd.f32 %v1351_v33, %v1350_v27  ;;  %v4623_v61 = vpop.f32.mrf.mxu0  ;;  %v1485_v7 = vadd.f32 %v1484_v31, %v1349_v19  ;;  %vm1228_vm2 = vcmp.eq.s32.totalorder %v4206_v36, %v1121_v43  ;;  %vm1229_vm6 = vcmp.eq.s32.totalorder %v4209_v38, %v1121_v43 }
 0x131   :  { %6036 = vst [vmem:[#allocation11_spill] sm:$0xff] %v4623_v61  ;;  %v4626_v10 = vpop.f32.mrf.mxu1  ;;  %1481 = vadd.xlane.f32.xlu1 %v1480_v2  ;;  %v1746_v16 = vmax.f32 %v1745_v46, %v4606_v15  ;;  %v1354_v22 = vsel %vm1226_vm15, %v4623_v61, 0.0  ;;  %v1127_v0 = vpop.permute.xlu1 %1126 }
 0x132   :  { %6037 = vst [vmem:[#allocation12_spill] sm:$0xff] %v4626_v10  ;;  %v4631_v23 = vpop.f32.mrf.mxu0  ;;  %1743 = vmax.xlane.f32.xlu0 %v1742_v56  ;;  %v1489_v6 = vadd.f32 %v1488_v55, %v1352_v54  ;;  %v1124_v56 = vpop.permute.xlu0 %1123  ;;  %v1353_v54 = vsel %vm1225_vm1, %v4619_v50, 0.0  ;;  %vm1234_vm7 = vcmp.eq.s32.totalorder %v4200_v34, %v1127_v0  ;;  %vm1235_vm8 = vcmp.eq.s32.totalorder %v4203_v35, %v1127_v0 }
 0x133   :  { %6038 = vst [vmem:[#allocation13_spill] sm:$0xff] %v4631_v23  ;;  %v1355_v27 = vsel %vm1227_vm0, %v4631_v23, 0.0  ;;  %v1750_v2 = vmax.f32 %v4623_v61, %v4631_v23  ;;  %v4639_v33 = vpop.f32.mrf.mxu1  ;;  %v1747_v30 = vmax.f32 %v1746_v16, %v4619_v50  ;;  %v1356_v61 = vsel %vm1228_vm2, %v4626_v10, 0.0 }
 0x134   :  { %6039 = vst [vmem:[#allocation14_spill] sm:$0xff] %v4639_v33  ;;  %v1493_v46 = vadd.f32 %v1355_v27, %v1354_v22  ;;  %v4642_v15 = vpop.f32.mrf.mxu0  ;;  %vm1230_vm3 = vcmp.eq.s32.totalorder %v4200_v34, %v1124_v56  ;;  %vm1231_vm4 = vcmp.eq.s32.totalorder %v4203_v35, %v1124_v56  ;;  %v1490_v11 = vadd.f32 %v1489_v6, %v1353_v54 }
 0x135   :  { %6040 = vst [vmem:[#allocation15_spill] sm:$0xff] %v4642_v15  ;;  %v4646_v55 = vpop.f32.mrf.mxu1  ;;  %1748 = vmax.xlane.f32.xlu1 %v1747_v30  ;;  %v1751_v23 = vmax.f32 %v1750_v2, %v4626_v10  ;;  %v1358_v31 = vsel %vm1230_vm3, %v4642_v15, 0.0  ;;  %vm1232_vm5 = vcmp.eq.s32.totalorder %v4206_v36, %v1124_v56  ;;  %vm1233_vm9 = vcmp.eq.s32.totalorder %v4209_v38, %v1124_v56 }
 0x136   :  { %6041 = vst [vmem:[#allocation16_spill] sm:$0xff] %v4646_v55  ;;  %v4652_v16 = vpop.f32.mrf.mxu0  ;;  %1486 = vadd.xlane.f32.xlu0 %v1485_v7  ;;  %v1494_v50 = vadd.f32 %v1493_v46, %v1356_v61  ;;  %v1360_v7 = vsel %vm1232_vm5, %v4646_v55, 0.0  ;;  %vm1236_vm10 = vcmp.eq.s32.totalorder %v4206_v36, %v1127_v0  ;;  %vm1237_vm15 = vcmp.eq.s32.totalorder %v4209_v38, %v1127_v0 }
 0x137   :  { %6042 = vst [vmem:[#allocation17_spill] sm:$0xff] %v4652_v16  ;;  %v1359_v19 = vsel %vm1231_vm4, %v4652_v16, 0.0  ;;  %v1755_v22 = vmax.f32 %v4642_v15, %v4652_v16  ;;  %v4659_v27 = vpop.f32.mrf.mxu1  ;;  %v1752_v2 = vmax.f32 %v1751_v23, %v4639_v33  ;;  %v1357_v23 = vsel %vm1229_vm6, %v4639_v33, 0.0  ;;  %v1133_v33 = vpop.permute.xlu1 %1132 }
 0x138   :  { %6043 = vst [vmem:[#allocation18_spill] sm:$0xff] %v4659_v27  ;;  %v1498_v30 = vadd.f32 %v1359_v19, %v1358_v31  ;;  %v4663_v10 = vpop.f32.mrf.mxu0  ;;  %v1495_v15 = vadd.f32 %v1494_v50, %v1357_v23  ;;  %vm1242_vm1 = vcmp.eq.s32.totalorder %v4200_v34, %v1133_v33  ;;  %vm1243_vm2 = vcmp.eq.s32.totalorder %v4203_v35, %v1133_v33 }
 0x139   :  { %6044 = vst [vmem:[#allocation19_spill] sm:$0xff] %v4663_v10  ;;  %v4666_v6 = vpop.f32.mrf.mxu1  ;;  %1491 = vadd.xlane.f32.xlu1 %v1490_v11  ;;  %v1756_v54 = vmax.f32 %v1755_v22, %v4646_v55  ;;  %v1362_v46 = vsel %vm1234_vm7, %v4663_v10, 0.0  ;;  %vm1244_vm3 = vcmp.eq.s32.totalorder %v4206_v36, %v1133_v33  ;;  %vm1245_vm4 = vcmp.eq.s32.totalorder %v4209_v38, %v1133_v33 }
 0x13a   :  { %6045 = vst [vmem:[#allocation20_spill] sm:$0xff] %v4666_v6  ;;  %v4671_v16 = vpop.f32.mrf.mxu0  ;;  %1753 = vmax.xlane.f32.xlu0 %v1752_v2  ;;  %v1499_v61 = vadd.f32 %v1498_v30, %v1360_v7  ;;  %v1130_v2 = vpop.permute.xlu0 %1129  ;;  %v1361_v7 = vsel %vm1233_vm9, %v4659_v27, 0.0 }
 0x13b   :  { %6046 = vst [vmem:[#allocation21_spill] sm:$0xff] %v4671_v16  ;;  %v1363_v31 = vsel %vm1235_vm8, %v4671_v16, 0.0  ;;  %v1760_v11 = vmax.f32 %v4663_v10, %v4671_v16  ;;  %v4679_v19 = vpop.f32.mrf.mxu1  ;;  %v1757_v43 = vmax.f32 %v1756_v54, %v4659_v27  ;;  %v1364_v10 = vsel %vm1236_vm10, %v4666_v6, 0.0 }
 0x13c   :  { %v1503_v22 = vadd.f32 %v1363_v31, %v1362_v46  ;;  %v4682_v55 = vpop.f32.mrf.mxu0  ;;  %vm1238_vm11 = vcmp.eq.s32.totalorder %v4200_v34, %v1130_v2  ;;  %vm1239_vm12 = vcmp.eq.s32.totalorder %v4203_v35, %v1130_v2  ;;  %v1500_v50 = vadd.f32 %v1499_v61, %v1361_v7 }
 0x13d   :  { %6047 = vst [vmem:[#allocation22_spill] sm:$0xff] %v4682_v55  ;;  %v4686_v30 = vpop.f32.mrf.mxu1  ;;  %1758 = vmax.xlane.f32.xlu1 %v1757_v43  ;;  %v1761_v16 = vmax.f32 %v1760_v11, %v4666_v6  ;;  %v1366_v56 = vsel %vm1238_vm11, %v4682_v55, 0.0  ;;  %vm1240_vm14 = vcmp.eq.s32.totalorder %v4206_v36, %v1130_v2  ;;  %vm1241_vm0 = vcmp.eq.s32.totalorder %v4209_v38, %v1130_v2 }
 0x13e   :  { %6048 = vst [vmem:[#allocation23_spill] sm:$0xff] %v4686_v30  ;;  %v4692_v54 = vpop.f32.mrf.mxu0  ;;  %1496 = vadd.xlane.f32.xlu0 %v1495_v15  ;;  %v1504_v27 = vadd.f32 %v1503_v22, %v1364_v10  ;;  %v1368_v15 = vsel %vm1240_vm14, %v4686_v30, 0.0  ;;  %v1365_v10 = vsel %vm1237_vm15, %v4679_v19, 0.0 }
 0x13f   :  { %6049 = vst [vmem:[#allocation24_spill] sm:$0xff] %v4692_v54  ;;  %v1367_v23 = vsel %vm1239_vm12, %v4692_v54, 0.0  ;;  %v1765_v46 = vmax.f32 %v4682_v55, %v4692_v54  ;;  %v4699_v31 = vpop.f32.mrf.mxu1  ;;  %v1762_v11 = vmax.f32 %v1761_v16, %v4679_v19 }
 0x140   :  { %6050 = vst [vmem:[#allocation25_spill] sm:$0xff] %v4699_v31  ;;  %v1508_v43 = vadd.f32 %v1367_v23, %v1366_v56  ;;  %v4703_v6 = vpop.f32.mrf.mxu0 }
 0x141   :  { %6051 = vst [vmem:[#allocation26_spill] sm:$0xff] %v4703_v6  ;;  %v4706_v61 = vpop.f32.mrf.mxu1  ;;  %1501 = vadd.xlane.f32.xlu1 %v1500_v50  ;;  %v1766_v7 = vmax.f32 %v1765_v46, %v4686_v30  ;;  %v1370_v56 = vsel %vm1242_vm1, %v4703_v6, 0.0  ;;  %v1136_v30 = vpop.permute.xlu0 %1135 }
 0x142   :  { %6052 = vst [vmem:[#allocation27_spill] sm:$0xff] %v4706_v61  ;;  %v4712_v16 = vpop.f32.mrf.mxu0  ;;  %1763 = vmax.xlane.f32.xlu0 %v1762_v11  ;;  %v1509_v22 = vadd.f32 %v1508_v43, %v1368_v15  ;;  %v1505_v11 = vadd.f32 %v1504_v27, %v1365_v10  ;;  %v1372_v43 = vsel %vm1244_vm3, %v4706_v61, 0.0  ;;  %vm1246_vm5 = vcmp.eq.s32.totalorder %v4200_v34, %v1136_v30 }
 0x143   :  { %6053 = vst [vmem:[#allocation28_spill] sm:$0xff] %v4712_v16  ;;  %v1371_v50 = vsel %vm1243_vm2, %v4712_v16, 0.0  ;;  %v1770_v23 = vmax.f32 %v4703_v6, %v4712_v16  ;;  %v4720_v0 = vpop.f32.mrf.mxu1  ;;  %v1767_v46 = vmax.f32 %v1766_v7, %v4699_v31  ;;  %v1369_v7 = vsel %vm1241_vm0, %v4699_v31, 0.0 }
 0x144   :  { %6054 = vst [vmem:[#allocation29_spill] sm:$0xff] %v4720_v0  ;;  %v1513_v54 = vadd.f32 %v1371_v50, %v1370_v56  ;;  %v4724_v55 = vpop.f32.mrf.mxu0  ;;  %vm1247_vm6 = vcmp.eq.s32.totalorder %v4203_v35, %v1136_v30  ;;  %v1510_v27 = vadd.f32 %v1509_v22, %v1369_v7  ;;  %v1373_v33 = vsel %vm1245_vm4, %v4720_v0, 0.0 }
 0x145   :  { %6055 = vst [vmem:[#allocation30_spill] sm:$0xff] %v4724_v55  ;;  %v4729_v15 = vpop.f32.mrf.mxu1  ;;  %1768 = vmax.xlane.f32.xlu1 %v1767_v46  ;;  %v1771_v16 = vmax.f32 %v1770_v23, %v4706_v61  ;;  %v1374_v56 = vsel %vm1246_vm5, %v4724_v55, 0.0  ;;  %vm1248_vm7 = vcmp.eq.s32.totalorder %v4206_v36, %v1136_v30  ;;  %vm1249_vm8 = vcmp.eq.s32.totalorder %v4209_v38, %v1136_v30 }
 0x146   :  { %6056 = vst [vmem:[#allocation31_spill] sm:$0xff] %v4729_v15  ;;  %v4735_v6 = vpop.f32.mrf.mxu0  ;;  %1506 = vadd.xlane.f32.xlu0 %v1505_v11  ;;  %v1514_v10 = vadd.f32 %v1513_v54, %v1372_v43  ;;  %v1139_v11 = vpop.permute.xlu1 %1138  ;;  %v1376_v54 = vsel %vm1248_vm7, %v4729_v15, 0.0 }
 0x147   :  { %6057 = vst [vmem:[#allocation32_spill] sm:$0xff] %v4735_v6  ;;  %v1375_v50 = vsel %vm1247_vm6, %v4735_v6, 0.0  ;;  %v1775_v46 = vmax.f32 %v4724_v55, %v4735_v6  ;;  %v4743_v2 = vpop.f32.mrf.mxu1  ;;  %v1772_v23 = vmax.f32 %v1771_v16, %v4720_v0  ;;  %vm1250_vm9 = vcmp.eq.s32.totalorder %v4200_v34, %v1139_v11  ;;  %v1142_v55 = vpop.permute.xlu0 %1141 }
 0x148   :  { %6058 = vst [vmem:[#allocation33_spill] sm:$0xff] %v4743_v2  ;;  %v1518_v61 = vadd.f32 %v1375_v50, %v1374_v56  ;;  %v4747_v31 = vpop.f32.mrf.mxu0  ;;  %v1515_v22 = vadd.f32 %v1514_v10, %v1373_v33  ;;  %vm1251_vm10 = vcmp.eq.s32.totalorder %v4203_v35, %v1139_v11  ;;  %v1377_v16 = vsel %vm1249_vm8, %v4743_v2, 0.0 }
 0x149   :  { %6059 = vst [vmem:[#allocation34_spill] sm:$0xff] %v4747_v31  ;;  %v4750_v43 = vpop.f32.mrf.mxu1  ;;  %1511 = vadd.xlane.f32.xlu1 %v1510_v27  ;;  %v1776_v7 = vmax.f32 %v1775_v46, %v4729_v15  ;;  %v1378_v10 = vsel %vm1250_vm9, %v4747_v31, 0.0  ;;  %vm1252_vm11 = vcmp.eq.s32.totalorder %v4206_v36, %v1139_v11  ;;  %vm1253_vm12 = vcmp.eq.s32.totalorder %v4209_v38, %v1139_v11 }
 0x14a   :  { %6060 = vst [vmem:[#allocation35_spill] sm:$0xff] %v4750_v43  ;;  %v4755_v6 = vpop.f32.mrf.mxu0  ;;  %1773 = vmax.xlane.f32.xlu0 %v1772_v23  ;;  %v1519_v33 = vadd.f32 %v1518_v61, %v1376_v54  ;;  %v1380_v61 = vsel %vm1252_vm11, %v4750_v43, 0.0  ;;  %vm1254_vm14 = vcmp.eq.s32.totalorder %v4200_v34, %v1142_v55  ;;  %vm1255_vm15 = vcmp.eq.s32.totalorder %v4203_v35, %v1142_v55 }
 0x14b   :  { %6061 = vst [vmem:[#allocation36_spill] sm:$0xff] %v4755_v6  ;;  %v1379_v56 = vsel %vm1251_vm10, %v4755_v6, 0.0  ;;  %v1780_v27 = vmax.f32 %v4747_v31, %v4755_v6  ;;  %v4763_v50 = vpop.f32.mrf.mxu1  ;;  %v1777_v30 = vmax.f32 %v1776_v7, %v4743_v2  ;;  %vm1256_vm0 = vcmp.eq.s32.totalorder %v4206_v36, %v1142_v55  ;;  %v1145_v31 = vpop.permute.xlu1 %1144 }
 0x14c   :  { %6062 = vst [vmem:[#allocation37_spill] sm:$0xff] %v4763_v50  ;;  %v1523_v46 = vadd.f32 %v1379_v56, %v1378_v10  ;;  %v4767_v15 = vpop.f32.mrf.mxu0  ;;  %v1520_v23 = vadd.f32 %v1519_v33, %v1377_v16  ;;  %v1381_v7 = vsel %vm1253_vm12, %v4763_v50, 0.0  ;;  %vm1257_vm1 = vcmp.eq.s32.totalorder %v4209_v38, %v1142_v55 }
 0x14d   :  { %6063 = vst [vmem:[#allocation38_spill] sm:$0xff] %v4767_v15  ;;  %v4770_v54 = vpop.f32.mrf.mxu1  ;;  %1778 = vmax.xlane.f32.xlu1 %v1777_v30  ;;  %v1781_v0 = vmax.f32 %v1780_v27, %v4750_v43  ;;  %v1382_v33 = vsel %vm1254_vm14, %v4767_v15, 0.0  ;;  %vm1258_vm2 = vcmp.eq.s32.totalorder %v4200_v34, %v1145_v31  ;;  %vm1259_vm3 = vcmp.eq.s32.totalorder %v4203_v35, %v1145_v31 }
 0x14e   :  { %6064 = vst [vmem:[#allocation39_spill] sm:$0xff] %v4770_v54  ;;  %v4775_v6 = vpop.f32.mrf.mxu0  ;;  %1516 = vadd.xlane.f32.xlu0 %v1515_v22  ;;  %v1524_v16 = vadd.f32 %v1523_v46, %v1380_v61  ;;  %v1384_v46 = vsel %vm1256_vm0, %v4770_v54, 0.0  ;;  %vm1260_vm4 = vcmp.eq.s32.totalorder %v4206_v36, %v1145_v31  ;;  %vm1261_vm5 = vcmp.eq.s32.totalorder %v4209_v38, %v1145_v31 }
 0x14f   :  { %6065 = vst [vmem:[#allocation40_spill] sm:$0xff] %v4775_v6  ;;  %v1383_v10 = vsel %vm1255_vm15, %v4775_v6, 0.0  ;;  %v1785_v56 = vmax.f32 %v4767_v15, %v4775_v6  ;;  %v4783_v27 = vpop.f32.mrf.mxu1  ;;  %v1782_v11 = vmax.f32 %v1781_v0, %v4763_v50  ;;  %v1148_v15 = vpop.permute.xlu0 %1147 }
 0x150   :  { %6066 = vst [vmem:[#allocation41_spill] sm:$0xff] %v4783_v27  ;;  %v1528_v30 = vadd.f32 %v1383_v10, %v1382_v33  ;;  %v4787_v43 = vpop.f32.mrf.mxu0  ;;  %v1525_v22 = vadd.f32 %v1524_v16, %v1381_v7  ;;  %v1385_v0 = vsel %vm1257_vm1, %v4783_v27, 0.0  ;;  %vm1262_vm6 = vcmp.eq.s32.totalorder %v4200_v34, %v1148_v15 }
 0x151   :  { %6067 = vst [vmem:[#allocation42_spill] sm:$0xff] %v4787_v43  ;;  %v4790_v61 = vpop.f32.mrf.mxu1  ;;  %1521 = vadd.xlane.f32.xlu1 %v1520_v23  ;;  %v1786_v2 = vmax.f32 %v1785_v56, %v4770_v54  ;;  %v1386_v16 = vsel %vm1258_vm2, %v4787_v43, 0.0  ;;  %vm1263_vm7 = vcmp.eq.s32.totalorder %v4203_v35, %v1148_v15  ;;  %vm1264_vm8 = vcmp.eq.s32.totalorder %v4206_v36, %v1148_v15 }
 0x152   :  { %6068 = vst [vmem:[#allocation43_spill] sm:$0xff] %v4790_v61  ;;  %v4795_v6 = vpop.f32.mrf.mxu0  ;;  %1783 = vmax.xlane.f32.xlu0 %v1782_v11  ;;  %v1529_v7 = vadd.f32 %v1528_v30, %v1384_v46  ;;  %v1388_v30 = vsel %vm1260_vm4, %v4790_v61, 0.0  ;;  %vm1265_vm9 = vcmp.eq.s32.totalorder %v4209_v38, %v1148_v15 }
 0x153   :  { %6069 = vst [vmem:[#allocation44_spill] sm:$0xff] %v4795_v6  ;;  %v1387_v33 = vsel %vm1259_vm3, %v4795_v6, 0.0  ;;  %v1790_v23 = vmax.f32 %v4787_v43, %v4795_v6  ;;  %v4803_v10 = vpop.f32.mrf.mxu1  ;;  %v1787_v55 = vmax.f32 %v1786_v2, %v4783_v27  ;;  %v1151_v43 = vpop.permute.xlu1 %1150 }
 0x154   :  { %6070 = vst [vmem:[#allocation45_spill] sm:$0xff] %v4803_v10  ;;  %v1533_v56 = vadd.f32 %v1387_v33, %v1386_v16  ;;  %v4807_v54 = vpop.f32.mrf.mxu0  ;;  %v1530_v11 = vadd.f32 %v1529_v7, %v1385_v0  ;;  %v1389_v2 = vsel %vm1261_vm5, %v4803_v10, 0.0  ;;  %vm1266_vm10 = vcmp.eq.s32.totalorder %v4200_v34, %v1151_v43 }
 0x155   :  { %6071 = vst [vmem:[#allocation46_spill] sm:$0xff] %v4807_v54  ;;  %v4810_v46 = vpop.f32.mrf.mxu1  ;;  %1788 = vmax.xlane.f32.xlu1 %v1787_v55  ;;  %v1791_v50 = vmax.f32 %v1790_v23, %v4790_v61  ;;  %v1390_v7 = vsel %vm1262_vm6, %v4807_v54, 0.0  ;;  %vm1267_vm11 = vcmp.eq.s32.totalorder %v4203_v35, %v1151_v43  ;;  %vm1268_vm12 = vcmp.eq.s32.totalorder %v4206_v36, %v1151_v43 }
 0x156   :  { %6072 = vst [vmem:[#allocation47_spill] sm:$0xff] %v4810_v46  ;;  %v4815_v6 = vpop.f32.mrf.mxu0  ;;  %1526 = vadd.xlane.f32.xlu0 %v1525_v22  ;;  %v1534_v0 = vadd.f32 %v1533_v56, %v1388_v30  ;;  %v1392_v56 = vsel %vm1264_vm8, %v4810_v46, 0.0  ;;  %vm1269_vm14 = vcmp.eq.s32.totalorder %v4209_v38, %v1151_v43 }
 0x157   :  { %6073 = vst [vmem:[#allocation48_spill] sm:$0xff] %v4815_v6  ;;  %v1391_v16 = vsel %vm1263_vm7, %v4815_v6, 0.0  ;;  %v1795_v33 = vmax.f32 %v4807_v54, %v4815_v6  ;;  %v4823_v23 = vpop.f32.mrf.mxu1  ;;  %v1792_v31 = vmax.f32 %v1791_v50, %v4803_v10  ;;  %v1154_v54 = vpop.permute.xlu0 %1153 }
 0x158   :  { %6074 = vst [vmem:[#allocation49_spill] sm:$0xff] %v4823_v23  ;;  %v1538_v55 = vadd.f32 %v1391_v16, %v1390_v7  ;;  %v4827_v61 = vpop.f32.mrf.mxu0  ;;  %v1535_v22 = vadd.f32 %v1534_v0, %v1389_v2  ;;  %v1393_v50 = vsel %vm1265_vm9, %v4823_v23, 0.0  ;;  %vm1270_vm15 = vcmp.eq.s32.totalorder %v4200_v34, %v1154_v54 }
 0x159   :  { %6075 = vst [vmem:[#allocation50_spill] sm:$0xff] %v4827_v61  ;;  %v4830_v30 = vpop.f32.mrf.mxu1  ;;  %1531 = vadd.xlane.f32.xlu1 %v1530_v11  ;;  %v1796_v27 = vmax.f32 %v1795_v33, %v4810_v46  ;;  %v1394_v0 = vsel %vm1266_vm10, %v4827_v61, 0.0  ;;  %vm1271_vm0 = vcmp.eq.s32.totalorder %v4203_v35, %v1154_v54  ;;  %vm1272_vm1 = vcmp.eq.s32.totalorder %v4206_v36, %v1154_v54 }
 0x15a   :  { %6076 = vst [vmem:[#allocation51_spill] sm:$0xff] %v4830_v30  ;;  %v4835_v6 = vpop.f32.mrf.mxu0  ;;  %1793 = vmax.xlane.f32.xlu0 %v1792_v31  ;;  %v1539_v2 = vadd.f32 %v1538_v55, %v1392_v56  ;;  %v1396_v55 = vsel %vm1268_vm12, %v4830_v30, 0.0  ;;  %vm1273_vm2 = vcmp.eq.s32.totalorder %v4209_v38, %v1154_v54 }
 0x15b   :  { %6077 = vst [vmem:[#allocation52_spill] sm:$0xff] %v4835_v6  ;;  %v1395_v7 = vsel %vm1267_vm11, %v4835_v6, 0.0  ;;  %v1800_v11 = vmax.f32 %v4827_v61, %v4835_v6  ;;  %v4843_v16 = vpop.f32.mrf.mxu1  ;;  %v1797_v15 = vmax.f32 %v1796_v27, %v4823_v23  ;;  %v1157_v61 = vpop.permute.xlu1 %1156 }
 0x15c   :  { %6078 = vst [vmem:[#allocation53_spill] sm:$0xff] %v4843_v16  ;;  %v1543_v33 = vadd.f32 %v1395_v7, %v1394_v0  ;;  %v4847_v46 = vpop.f32.mrf.mxu0  ;;  %v1540_v31 = vadd.f32 %v1539_v2, %v1393_v50  ;;  %v1397_v27 = vsel %vm1269_vm14, %v4843_v16, 0.0  ;;  %vm1274_vm3 = vcmp.eq.s32.totalorder %v4200_v34, %v1157_v61 }
 0x15d   :  { %6079 = vst [vmem:[#allocation54_spill] sm:$0xff] %v4847_v46  ;;  %v4850_v56 = vpop.f32.mrf.mxu1  ;;  %1798 = vmax.xlane.f32.xlu1 %v1797_v15  ;;  %v1801_v10 = vmax.f32 %v1800_v11, %v4830_v30  ;;  %v1398_v2 = vsel %vm1270_vm15, %v4847_v46, 0.0  ;;  %vm1275_vm4 = vcmp.eq.s32.totalorder %v4203_v35, %v1157_v61  ;;  %vm1276_vm5 = vcmp.eq.s32.totalorder %v4206_v36, %v1157_v61 }
 0x15e   :  { %6080 = vst [vmem:[#allocation55_spill] sm:$0xff] %v4850_v56  ;;  %v4855_v6 = vpop.f32.mrf.mxu0  ;;  %1536 = vadd.xlane.f32.xlu0 %v1535_v22  ;;  %v1544_v50 = vadd.f32 %v1543_v33, %v1396_v55  ;;  %v1400_v33 = vsel %vm1272_vm1, %v4850_v56, 0.0  ;;  %vm1277_vm6 = vcmp.eq.s32.totalorder %v4209_v38, %v1157_v61 }
 0x15f   :  { %6081 = vst [vmem:[#allocation56_spill] sm:$0xff] %v4855_v6  ;;  %v1399_v0 = vsel %vm1271_vm0, %v4855_v6, 0.0  ;;  %v1805_v7 = vmax.f32 %v4847_v46, %v4855_v6  ;;  %v4863_v11 = vpop.f32.mrf.mxu1  ;;  %v1802_v43 = vmax.f32 %v1801_v10, %v4843_v16  ;;  %v1160_v46 = vpop.permute.xlu0 %1159 }
 0x160   :  { %6082 = vst [vmem:[#allocation57_spill] sm:$0xff] %v4863_v11  ;;  %v1548_v15 = vadd.f32 %v1399_v0, %v1398_v2  ;;  %v4867_v30 = vpop.f32.mrf.mxu0  ;;  %v1545_v22 = vadd.f32 %v1544_v50, %v1397_v27  ;;  %v1401_v10 = vsel %vm1273_vm2, %v4863_v11, 0.0  ;;  %vm1278_vm7 = vcmp.eq.s32.totalorder %v4200_v34, %v1160_v46 }
 0x161   :  { %6083 = vst [vmem:[#allocation58_spill] sm:$0xff] %v4867_v30  ;;  %v4870_v55 = vpop.f32.mrf.mxu1  ;;  %1541 = vadd.xlane.f32.xlu1 %v1540_v31  ;;  %v1806_v23 = vmax.f32 %v1805_v7, %v4850_v56  ;;  %v1402_v50 = vsel %vm1274_vm3, %v4867_v30, 0.0  ;;  %vm1279_vm8 = vcmp.eq.s32.totalorder %v4203_v35, %v1160_v46  ;;  %vm1280_vm9 = vcmp.eq.s32.totalorder %v4206_v36, %v1160_v46 }
 0x162   :  { %6084 = vst [vmem:[#allocation59_spill] sm:$0xff] %v4870_v55  ;;  %v4875_v6 = vpop.f32.mrf.mxu0  ;;  %1803 = vmax.xlane.f32.xlu0 %v1802_v43  ;;  %v1549_v27 = vadd.f32 %v1548_v15, %v1400_v33  ;;  %v1404_v15 = vsel %vm1276_vm5, %v4870_v55, 0.0  ;;  %vm1281_vm10 = vcmp.eq.s32.totalorder %v4209_v38, %v1160_v46 }
 0x163   :  { %6085 = vst [vmem:[#allocation60_spill] sm:$0xff] %v4875_v6  ;;  %v1403_v2 = vsel %vm1275_vm4, %v4875_v6, 0.0  ;;  %v1810_v31 = vmax.f32 %v4867_v30, %v4875_v6  ;;  %v4883_v0 = vpop.f32.mrf.mxu1  ;;  %v1807_v54 = vmax.f32 %v1806_v23, %v4863_v11  ;;  %v1163_v30 = vpop.permute.xlu1 %1162 }
 0x164   :  { %6086 = vst [vmem:[#allocation61_spill] sm:$0xff] %v4883_v0  ;;  %v1553_v7 = vadd.f32 %v1403_v2, %v1402_v50  ;;  %v4887_v56 = vpop.f32.mrf.mxu0  ;;  %v1550_v43 = vadd.f32 %v1549_v27, %v1401_v10  ;;  %v1405_v23 = vsel %vm1277_vm6, %v4883_v0, 0.0  ;;  %vm1282_vm11 = vcmp.eq.s32.totalorder %v4200_v34, %v1163_v30 }
 0x165   :  { %6087 = vst [vmem:[#allocation62_spill] sm:$0xff] %v4887_v56  ;;  %v4890_v33 = vpop.f32.mrf.mxu1  ;;  %1808 = vmax.xlane.f32.xlu1 %v1807_v54  ;;  %v1811_v16 = vmax.f32 %v1810_v31, %v4870_v55  ;;  %v1406_v27 = vsel %vm1278_vm7, %v4887_v56, 0.0  ;;  %vm1283_vm12 = vcmp.eq.s32.totalorder %v4203_v35, %v1163_v30  ;;  %vm1284_vm14 = vcmp.eq.s32.totalorder %v4206_v36, %v1163_v30 }
 0x166   :  { %6088 = vst [vmem:[#allocation63_spill] sm:$0xff] %v4890_v33  ;;  %v4895_v6 = vpop.f32.mrf.mxu0  ;;  %1546 = vadd.xlane.f32.xlu0 %v1545_v22  ;;  %v1554_v10 = vadd.f32 %v1553_v7, %v1404_v15  ;;  %v1408_v7 = vsel %vm1280_vm9, %v4890_v33, 0.0  ;;  %vm1285_vm15 = vcmp.eq.s32.totalorder %v4209_v38, %v1163_v30 }
 0x167   :  { %6089 = vst [vmem:[#allocation64_spill] sm:$0xff] %v4895_v6  ;;  %v1407_v50 = vsel %vm1279_vm8, %v4895_v6, 0.0  ;;  %v1815_v2 = vmax.f32 %v4887_v56, %v4895_v6  ;;  %v4903_v31 = vpop.f32.mrf.mxu1  ;;  %v1812_v61 = vmax.f32 %v1811_v16, %v4883_v0  ;;  %v1166_v56 = vpop.permute.xlu0 %1165 }
 0x168   :  { %6090 = vst [vmem:[#allocation65_spill] sm:$0xff] %v4903_v31  ;;  %v1558_v54 = vadd.f32 %v1407_v50, %v1406_v27  ;;  %v4907_v55 = vpop.f32.mrf.mxu0  ;;  %v1555_v22 = vadd.f32 %v1554_v10, %v1405_v23  ;;  %v1409_v16 = vsel %vm1281_vm10, %v4903_v31, 0.0  ;;  %vm1286_vm0 = vcmp.eq.s32.totalorder %v4200_v34, %v1166_v56 }
 0x169   :  { %6091 = vst [vmem:[#allocation66_spill] sm:$0xff] %v4907_v55  ;;  %v4910_v15 = vpop.f32.mrf.mxu1  ;;  %1551 = vadd.xlane.f32.xlu1 %v1550_v43  ;;  %v1816_v11 = vmax.f32 %v1815_v2, %v4890_v33  ;;  %v1410_v10 = vsel %vm1282_vm11, %v4907_v55, 0.0  ;;  %vm1287_vm1 = vcmp.eq.s32.totalorder %v4203_v35, %v1166_v56  ;;  %vm1288_vm2 = vcmp.eq.s32.totalorder %v4206_v36, %v1166_v56 }
 0x16a   :  { %6092 = vst [vmem:[#allocation67_spill] sm:$0xff] %v4910_v15  ;;  %v4915_v6 = vpop.f32.mrf.mxu0  ;;  %1813 = vmax.xlane.f32.xlu0 %v1812_v61  ;;  %v1559_v23 = vadd.f32 %v1558_v54, %v1408_v7  ;;  %v1412_v54 = vsel %vm1284_vm14, %v4910_v15, 0.0  ;;  %vm1289_vm3 = vcmp.eq.s32.totalorder %v4209_v38, %v1166_v56 }
 0x16b   :  { %6093 = vst [vmem:[#allocation68_spill] sm:$0xff] %v4915_v6  ;;  %v1411_v27 = vsel %vm1283_vm12, %v4915_v6, 0.0  ;;  %v1820_v43 = vmax.f32 %v4907_v55, %v4915_v6  ;;  %v4923_v50 = vpop.f32.mrf.mxu1  ;;  %v1817_v46 = vmax.f32 %v1816_v11, %v4903_v31  ;;  %v1169_v55 = vpop.permute.xlu1 %1168 }
 0x16c   :  { %6094 = vst [vmem:[#allocation69_spill] sm:$0xff] %v4923_v50  ;;  %v1563_v2 = vadd.f32 %v1411_v27, %v1410_v10  ;;  %v4927_v33 = vpop.f32.mrf.mxu0  ;;  %v1560_v61 = vadd.f32 %v1559_v23, %v1409_v16  ;;  %v1413_v11 = vsel %vm1285_vm15, %v4923_v50, 0.0  ;;  %vm1290_vm4 = vcmp.eq.s32.totalorder %v4200_v34, %v1169_v55 }
 0x16d   :  { %6095 = vst [vmem:[#allocation70_spill] sm:$0xff] %v4927_v33  ;;  %v4930_v7 = vpop.f32.mrf.mxu1  ;;  %1818 = vmax.xlane.f32.xlu1 %v1817_v46  ;;  %v1821_v0 = vmax.f32 %v1820_v43, %v4910_v15  ;;  %v1414_v23 = vsel %vm1286_vm0, %v4927_v33, 0.0  ;;  %vm1291_vm5 = vcmp.eq.s32.totalorder %v4203_v35, %v1169_v55  ;;  %vm1292_vm6 = vcmp.eq.s32.totalorder %v4206_v36, %v1169_v55 }
 0x16e   :  { %6096 = vst [vmem:[#allocation71_spill] sm:$0xff] %v4930_v7  ;;  %v4935_v6 = vpop.f32.mrf.mxu0  ;;  %1556 = vadd.xlane.f32.xlu0 %v1555_v22  ;;  %v1564_v16 = vadd.f32 %v1563_v2, %v1412_v54  ;;  %v1416_v2 = vsel %vm1288_vm2, %v4930_v7, 0.0  ;;  %vm1293_vm7 = vcmp.eq.s32.totalorder %v4209_v38, %v1169_v55 }
 0x16f   :  { %6097 = vst [vmem:[#allocation72_spill] sm:$0xff] %v4935_v6  ;;  %v1415_v10 = vsel %vm1287_vm1, %v4935_v6, 0.0  ;;  %v1825_v27 = vmax.f32 %v4927_v33, %v4935_v6  ;;  %v4943_v43 = vpop.f32.mrf.mxu1  ;;  %v1822_v30 = vmax.f32 %v1821_v0, %v4923_v50  ;;  %v1172_v33 = vpop.permute.xlu0 %1171 }
 0x170   :  { %6098 = vst [vmem:[#allocation73_spill] sm:$0xff] %v4943_v43  ;;  %v1568_v46 = vadd.f32 %v1415_v10, %v1414_v23  ;;  %v4947_v15 = vpop.f32.mrf.mxu0  ;;  %v1565_v22 = vadd.f32 %v1564_v16, %v1413_v11  ;;  %v1417_v0 = vsel %vm1289_vm3, %v4943_v43, 0.0  ;;  %vm1294_vm8 = vcmp.eq.s32.totalorder %v4200_v34, %v1172_v33 }
 0x171   :  { %6099 = vst [vmem:[#allocation74_spill] sm:$0xff] %v4947_v15  ;;  %v4950_v54 = vpop.f32.mrf.mxu1  ;;  %1561 = vadd.xlane.f32.xlu1 %v1560_v61  ;;  %v1826_v31 = vmax.f32 %v1825_v27, %v4930_v7  ;;  %v1418_v16 = vsel %vm1290_vm4, %v4947_v15, 0.0  ;;  %vm1295_vm9 = vcmp.eq.s32.totalorder %v4203_v35, %v1172_v33  ;;  %vm1296_vm10 = vcmp.eq.s32.totalorder %v4206_v36, %v1172_v33 }
 0x172   :  { %6100 = vst [vmem:[#allocation75_spill] sm:$0xff] %v4950_v54  ;;  %v4955_v6 = vpop.f32.mrf.mxu0  ;;  %1823 = vmax.xlane.f32.xlu0 %v1822_v30  ;;  %v1569_v11 = vadd.f32 %v1568_v46, %v1416_v2  ;;  %v1420_v46 = vsel %vm1292_vm6, %v4950_v54, 0.0  ;;  %vm1297_vm11 = vcmp.eq.s32.totalorder %v4209_v38, %v1172_v33 }
 0x173   :  { %6101 = vst [vmem:[#allocation76_spill] sm:$0xff] %v4955_v6  ;;  %v1419_v23 = vsel %vm1291_vm5, %v4955_v6, 0.0  ;;  %v1830_v61 = vmax.f32 %v4947_v15, %v4955_v6  ;;  %v4963_v10 = vpop.f32.mrf.mxu1  ;;  %v1827_v56 = vmax.f32 %v1826_v31, %v4943_v43  ;;  %v1175_v15 = vpop.permute.xlu1 %1174 }
 0x174   :  { %6102 = vst [vmem:[#allocation77_spill] sm:$0xff] %v4963_v10  ;;  %v1573_v27 = vadd.f32 %v1419_v23, %v1418_v16  ;;  %v4967_v7 = vpop.f32.mrf.mxu0  ;;  %v1570_v30 = vadd.f32 %v1569_v11, %v1417_v0  ;;  %v1421_v31 = vsel %vm1293_vm7, %v4963_v10, 0.0  ;;  %vm1298_vm12 = vcmp.eq.s32.totalorder %v4200_v34, %v1175_v15 }
 0x175   :  { %6103 = vst [vmem:[#allocation78_spill] sm:$0xff] %v4967_v7  ;;  %v4970_v2 = vpop.f32.mrf.mxu1  ;;  %1828 = vmax.xlane.f32.xlu1 %v1827_v56  ;;  %v1831_v50 = vmax.f32 %v1830_v61, %v4950_v54  ;;  %v1422_v11 = vsel %vm1294_vm8, %v4967_v7, 0.0  ;;  %vm1299_vm14 = vcmp.eq.s32.totalorder %v4203_v35, %v1175_v15  ;;  %vm1300_vm15 = vcmp.eq.s32.totalorder %v4206_v36, %v1175_v15 }
 0x176   :  { %6104 = vst [vmem:[#allocation79_spill] sm:$0xff] %v4970_v2  ;;  %v4975_v6 = vpop.f32.mrf.mxu0  ;;  %1566 = vadd.xlane.f32.xlu0 %v1565_v22  ;;  %v1574_v0 = vadd.f32 %v1573_v27, %v1420_v46  ;;  %v1424_v27 = vsel %vm1296_vm10, %v4970_v2, 0.0  ;;  %vm1301_vm0 = vcmp.eq.s32.totalorder %v4209_v38, %v1175_v15 }
 0x177   :  { %6105 = vst [vmem:[#allocation80_spill] sm:$0xff] %v4975_v6  ;;  %v1423_v16 = vsel %vm1295_vm9, %v4975_v6, 0.0  ;;  %v1835_v23 = vmax.f32 %v4967_v7, %v4975_v6  ;;  %v4983_v61 = vpop.f32.mrf.mxu1  ;;  %v1832_v55 = vmax.f32 %v1831_v50, %v4963_v10 }
 0x178   :  { %6106 = vst [vmem:[#allocation81_spill] sm:$0xff] %v4983_v61  ;;  %v1578_v56 = vadd.f32 %v1423_v16, %v1422_v11  ;;  %v4987_v54 = vpop.f32.mrf.mxu0  ;;  %v1575_v22 = vadd.f32 %v1574_v0, %v1421_v31  ;;  %v1425_v50 = vsel %vm1297_vm11, %v4983_v61, 0.0  ;;  %v1178_v0 = vpop.permute.xlu0 %1177 }
 0x179   :  { %6107 = vst [vmem:[#allocation82_spill] sm:$0xff] %v4987_v54  ;;  %v4990_v46 = vpop.f32.mrf.mxu1  ;;  %1571 = vadd.xlane.f32.xlu1 %v1570_v30  ;;  %v1836_v43 = vmax.f32 %v1835_v23, %v4970_v2  ;;  %v1426_v11 = vsel %vm1298_vm12, %v4987_v54, 0.0  ;;  %vm1302_vm1 = vcmp.eq.s32.totalorder %v4200_v34, %v1178_v0  ;;  %vm1303_vm2 = vcmp.eq.s32.totalorder %v4203_v35, %v1178_v0 }
 0x17a   :  { %6108 = vst [vmem:[#allocation83_spill] sm:$0xff] %v4990_v46  ;;  %v4995_v6 = vpop.f32.mrf.mxu0  ;;  %1833 = vmax.xlane.f32.xlu0 %v1832_v55  ;;  %v1579_v31 = vadd.f32 %v1578_v56, %v1424_v27  ;;  %v1428_v56 = vsel %vm1300_vm15, %v4990_v46, 0.0  ;;  %vm1304_vm3 = vcmp.eq.s32.totalorder %v4206_v36, %v1178_v0  ;;  %vm1305_vm4 = vcmp.eq.s32.totalorder %v4209_v38, %v1178_v0 }
 0x17b   :  { %6109 = vst [vmem:[#allocation84_spill] sm:$0xff] %v4995_v6  ;;  %v1427_v16 = vsel %vm1299_vm14, %v4995_v6, 0.0  ;;  %v1840_v30 = vmax.f32 %v4987_v54, %v4995_v6  ;;  %v5003_v23 = vpop.f32.mrf.mxu1  ;;  %v1837_v33 = vmax.f32 %v1836_v43, %v4983_v61 }
 0x17c   :  { %v1583_v2 = vadd.f32 %v1427_v16, %v1426_v11  ;;  %v5007_v7 = vpop.f32.mrf.mxu0  ;;  %v1580_v55 = vadd.f32 %v1579_v31, %v1425_v50  ;;  %v1429_v43 = vsel %vm1301_vm0, %v5003_v23, 0.0  ;;  %v1181_v50 = vpop.permute.xlu1 %1180 }
 0x17d   :  { %v5010_v27 = vpop.f32.mrf.mxu1  ;;  %1838 = vmax.xlane.f32.xlu1 %v1837_v33  ;;  %v1841_v10 = vmax.f32 %v1840_v30, %v4990_v46  ;;  %v1430_v31 = vsel %vm1302_vm1, %v5007_v7, 0.0  ;;  %vm1306_vm5 = vcmp.eq.s32.totalorder %v4200_v34, %v1181_v50  ;;  %vm1307_vm6 = vcmp.eq.s32.totalorder %v4203_v35, %v1181_v50 }
 0x17e   :  { %v5015_v6 = vpop.f32.mrf.mxu0  ;;  %1576 = vadd.xlane.f32.xlu0 %v1575_v22  ;;  %v1584_v11 = vadd.f32 %v1583_v2, %v1428_v56  ;;  %v1432_v2 = vsel %vm1304_vm3, %v5010_v27, 0.0  ;;  %vm1308_vm7 = vcmp.eq.s32.totalorder %v4206_v36, %v1181_v50  ;;  %vm1309_vm8 = vcmp.eq.s32.totalorder %v4209_v38, %v1181_v50  ;;  %v5052_v36 = vld [vmem:[#allocation2] sm:$0xff]  ;;  %v1055_v50 = vld [vmem:[#allocation4 + $0x8] sm:$0xff] }
 0x17f   :  { %6110 = vst [vmem:[#allocation85_spill] sm:$0xff] %v5015_v6  ;;  %v1431_v16 = vsel %vm1303_vm2, %v5015_v6, 0.0  ;;  %v1845_v30 = vmax.f32 %v5007_v7, %v5015_v6  ;;  %v5023_v33 = vpop.f32.mrf.mxu1  ;;  %v1842_v15 = vmax.f32 %v1841_v10, %v5003_v23 }
 0x180   :  { %v1588_v46 = vadd.f32 %v1431_v16, %v1430_v31  ;;  %v5027_v54 = vpop.f32.mrf.mxu0  ;;  %v1585_v22 = vadd.f32 %v1584_v11, %v1429_v43  ;;  %v1433_v10 = vsel %vm1305_vm4, %v5023_v33, 0.0 }
 0x181   :  { %v5030_v56 = vpop.f32.mrf.mxu1  ;;  %1581 = vadd.xlane.f32.xlu1 %v1580_v55  ;;  %v1846_v61 = vmax.f32 %v1845_v30, %v5010_v27  ;;  %v1434_v43 = vsel %vm1306_vm5, %v5027_v54, 0.0 }
 0x182   :  { %v5035_v6 = vpop.f32.mrf.mxu0  ;;  %1843 = vmax.xlane.f32.xlu0 %v1842_v15  ;;  %v1589_v31 = vadd.f32 %v1588_v46, %v1432_v2  ;;  %v1436_v35 = vsel %vm1308_vm7, %v5030_v56, 0.0 }
 0x183   :  { %6111 = vst [vmem:[#allocation86_spill] sm:$0xff] %v5035_v6  ;;  %v1435_v11 = vsel %vm1307_vm6, %v5035_v6, 0.0  ;;  %v1850_v55 = vmax.f32 %v5027_v54, %v5035_v6  ;;  %v1847_v16 = vmax.f32 %v1846_v61, %v5023_v33  ;;  %v5045_v0 = vpop.f32.mrf.mxu1 }
 0x184   :  { %v1593_v34 = vadd.f32 %v1435_v11, %v1434_v43  ;;  %v1590_v30 = vadd.f32 %v1589_v31, %v1433_v10  ;;  %v1437_v2 = vsel %vm1309_vm8, %v5045_v0, 0.0  ;;  %v1054_v10 = vld [vmem:[#allocation4] sm:$0xff] }
 0x185   :  { %1848 = vmax.xlane.f32.xlu1 %v1847_v16  ;;  %v1851_v46 = vmax.f32 %v1850_v55, %v5030_v56 }
 0x186   :  { %1586 = vadd.xlane.f32.xlu0 %v1585_v22  ;;  %v1594_v15 = vadd.f32 %v1593_v34, %v1436_v35  ;;  %v5061_v22 = vld [vmem:[#allocation2 + $0x8] sm:$0xff]  ;;  %v5068_v35 = vld [vmem:[#allocation2 + $0x10] sm:$0xff] }
 0x187   :  { %v1852_v6 = vmax.f32 %v1851_v46, %v5045_v0  ;;  %6112 = vst [vmem:[#allocation87_spill] sm:$0xff] %v5061_v22  ;;  %v1056_v46 = vld [vmem:[#allocation4 + $0x10] sm:$0xff] }
 0x188   :  { %v1595_v61 = vadd.f32 %v1594_v15, %v1437_v2  ;;  %v1058_v15 = vld [vmem:[#allocation4 + $0x20] sm:$0xff] }
 0x189   :  { %1591 = vadd.xlane.f32.xlu1 %v1590_v30 }
 0x18a   :  { %1853 = vmax.xlane.f32.xlu0 %v1852_v6 }
 0x18e   :  { %1596 = vadd.xlane.f32.xlu0 %v1595_v61 }
 0x196   :  { %v1699_v31 = vpop.xlane.xlu1 %1698 }
 0x197   :  { %v5055_v43 = vmax.f32 %v5052_v36, %v1699_v31  ;;  %v1442_v11 = vpop.xlane.xlu0 %1441 }
 0x198   :  { %v1598_v55 = vadd.f32 %v1442_v11, %v1054_v10  ;;  %v5078_v11 = vld [vmem:[#allocation2 + $0x18] sm:$0xff] }
 0x199   :  { %2815 = vst.msk [vmem:[#allocation2] sm:$0xff] %vm19_vm13, %v5055_v43  ;;  %6114 = vst [vmem:[#allocation89_spill] sm:$0xff] %v5078_v11 }
 0x19a   :  { %1631 = vst.msk [vmem:[#allocation4] sm:$0xff] %vm19_vm13, %v1598_v55  ;;  %2049 = vperm.xlu1 %3370, %v5055_v43  }
 0x19b   :  { %v1447_v6 = vpop.xlane.xlu1 %1446  ;;  %v1704_v16 = vpop.xlane.xlu0 %1703 }
 0x19c   :  { %v1599_v34 = vadd.f32 %v1447_v6, %v1055_v50  ;;  %v5066_v30 = vmax.f32 %v5061_v22, %v1704_v16  ;;  %v5090_v16 = vld [vmem:[#allocation2 + $0x20] sm:$0xff] }
 0x19d   :  { %6116 = vst [vmem:[#allocation91_spill] sm:$0xff] %v5090_v16 }
 0x19e   :  { %6113 = vst [vmem:[#allocation88_spill] sm:$0xff] %v5066_v30  ;;  %1632 = vst.msk [vmem:[#allocation4 + $0x8] sm:$0xff] %vm19_vm13, %v1599_v34  ;;  %v1057_v34 = vld [vmem:[#allocation4 + $0x18] sm:$0xff] }
 0x19f   :  { %2816 = vst.msk [vmem:[#allocation2 + $0x8] sm:$0xff] %vm19_vm13, %v5066_v30  ;;  %v1709_v2 = vpop.xlane.xlu1 %1708  ;;  %v1452_v61 = vpop.xlane.xlu0 %1451 }
 0x1a0   :  { %v5076_v10 = vmax.f32 %v5068_v35, %v1709_v2  ;;  %v1600_v31 = vadd.f32 %v1452_v61, %v1056_v46  ;;  %v5105_v46 = vld [vmem:[#allocation2 + $0x28] sm:$0xff] }
 0x1a1   :  { %6118 = vst [vmem:[#allocation93_spill] sm:$0xff] %v5105_v46 }
 0x1a2   :  { %2817 = vst.msk [vmem:[#allocation2 + $0x10] sm:$0xff] %vm19_vm13, %v5076_v10  ;;  %1633 = vst.msk [vmem:[#allocation4 + $0x10] sm:$0xff] %vm19_vm13, %v1600_v31  ;;  %2059 = vperm.xlu1 %3370, %v5076_v10  }
 0x1a3   :  { %v1714_v50 = vpop.xlane.xlu0 %1713 }
 0x1a4   :  { %v5087_v6 = vmax.f32 %v5078_v11, %v1714_v50  ;;  %2054 = vperm.xlu0 %3369, %v5066_v30  }
 0x1a6   :  { %6115 = vst [vmem:[#allocation90_spill] sm:$0xff] %v5087_v6  ;;  %2818 = vst.msk [vmem:[#allocation2 + $0x18] sm:$0xff] %vm19_vm13, %v5087_v6  ;;  %v1719_v2 = vpop.xlane.xlu1 %1718  ;;  %2064 = vperm.xlu1 %3370, %v5087_v6  }
 0x1a7   :  { %v5098_v61 = vmax.f32 %v5090_v16, %v1719_v2  ;;  %v1457_v31 = vpop.xlane.xlu0 %1456 }
 0x1a8   :  { %v1601_v50 = vadd.f32 %v1457_v31, %v1057_v34  ;;  %v5111_v34 = vld [vmem:[#allocation2 + $0x30] sm:$0xff]  ;;  %v1059_v31 = vld [vmem:[#allocation4 + $0x28] sm:$0xff] }
 0x1a9   :  { %6117 = vst [vmem:[#allocation92_spill] sm:$0xff] %v5098_v61  ;;  %2819 = vst.msk [vmem:[#allocation2 + $0x20] sm:$0xff] %vm19_vm13, %v5098_v61  ;;  %2069 = vperm.xlu0 %3369, %v5098_v61  }
 0x1aa   :  { %1634 = vst.msk [vmem:[#allocation4 + $0x18] sm:$0xff] %vm19_vm13, %v1601_v50  ;;  %v1462_v38 = vpop.xlane.xlu1 %1461  ;;  %6120 = vst [vmem:[#allocation95_spill] sm:$0xff] %v5111_v34  ;;  %v1060_v50 = vld [vmem:[#allocation4 + $0x30] sm:$0xff] }
 0x1ab   :  { %v1602_v6 = vadd.f32 %v1462_v38, %v1058_v15  ;;  %v1724_v11 = vpop.xlane.xlu0 %1723 }
 0x1ac   :  { %v5109_v2 = vmax.f32 %v5105_v46, %v1724_v11 }
 0x1ad   :  { %1635 = vst.msk [vmem:[#allocation4 + $0x20] sm:$0xff] %vm19_vm13, %v1602_v6  ;;  %v5127_v6 = vld [vmem:[#allocation2 + $0x38] sm:$0xff] }
 0x1ae   :  { %6119 = vst [vmem:[#allocation94_spill] sm:$0xff] %v5109_v2  ;;  %2820 = vst.msk [vmem:[#allocation2 + $0x28] sm:$0xff] %vm19_vm13, %v5109_v2  ;;  %v1729_v61 = vpop.xlane.xlu1 %1728  ;;  %2074 = vperm.xlu1 %3370, %v5109_v2  }
 0x1af   :  { %v5120_v38 = vmax.f32 %v5111_v34, %v1729_v61  ;;  %v1467_v15 = vpop.xlane.xlu0 %1466  ;;  %6122 = vst [vmem:[#allocation97_spill] sm:$0xff] %v5127_v6 }
 0x1b0   :  { %v1603_v11 = vadd.f32 %v1467_v15, %v1059_v31  ;;  %v5133_v31 = vld [vmem:[#allocation2 + $0x40] sm:$0xff]  ;;  %v1061_v15 = vld [vmem:[#allocation4 + $0x38] sm:$0xff] }
 0x1b1   :  { %6121 = vst [vmem:[#allocation96_spill] sm:$0xff] %v5120_v38  ;;  %2821 = vst.msk [vmem:[#allocation2 + $0x30] sm:$0xff] %vm19_vm13, %v5120_v38  ;;  %2079 = vperm.xlu0 %3369, %v5120_v38  }
 0x1b2   :  { %1636 = vst.msk [vmem:[#allocation4 + $0x28] sm:$0xff] %vm19_vm13, %v1603_v11  ;;  %v1472_v55 = vpop.xlane.xlu1 %1471  ;;  %6124 = vst [vmem:[#allocation99_spill] sm:$0xff] %v5133_v31 }
 0x1b3   :  { %v1604_v2 = vadd.f32 %v1472_v55, %v1060_v50  ;;  %v1734_v46 = vpop.xlane.xlu0 %1733  ;;  %v1062_v50 = vld [vmem:[#allocation4 + $0x40] sm:$0xff] }
 0x1b4   :  { %v5131_v61 = vmax.f32 %v5127_v6, %v1734_v46 }
 0x1b5   :  { %1637 = vst.msk [vmem:[#allocation4 + $0x30] sm:$0xff] %vm19_vm13, %v1604_v2  ;;  %v5149_v2 = vld [vmem:[#allocation2 + $0x48] sm:$0xff] }
 0x1b6   :  { %6123 = vst [vmem:[#allocation98_spill] sm:$0xff] %v5131_v61  ;;  %2822 = vst.msk [vmem:[#allocation2 + $0x38] sm:$0xff] %vm19_vm13, %v5131_v61  ;;  %v1739_v38 = vpop.xlane.xlu1 %1738  ;;  %2084 = vperm.xlu1 %3370, %v5131_v61  }
 0x1b7   :  { %v5142_v55 = vmax.f32 %v5133_v31, %v1739_v38  ;;  %v1477_v11 = vpop.xlane.xlu0 %1476  ;;  %6126 = vst [vmem:[#allocation101_spill] sm:$0xff] %v5149_v2 }
 0x1b8   :  { %v1605_v46 = vadd.f32 %v1477_v11, %v1061_v15  ;;  %v5155_v15 = vld [vmem:[#allocation2 + $0x50] sm:$0xff]  ;;  %v1063_v11 = vld [vmem:[#allocation4 + $0x48] sm:$0xff] }
 0x1b9   :  { %6125 = vst [vmem:[#allocation100_spill] sm:$0xff] %v5142_v55  ;;  %2823 = vst.msk [vmem:[#allocation2 + $0x40] sm:$0xff] %vm19_vm13, %v5142_v55  ;;  %2089 = vperm.xlu0 %3369, %v5142_v55  }
 0x1ba   :  { %1638 = vst.msk [vmem:[#allocation4 + $0x38] sm:$0xff] %vm19_vm13, %v1605_v46  ;;  %v1482_v16 = vpop.xlane.xlu1 %1481  ;;  %6128 = vst [vmem:[#allocation103_spill] sm:$0xff] %v5155_v15 }
 0x1bb   :  { %v1606_v61 = vadd.f32 %v1482_v16, %v1062_v50  ;;  %v1744_v6 = vpop.xlane.xlu0 %1743  ;;  %v1064_v50 = vld [vmem:[#allocation4 + $0x50] sm:$0xff] }
 0x1bc   :  { %v5153_v38 = vmax.f32 %v5149_v2, %v1744_v6 }
 0x1bd   :  { %1639 = vst.msk [vmem:[#allocation4 + $0x40] sm:$0xff] %vm19_vm13, %v1606_v61  ;;  %v5171_v61 = vld [vmem:[#allocation2 + $0x58] sm:$0xff] }
 0x1be   :  { %6127 = vst [vmem:[#allocation102_spill] sm:$0xff] %v5153_v38  ;;  %2824 = vst.msk [vmem:[#allocation2 + $0x48] sm:$0xff] %vm19_vm13, %v5153_v38  ;;  %v1749_v55 = vpop.xlane.xlu1 %1748  ;;  %2094 = vperm.xlu1 %3370, %v5153_v38  }
 0x1bf   :  { %v5164_v16 = vmax.f32 %v5155_v15, %v1749_v55  ;;  %v1487_v46 = vpop.xlane.xlu0 %1486  ;;  %6130 = vst [vmem:[#allocation105_spill] sm:$0xff] %v5171_v61 }
 0x1c0   :  { %v1607_v6 = vadd.f32 %v1487_v46, %v1063_v11  ;;  %v5177_v11 = vld [vmem:[#allocation2 + $0x60] sm:$0xff]  ;;  %v1065_v46 = vld [vmem:[#allocation4 + $0x58] sm:$0xff] }
 0x1c1   :  { %6129 = vst [vmem:[#allocation104_spill] sm:$0xff] %v5164_v16  ;;  %2825 = vst.msk [vmem:[#allocation2 + $0x50] sm:$0xff] %vm19_vm13, %v5164_v16  ;;  %2099 = vperm.xlu0 %3369, %v5164_v16  }
 0x1c2   :  { %1640 = vst.msk [vmem:[#allocation4 + $0x48] sm:$0xff] %vm19_vm13, %v1607_v6  ;;  %v1492_v34 = vpop.xlane.xlu1 %1491  ;;  %6132 = vst [vmem:[#allocation107_spill] sm:$0xff] %v5177_v11 }
 0x1c3   :  { %v1608_v38 = vadd.f32 %v1492_v34, %v1064_v50  ;;  %v1754_v2 = vpop.xlane.xlu0 %1753  ;;  %v1066_v50 = vld [vmem:[#allocation4 + $0x60] sm:$0xff] }
 0x1c4   :  { %v5175_v55 = vmax.f32 %v5171_v61, %v1754_v2 }
 0x1c5   :  { %1641 = vst.msk [vmem:[#allocation4 + $0x50] sm:$0xff] %vm19_vm13, %v1608_v38  ;;  %v5193_v38 = vld [vmem:[#allocation2 + $0x68] sm:$0xff] }
 0x1c6   :  { %6131 = vst [vmem:[#allocation106_spill] sm:$0xff] %v5175_v55  ;;  %2826 = vst.msk [vmem:[#allocation2 + $0x58] sm:$0xff] %vm19_vm13, %v5175_v55  ;;  %v1759_v16 = vpop.xlane.xlu1 %1758  ;;  %2104 = vperm.xlu1 %3370, %v5175_v55  }
 0x1c7   :  { %v5186_v34 = vmax.f32 %v5177_v11, %v1759_v16  ;;  %v1497_v6 = vpop.xlane.xlu0 %1496  ;;  %6134 = vst [vmem:[#allocation109_spill] sm:$0xff] %v5193_v38 }
 0x1c8   :  { %v1609_v2 = vadd.f32 %v1497_v6, %v1065_v46  ;;  %v5199_v46 = vld [vmem:[#allocation2 + $0x70] sm:$0xff]  ;;  %v1067_v6 = vld [vmem:[#allocation4 + $0x68] sm:$0xff] }
 0x1c9   :  { %6133 = vst [vmem:[#allocation108_spill] sm:$0xff] %v5186_v34  ;;  %2827 = vst.msk [vmem:[#allocation2 + $0x60] sm:$0xff] %vm19_vm13, %v5186_v34  ;;  %2109 = vperm.xlu0 %3369, %v5186_v34  }
 0x1ca   :  { %1642 = vst.msk [vmem:[#allocation4 + $0x58] sm:$0xff] %vm19_vm13, %v1609_v2  ;;  %v1502_v31 = vpop.xlane.xlu1 %1501  ;;  %6136 = vst [vmem:[#allocation111_spill] sm:$0xff] %v5199_v46 }
 0x1cb   :  { %v1610_v55 = vadd.f32 %v1502_v31, %v1066_v50  ;;  %v1764_v61 = vpop.xlane.xlu0 %1763  ;;  %v1068_v50 = vld [vmem:[#allocation4 + $0x70] sm:$0xff] }
 0x1cc   :  { %v5197_v16 = vmax.f32 %v5193_v38, %v1764_v61 }
 0x1cd   :  { %1643 = vst.msk [vmem:[#allocation4 + $0x60] sm:$0xff] %vm19_vm13, %v1610_v55  ;;  %v5215_v55 = vld [vmem:[#allocation2 + $0x78] sm:$0xff] }
 0x1ce   :  { %6135 = vst [vmem:[#allocation110_spill] sm:$0xff] %v5197_v16  ;;  %2828 = vst.msk [vmem:[#allocation2 + $0x68] sm:$0xff] %vm19_vm13, %v5197_v16  ;;  %v1769_v34 = vpop.xlane.xlu1 %1768  ;;  %2114 = vperm.xlu1 %3370, %v5197_v16  }
 0x1cf   :  { %v5208_v31 = vmax.f32 %v5199_v46, %v1769_v34  ;;  %v1507_v2 = vpop.xlane.xlu0 %1506  ;;  %6138 = vst [vmem:[#allocation113_spill] sm:$0xff] %v5215_v55 }
 0x1d0   :  { %v1611_v61 = vadd.f32 %v1507_v2, %v1067_v6  ;;  %v5221_v6 = vld [vmem:[#allocation2 + $0x80] sm:$0xff]  ;;  %v1069_v2 = vld [vmem:[#allocation4 + $0x78] sm:$0xff] }
 0x1d1   :  { %6137 = vst [vmem:[#allocation112_spill] sm:$0xff] %v5208_v31  ;;  %2829 = vst.msk [vmem:[#allocation2 + $0x70] sm:$0xff] %vm19_vm13, %v5208_v31  ;;  %2119 = vperm.xlu0 %3369, %v5208_v31  }
 0x1d2   :  { %1644 = vst.msk [vmem:[#allocation4 + $0x68] sm:$0xff] %vm19_vm13, %v1611_v61  ;;  %v1512_v15 = vpop.xlane.xlu1 %1511  ;;  %6140 = vst [vmem:[#allocation115_spill] sm:$0xff] %v5221_v6 }
 0x1d3   :  { %v1612_v16 = vadd.f32 %v1512_v15, %v1068_v50  ;;  %v1774_v38 = vpop.xlane.xlu0 %1773  ;;  %v1070_v50 = vld [vmem:[#allocation4 + $0x80] sm:$0xff] }
 0x1d4   :  { %v5219_v34 = vmax.f32 %v5215_v55, %v1774_v38 }
 0x1d5   :  { %1645 = vst.msk [vmem:[#allocation4 + $0x70] sm:$0xff] %vm19_vm13, %v1612_v16  ;;  %v5237_v16 = vld [vmem:[#allocation2 + $0x88] sm:$0xff] }
 0x1d6   :  { %6139 = vst [vmem:[#allocation114_spill] sm:$0xff] %v5219_v34  ;;  %2830 = vst.msk [vmem:[#allocation2 + $0x78] sm:$0xff] %vm19_vm13, %v5219_v34  ;;  %v1779_v31 = vpop.xlane.xlu1 %1778  ;;  %2124 = vperm.xlu1 %3370, %v5219_v34  }
 0x1d7   :  { %v5230_v15 = vmax.f32 %v5221_v6, %v1779_v31  ;;  %v1517_v61 = vpop.xlane.xlu0 %1516  ;;  %6142 = vst [vmem:[#allocation117_spill] sm:$0xff] %v5237_v16 }
 0x1d8   :  { %v1613_v38 = vadd.f32 %v1517_v61, %v1069_v2  ;;  %v5243_v2 = vld [vmem:[#allocation2 + $0x90] sm:$0xff]  ;;  %v1071_v61 = vld [vmem:[#allocation4 + $0x88] sm:$0xff] }
 0x1d9   :  { %6141 = vst [vmem:[#allocation116_spill] sm:$0xff] %v5230_v15  ;;  %2831 = vst.msk [vmem:[#allocation2 + $0x80] sm:$0xff] %vm19_vm13, %v5230_v15  ;;  %2129 = vperm.xlu0 %3369, %v5230_v15  }
 0x1da   :  { %1646 = vst.msk [vmem:[#allocation4 + $0x78] sm:$0xff] %vm19_vm13, %v1613_v38  ;;  %v1522_v11 = vpop.xlane.xlu1 %1521  ;;  %6144 = vst [vmem:[#allocation119_spill] sm:$0xff] %v5243_v2 }
 0x1db   :  { %v1614_v34 = vadd.f32 %v1522_v11, %v1070_v50  ;;  %v1784_v55 = vpop.xlane.xlu0 %1783  ;;  %v1072_v50 = vld [vmem:[#allocation4 + $0x90] sm:$0xff] }
 0x1dc   :  { %v5241_v31 = vmax.f32 %v5237_v16, %v1784_v55 }
 0x1dd   :  { %1647 = vst.msk [vmem:[#allocation4 + $0x80] sm:$0xff] %vm19_vm13, %v1614_v34  ;;  %v5259_v34 = vld [vmem:[#allocation2 + $0x98] sm:$0xff] }
 0x1de   :  { %6143 = vst [vmem:[#allocation118_spill] sm:$0xff] %v5241_v31  ;;  %2832 = vst.msk [vmem:[#allocation2 + $0x88] sm:$0xff] %vm19_vm13, %v5241_v31  ;;  %v1789_v15 = vpop.xlane.xlu1 %1788  ;;  %2134 = vperm.xlu1 %3370, %v5241_v31  }
 0x1df   :  { %v5252_v11 = vmax.f32 %v5243_v2, %v1789_v15  ;;  %v1527_v38 = vpop.xlane.xlu0 %1526  ;;  %6146 = vst [vmem:[#allocation121_spill] sm:$0xff] %v5259_v34 }
 0x1e0   :  { %v1615_v55 = vadd.f32 %v1527_v38, %v1071_v61  ;;  %v5265_v61 = vld [vmem:[#allocation2 + $0xa0] sm:$0xff]  ;;  %v1073_v38 = vld [vmem:[#allocation4 + $0x98] sm:$0xff] }
 0x1e1   :  { %6145 = vst [vmem:[#allocation120_spill] sm:$0xff] %v5252_v11  ;;  %2833 = vst.msk [vmem:[#allocation2 + $0x90] sm:$0xff] %vm19_vm13, %v5252_v11  ;;  %2139 = vperm.xlu0 %3369, %v5252_v11  }
 0x1e2   :  { %1648 = vst.msk [vmem:[#allocation4 + $0x88] sm:$0xff] %vm19_vm13, %v1615_v55  ;;  %v1532_v46 = vpop.xlane.xlu1 %1531  ;;  %6148 = vst [vmem:[#allocation123_spill] sm:$0xff] %v5265_v61 }
 0x1e3   :  { %v1616_v31 = vadd.f32 %v1532_v46, %v1072_v50  ;;  %v1794_v16 = vpop.xlane.xlu0 %1793  ;;  %v1074_v50 = vld [vmem:[#allocation4 + $0xa0] sm:$0xff] }
 0x1e4   :  { %v5263_v15 = vmax.f32 %v5259_v34, %v1794_v16 }
 0x1e5   :  { %1649 = vst.msk [vmem:[#allocation4 + $0x90] sm:$0xff] %vm19_vm13, %v1616_v31  ;;  %v5281_v31 = vld [vmem:[#allocation2 + $0xa8] sm:$0xff] }
 0x1e6   :  { %6147 = vst [vmem:[#allocation122_spill] sm:$0xff] %v5263_v15  ;;  %2834 = vst.msk [vmem:[#allocation2 + $0x98] sm:$0xff] %vm19_vm13, %v5263_v15  ;;  %v1799_v11 = vpop.xlane.xlu1 %1798  ;;  %2144 = vperm.xlu1 %3370, %v5263_v15  }
 0x1e7   :  { %v5274_v46 = vmax.f32 %v5265_v61, %v1799_v11  ;;  %v1537_v55 = vpop.xlane.xlu0 %1536  ;;  %6150 = vst [vmem:[#allocation125_spill] sm:$0xff] %v5281_v31 }
 0x1e8   :  { %v1617_v16 = vadd.f32 %v1537_v55, %v1073_v38  ;;  %v5287_v38 = vld [vmem:[#allocation2 + $0xb0] sm:$0xff]  ;;  %v1075_v55 = vld [vmem:[#allocation4 + $0xa8] sm:$0xff] }
 0x1e9   :  { %6149 = vst [vmem:[#allocation124_spill] sm:$0xff] %v5274_v46  ;;  %2835 = vst.msk [vmem:[#allocation2 + $0xa0] sm:$0xff] %vm19_vm13, %v5274_v46  ;;  %2149 = vperm.xlu0 %3369, %v5274_v46  }
 0x1ea   :  { %1650 = vst.msk [vmem:[#allocation4 + $0x98] sm:$0xff] %vm19_vm13, %v1617_v16  ;;  %v1542_v6 = vpop.xlane.xlu1 %1541  ;;  %6152 = vst [vmem:[#allocation127_spill] sm:$0xff] %v5287_v38 }
 0x1eb   :  { %v1618_v15 = vadd.f32 %v1542_v6, %v1074_v50  ;;  %v1804_v34 = vpop.xlane.xlu0 %1803  ;;  %v1076_v50 = vld [vmem:[#allocation4 + $0xb0] sm:$0xff] }
 0x1ec   :  { %v5285_v11 = vmax.f32 %v5281_v31, %v1804_v34 }
 0x1ed   :  { %1651 = vst.msk [vmem:[#allocation4 + $0xa0] sm:$0xff] %vm19_vm13, %v1618_v15  ;;  %v5303_v15 = vld [vmem:[#allocation2 + $0xb8] sm:$0xff] }
 0x1ee   :  { %6151 = vst [vmem:[#allocation126_spill] sm:$0xff] %v5285_v11  ;;  %2836 = vst.msk [vmem:[#allocation2 + $0xa8] sm:$0xff] %vm19_vm13, %v5285_v11  ;;  %v1809_v46 = vpop.xlane.xlu1 %1808  ;;  %2154 = vperm.xlu1 %3370, %v5285_v11  }
 0x1ef   :  { %v5296_v6 = vmax.f32 %v5287_v38, %v1809_v46  ;;  %v1547_v16 = vpop.xlane.xlu0 %1546  ;;  %6154 = vst [vmem:[#allocation129_spill] sm:$0xff] %v5303_v15 }
 0x1f0   :  { %v1619_v34 = vadd.f32 %v1547_v16, %v1075_v55  ;;  %v5309_v55 = vld [vmem:[#allocation2 + $0xc0] sm:$0xff]  ;;  %v1077_v16 = vld [vmem:[#allocation4 + $0xb8] sm:$0xff] }
 0x1f1   :  { %6153 = vst [vmem:[#allocation128_spill] sm:$0xff] %v5296_v6  ;;  %2837 = vst.msk [vmem:[#allocation2 + $0xb0] sm:$0xff] %vm19_vm13, %v5296_v6  ;;  %2159 = vperm.xlu0 %3369, %v5296_v6  }
 0x1f2   :  { %1652 = vst.msk [vmem:[#allocation4 + $0xa8] sm:$0xff] %vm19_vm13, %v1619_v34  ;;  %v1552_v2 = vpop.xlane.xlu1 %1551  ;;  %6156 = vst [vmem:[#allocation131_spill] sm:$0xff] %v5309_v55 }
 0x1f3   :  { %v1620_v11 = vadd.f32 %v1552_v2, %v1076_v50  ;;  %v1814_v31 = vpop.xlane.xlu0 %1813  ;;  %v1078_v50 = vld [vmem:[#allocation4 + $0xc0] sm:$0xff] }
 0x1f4   :  { %v5307_v46 = vmax.f32 %v5303_v15, %v1814_v31 }
 0x1f5   :  { %1653 = vst.msk [vmem:[#allocation4 + $0xb0] sm:$0xff] %vm19_vm13, %v1620_v11  ;;  %v5325_v11 = vld [vmem:[#allocation2 + $0xc8] sm:$0xff] }
 0x1f6   :  { %6155 = vst [vmem:[#allocation130_spill] sm:$0xff] %v5307_v46  ;;  %2838 = vst.msk [vmem:[#allocation2 + $0xb8] sm:$0xff] %vm19_vm13, %v5307_v46  ;;  %v1819_v6 = vpop.xlane.xlu1 %1818  ;;  %2164 = vperm.xlu1 %3370, %v5307_v46  }
 0x1f7   :  { %v5318_v2 = vmax.f32 %v5309_v55, %v1819_v6  ;;  %v1557_v34 = vpop.xlane.xlu0 %1556  ;;  %6158 = vst [vmem:[#allocation133_spill] sm:$0xff] %v5325_v11 }
 0x1f8   :  { %v1621_v31 = vadd.f32 %v1557_v34, %v1077_v16  ;;  %v5331_v16 = vld [vmem:[#allocation2 + $0xd0] sm:$0xff]  ;;  %v1079_v34 = vld [vmem:[#allocation4 + $0xc8] sm:$0xff] }
 0x1f9   :  { %6157 = vst [vmem:[#allocation132_spill] sm:$0xff] %v5318_v2  ;;  %2839 = vst.msk [vmem:[#allocation2 + $0xc0] sm:$0xff] %vm19_vm13, %v5318_v2  ;;  %2169 = vperm.xlu0 %3369, %v5318_v2  }
 0x1fa   :  { %1654 = vst.msk [vmem:[#allocation4 + $0xb8] sm:$0xff] %vm19_vm13, %v1621_v31  ;;  %v1562_v61 = vpop.xlane.xlu1 %1561  ;;  %6160 = vst [vmem:[#allocation135_spill] sm:$0xff] %v5331_v16 }
 0x1fb   :  { %v1622_v46 = vadd.f32 %v1562_v61, %v1078_v50  ;;  %v1824_v15 = vpop.xlane.xlu0 %1823  ;;  %v1080_v50 = vld [vmem:[#allocation4 + $0xd0] sm:$0xff] }
 0x1fc   :  { %v5329_v6 = vmax.f32 %v5325_v11, %v1824_v15 }
 0x1fd   :  { %1655 = vst.msk [vmem:[#allocation4 + $0xc0] sm:$0xff] %vm19_vm13, %v1622_v46  ;;  %v5347_v46 = vld [vmem:[#allocation2 + $0xd8] sm:$0xff] }
 0x1fe   :  { %6159 = vst [vmem:[#allocation134_spill] sm:$0xff] %v5329_v6  ;;  %2840 = vst.msk [vmem:[#allocation2 + $0xc8] sm:$0xff] %vm19_vm13, %v5329_v6  ;;  %v1829_v2 = vpop.xlane.xlu1 %1828  ;;  %2174 = vperm.xlu1 %3370, %v5329_v6  }
 0x1ff   :  { %v5340_v61 = vmax.f32 %v5331_v16, %v1829_v2  ;;  %v1567_v31 = vpop.xlane.xlu0 %1566  ;;  %6162 = vst [vmem:[#allocation137_spill] sm:$0xff] %v5347_v46 }
 0x200   :  { %v1623_v15 = vadd.f32 %v1567_v31, %v1079_v34  ;;  %v5353_v34 = vld [vmem:[#allocation2 + $0xe0] sm:$0xff]  ;;  %v1081_v31 = vld [vmem:[#allocation4 + $0xd8] sm:$0xff] }
 0x201   :  { %6161 = vst [vmem:[#allocation136_spill] sm:$0xff] %v5340_v61  ;;  %2841 = vst.msk [vmem:[#allocation2 + $0xd0] sm:$0xff] %vm19_vm13, %v5340_v61  ;;  %2179 = vperm.xlu0 %3369, %v5340_v61  }
 0x202   :  { %1656 = vst.msk [vmem:[#allocation4 + $0xc8] sm:$0xff] %vm19_vm13, %v1623_v15  ;;  %v1572_v38 = vpop.xlane.xlu1 %1571  ;;  %6164 = vst [vmem:[#allocation139_spill] sm:$0xff] %v5353_v34 }
 0x203   :  { %v1624_v6 = vadd.f32 %v1572_v38, %v1080_v50  ;;  %v1834_v11 = vpop.xlane.xlu0 %1833  ;;  %v1082_v50 = vld [vmem:[#allocation4 + $0xe0] sm:$0xff] }
 0x204   :  { %v5351_v2 = vmax.f32 %v5347_v46, %v1834_v11 }
 0x205   :  { %1657 = vst.msk [vmem:[#allocation4 + $0xd0] sm:$0xff] %vm19_vm13, %v1624_v6  ;;  %v5369_v6 = vld [vmem:[#allocation2 + $0xe8] sm:$0xff] }
 0x206   :  { %6163 = vst [vmem:[#allocation138_spill] sm:$0xff] %v5351_v2  ;;  %2842 = vst.msk [vmem:[#allocation2 + $0xd8] sm:$0xff] %vm19_vm13, %v5351_v2  ;;  %v1839_v61 = vpop.xlane.xlu1 %1838  ;;  %2184 = vperm.xlu1 %3370, %v5351_v2  }
 0x207   :  { %v5362_v38 = vmax.f32 %v5353_v34, %v1839_v61  ;;  %v1577_v15 = vpop.xlane.xlu0 %1576  ;;  %6166 = vst [vmem:[#allocation141_spill] sm:$0xff] %v5369_v6 }
 0x208   :  { %v1625_v11 = vadd.f32 %v1577_v15, %v1081_v31  ;;  %v5375_v31 = vld [vmem:[#allocation2 + $0xf0] sm:$0xff]  ;;  %v1083_v15 = vld [vmem:[#allocation4 + $0xe8] sm:$0xff] }
 0x209   :  { %6165 = vst [vmem:[#allocation140_spill] sm:$0xff] %v5362_v38  ;;  %2843 = vst.msk [vmem:[#allocation2 + $0xe0] sm:$0xff] %vm19_vm13, %v5362_v38  ;;  %2189 = vperm.xlu0 %3369, %v5362_v38  }
 0x20a   :  { %1658 = vst.msk [vmem:[#allocation4 + $0xd8] sm:$0xff] %vm19_vm13, %v1625_v11  ;;  %v1582_v55 = vpop.xlane.xlu1 %1581  ;;  %6168 = vst [vmem:[#allocation143_spill] sm:$0xff] %v5375_v31 }
 0x20b   :  { %v1626_v2 = vadd.f32 %v1582_v55, %v1082_v50  ;;  %v1844_v46 = vpop.xlane.xlu0 %1843  ;;  %v1084_v50 = vld [vmem:[#allocation4 + $0xf0] sm:$0xff] }
 0x20c   :  { %v5373_v61 = vmax.f32 %v5369_v6, %v1844_v46 }
 0x20d   :  { %1659 = vst.msk [vmem:[#allocation4 + $0xe0] sm:$0xff] %vm19_vm13, %v1626_v2  ;;  %v5391_v2 = vld [vmem:[#allocation2 + $0xf8] sm:$0xff] }
 0x20e   :  { %6167 = vst [vmem:[#allocation142_spill] sm:$0xff] %v5373_v61  ;;  %2844 = vst.msk [vmem:[#allocation2 + $0xe8] sm:$0xff] %vm19_vm13, %v5373_v61  ;;  %v1849_v38 = vpop.xlane.xlu1 %1848  ;;  %2194 = vperm.xlu1 %3370, %v5373_v61  }
 0x20f   :  { %v5384_v55 = vmax.f32 %v5375_v31, %v1849_v38  ;;  %v1587_v11 = vpop.xlane.xlu0 %1586  ;;  %6170 = vst [vmem:[#allocation145_spill] sm:$0xff] %v5391_v2 }
 0x210   :  { %v1627_v46 = vadd.f32 %v1587_v11, %v1083_v15  ;;  %v1085_v15 = vld [vmem:[#allocation4 + $0xf8] sm:$0xff] }
 0x211   :  { %6169 = vst [vmem:[#allocation144_spill] sm:$0xff] %v5384_v55  ;;  %2845 = vst.msk [vmem:[#allocation2 + $0xf0] sm:$0xff] %vm19_vm13, %v5384_v55  ;;  %2199 = vperm.xlu0 %3369, %v5384_v55  }
 0x212   :  { %1660 = vst.msk [vmem:[#allocation4 + $0xe8] sm:$0xff] %vm19_vm13, %v1627_v46  ;;  %v1592_v16 = vpop.xlane.xlu1 %1591 }
 0x213   :  { %v1628_v61 = vadd.f32 %v1592_v16, %v1084_v50  ;;  %v1854_v6 = vpop.xlane.xlu0 %1853 }
 0x214   :  { %v5395_v38 = vmax.f32 %v5391_v2, %v1854_v6 }
 0x215   :  { %1661 = vst.msk [vmem:[#allocation4 + $0xf0] sm:$0xff] %vm19_vm13, %v1628_v61 }
 0x216   :  { %2846 = vst.msk [vmem:[#allocation2 + $0xf8] sm:$0xff] %vm19_vm13, %v5395_v38  ;;  %v2050_v34 = vpop.permute.xlu1 %2049  ;;  %2204 = vperm.xlu1 %3370, %v5395_v38  }
 0x217   :  { %v2207_v46 = vsub.f32 %v4211_v39, %v2050_v34  ;;  %v2208_v16 = vsub.f32 %v4218_v41, %v2050_v34  ;;  %v2209_v50 = vsub.f32 %v4215_v40, %v2050_v34  ;;  %v2210_v6 = vsub.f32 %v4224_v45, %v2050_v34  ;;  %v1597_v55 = vpop.xlane.xlu0 %1596 }
 0x218   :  { %v1629_v61 = vadd.f32 %v1597_v55, %v1085_v15 }
 0x219   :  { %v2335_v31 = vmul.f32 1.442695, %v2207_v46  ;;  %v2337_v30 = vmul.f32 1.442695, %v2208_v16  ;;  %v2339_v22 = vmul.f32 1.442695, %v2209_v50 }
 0x21a   :  { %1662 = vst.msk [vmem:[#allocation4 + $0xf8] sm:$0xff] %vm19_vm13, %v1629_v61  ;;  %v2341_v11 = vmul.f32 1.442695, %v2210_v6 }
 0x21b   :  { %3419 = vpow2.f32 %v2335_v31 }
 0x21c   :  { %3421 = vpow2.f32 %v2337_v30 }
 0x21d   :  { %v2060_v2 = vpop.permute.xlu1 %2059  ;;  %3423 = vpow2.f32 %v2339_v22 }
 0x21e   :  { %v2215_v39 = vsub.f32 %v4252_v62, %v2060_v2  ;;  %v2216_v41 = vsub.f32 %v4265_v3, %v2060_v2  ;;  %v2217_v40 = vsub.f32 %v4257_v1, %v2060_v2  ;;  %3425 = vpow2.f32 %v2341_v11 }
 0x21f   :  { %v2218_v45 = vsub.f32 %v4275_v9, %v2060_v2  ;;  %v2055_v34 = vpop.permute.xlu0 %2054 }
 0x220   :  { %v2351_v55 = vmul.f32 1.442695, %v2215_v39  ;;  %v2353_v15 = vmul.f32 1.442695, %v2216_v41  ;;  %v2355_v46 = vmul.f32 1.442695, %v2217_v40  ;;  %v2211_v16 = vsub.f32 %v4229_v48, %v2055_v34 }
 0x221   :  { %v2357_v31 = vmul.f32 1.442695, %v2218_v45  ;;  %v2212_v30 = vsub.f32 %v4240_v53, %v2055_v34  ;;  %v2213_v22 = vsub.f32 %v4232_v51, %v2055_v34  ;;  %v2214_v62 = vsub.f32 %v4248_v59, %v2055_v34  ;;  %v2065_v50 = vpop.permute.xlu1 %2064 }
 0x222   :  { %3427 = vpow2.f32 %v2351_v55  ;;  %v2343_v3 = vmul.f32 1.442695, %v2211_v16  ;;  %v2219_v1 = vsub.f32 %v4313_v13, %v2065_v50  ;;  %v2220_v2 = vsub.f32 %v4460_v20, %v2065_v50 }
 0x223   :  { %3429 = vpow2.f32 %v2353_v15  ;;  %v2345_v9 = vmul.f32 1.442695, %v2212_v30  ;;  %v2347_v11 = vmul.f32 1.442695, %v2213_v22  ;;  %v2221_v48 = vsub.f32 %v4325_v17, %v2065_v50 }
 0x224   :  { %3431 = vpow2.f32 %v2355_v46  ;;  %v2070_v6 = vpop.permute.xlu0 %2069  ;;  %v2349_v53 = vmul.f32 1.442695, %v2214_v62  ;;  %v2222_v51 = vsub.f32 %v4478_v26, %v2065_v50  ;;  %v2359_v59 = vmul.f32 1.442695, %v2219_v1 }
 0x225   :  { %3433 = vpow2.f32 %v2357_v31  ;;  %v2223_v61 = vsub.f32 %v4482_v29, %v2070_v6  ;;  %v2361_v39 = vmul.f32 1.442695, %v2220_v2  ;;  %v2224_v13 = vsub.f32 %v4491_v42, %v2070_v6 }
 0x226   :  { %3435 = vpow2.f32 %v2343_v3  ;;  %v2363_v20 = vmul.f32 1.442695, %v2221_v48  ;;  %v2225_v40 = vsub.f32 %v4486_v32, %v2070_v6  ;;  %v2365_v17 = vmul.f32 1.442695, %v2222_v51 }
 0x227   :  { %3437 = vpow2.f32 %v2345_v9  ;;  %v2226_v34 = vsub.f32 %v4498_v47, %v2070_v6  ;;  %v2367_v26 = vmul.f32 1.442695, %v2223_v61  ;;  %v2369_v46 = vmul.f32 1.442695, %v2224_v13 }
 0x228   :  { %v3420_v41 = vpop.eup %3419  ;;  %3439 = vpow2.f32 %v2347_v11  ;;  %v2371_v30 = vmul.f32 1.442695, %v2225_v40 }
 0x229   :  { %v3422_v45 = vpop.eup %3421  ;;  %3441 = vpow2.f32 %v2349_v53  ;;  %v2075_v55 = vpop.permute.xlu1 %2074  ;;  %v2373_v62 = vmul.f32 1.442695, %v2226_v34 }
 0x22a   :  { %3443 = vpow2.f32 %v2359_v59  ;;  %v2227_v15 = vsub.f32 %v4502_v52, %v2075_v55  ;;  %v3424_v29 = vpop.eup %3423  ;;  %v2228_v42 = vsub.f32 %v4511_v60, %v2075_v55  ;;  %v2591_v16 = vadd.f32 %v3422_v45, %v3420_v41 }
 0x22b   :  { %3445 = vpow2.f32 %v2361_v39  ;;  %v3426_v31 = vpop.eup %3425  ;;  %v2229_v32 = vsub.f32 %v4505_v57, %v2075_v55  ;;  %v2230_v47 = vsub.f32 %v4519_v5, %v2075_v55 }
 0x22c   :  { %3447 = vpow2.f32 %v2363_v20  ;;  %v2080_v22 = vpop.permute.xlu0 %2079  ;;  %v2375_v50 = vmul.f32 1.442695, %v2227_v15  ;;  %v2592_v3 = vadd.f32 %v3424_v29, %v2591_v16  ;;  %v2377_v9 = vmul.f32 1.442695, %v2228_v42 }
 0x22d   :  { %3449 = vpow2.f32 %v2365_v17  ;;  %v2231_v52 = vsub.f32 %v4522_v8, %v2080_v22  ;;  %v2232_v60 = vsub.f32 %v4532_v18, %v2080_v22  ;;  %v2379_v11 = vmul.f32 1.442695, %v2229_v32 }
 0x22e   :  { %3451 = vpow2.f32 %v2367_v26  ;;  %v2233_v57 = vsub.f32 %v4526_v12, %v2080_v22  ;;  %v2593_v48 = vadd.f32 %v3426_v31, %v2592_v3  ;;  %v2381_v53 = vmul.f32 1.442695, %v2230_v47 }
 0x22f   :  { %v3428_v1 = vpop.eup %3427  ;;  %3453 = vpow2.f32 %v2369_v46  ;;  %v2234_v5 = vsub.f32 %v4539_v24, %v2080_v22  ;;  %v2383_v61 = vmul.f32 1.442695, %v2231_v52  ;;  %v2385_v13 = vmul.f32 1.442695, %v2232_v60 }
 0x230   :  { %v3430_v2 = vpop.eup %3429  ;;  %3455 = vpow2.f32 %v2371_v30  ;;  %2594 = vadd.xlane.f32.xlu0 %v2593_v48  ;;  %v2387_v40 = vmul.f32 1.442695, %v2233_v57  ;;  %v6171_v57 = vld [vmem:[#allocation5_spill] sm:$0xff]  ;;  %v6172_v48 = vld [vmem:[#allocation6_spill] sm:$0xff] }
 0x231   :  { %v3432_v6 = vpop.eup %3431  ;;  %3457 = vpow2.f32 %v2373_v62  ;;  %v2085_v51 = vpop.permute.xlu1 %2084  ;;  %v2601_v59 = vadd.f32 %v3430_v2, %v3428_v1  ;;  %v2389_v55 = vmul.f32 1.442695, %v2234_v5 }
 0x232   :  { %v3434_v8 = vpop.eup %3433  ;;  %3459 = vpow2.f32 %v2375_v50  ;;  %v2235_v39 = vsub.f32 %v4543_v28, %v2085_v51  ;;  %v2236_v41 = vsub.f32 %v4551_v44, %v2085_v51  ;;  %v2237_v45 = vsub.f32 %v4546_v37, %v2085_v51 }
 0x233   :  { %v3436_v18 = vpop.eup %3435  ;;  %3461 = vpow2.f32 %v2377_v9  ;;  %v2602_v12 = vadd.f32 %v3432_v6, %v2601_v59  ;;  %v2238_v24 = vsub.f32 %v4559_v58, %v2085_v51 }
 0x234   :  { %v3438_v20 = vpop.eup %3437  ;;  %3463 = vpow2.f32 %v2379_v11  ;;  %v2090_v17 = vpop.permute.xlu0 %2089  ;;  %v2391_v26 = vmul.f32 1.442695, %v2235_v39  ;;  %v2393_v42 = vmul.f32 1.442695, %v2236_v41  ;;  %v2395_v37 = vmul.f32 1.442695, %v2237_v45 }
 0x235   :  { %v3440_v34 = vpop.eup %3439  ;;  %3465 = vpow2.f32 %v2381_v53  ;;  %v2239_v28 = vsub.f32 %v4562_v63, %v2090_v17  ;;  %v2240_v29 = vsub.f32 %v4572_v14, %v2090_v17  ;;  %v2603_v44 = vadd.f32 %v3434_v8, %v2602_v12  ;;  %v6174_v39 = vld [vmem:[#allocation9_spill] sm:$0xff] }
 0x236   :  { %v3442_v15 = vpop.eup %3441  ;;  %3467 = vpow2.f32 %v2383_v61  ;;  %v2596_v16 = vadd.f32 %v3438_v20, %v3436_v18  ;;  %v2397_v58 = vmul.f32 1.442695, %v2238_v24  ;;  %v2241_v30 = vsub.f32 %v4566_v4, %v2090_v17  ;;  %v6173_v61 = vld [vmem:[#allocation7_spill] sm:$0xff]  ;;  %v6175_v24 = vld [vmem:[#allocation8_spill] sm:$0xff] }
 0x237   :  { %v3444_v46 = vpop.eup %3443  ;;  %3469 = vpow2.f32 %v2385_v13  ;;  %2604 = vadd.xlane.f32.xlu0 %v2603_v44  ;;  %v2242_v22 = vsub.f32 %v4579_v21, %v2090_v17  ;;  %v2399_v50 = vmul.f32 1.442695, %v2239_v28  ;;  %v2401_v52 = vmul.f32 1.442695, %v2240_v29 }
 0x238   :  { %v3446_v31 = vpop.eup %3445  ;;  %3471 = vpow2.f32 %v2387_v40  ;;  %v2597_v47 = vadd.f32 %v3440_v34, %v2596_v16  ;;  %v2403_v11 = vmul.f32 1.442695, %v2241_v30  ;;  %v6177_v16 = vld [vmem:[#allocation11_spill] sm:$0xff]  ;;  %v6178_v30 = vld [vmem:[#allocation13_spill] sm:$0xff] }
 0x239   :  { %v3448_v32 = vpop.eup %3447  ;;  %3473 = vpow2.f32 %v2389_v55  ;;  %v2095_v62 = vpop.permute.xlu1 %2094  ;;  %v2606_v63 = vadd.f32 %v3446_v31, %v3444_v46  ;;  %v2405_v51 = vmul.f32 1.442695, %v2242_v22  ;;  %v6176_v55 = vld [vmem:[#allocation10_spill] sm:$0xff] }
 0x23a   :  { %v3450_v14 = vpop.eup %3449  ;;  %3475 = vpow2.f32 %v2391_v26  ;;  %v2243_v3 = vsub.f32 %v4583_v25, %v2095_v62  ;;  %v2244_v9 = vsub.f32 %v4591_v49, %v2095_v62  ;;  %v2598_v4 = vadd.f32 %v3442_v15, %v2597_v47  ;;  %v6179_v47 = vld [vmem:[#allocation12_spill] sm:$0xff] }
 0x23b   :  { %v3452_v1 = vpop.eup %3451  ;;  %3477 = vpow2.f32 %v2393_v42  ;;  %v2607_v60 = vadd.f32 %v3448_v32, %v2606_v63  ;;  %v2245_v21 = vsub.f32 %v6171_v57, %v2095_v62  ;;  %v2246_v6 = vsub.f32 %v6172_v48, %v2095_v62 }
 0x23c   :  { %v3454_v2 = vpop.eup %3453  ;;  %3479 = vpow2.f32 %v2395_v37  ;;  %v2100_v53 = vpop.permute.xlu0 %2099  ;;  %2599 = vadd.xlane.f32.xlu1 %v2598_v4  ;;  %v2407_v8 = vmul.f32 1.442695, %v2243_v3  ;;  %v2409_v41 = vmul.f32 1.442695, %v2244_v9 }
 0x23d   :  { %v3456_v5 = vpop.eup %3455  ;;  %3481 = vpow2.f32 %v2397_v58  ;;  %v2608_v59 = vadd.f32 %v3450_v14, %v2607_v60  ;;  %v2247_v49 = vsub.f32 %v6173_v61, %v2100_v53  ;;  %v2248_v18 = vsub.f32 %v6174_v39, %v2100_v53  ;;  %v6184_v39 = vld [vmem:[#allocation18_spill] sm:$0xff] }
 0x23e   :  { %v3458_v25 = vpop.eup %3457  ;;  %3483 = vpow2.f32 %v2399_v50  ;;  %v2611_v12 = vadd.f32 %v3454_v2, %v3452_v1  ;;  %v2411_v40 = vmul.f32 1.442695, %v2245_v21  ;;  %v2413_v45 = vmul.f32 1.442695, %v2246_v6  ;;  %v6180_v50 = vld [vmem:[#allocation14_spill] sm:$0xff]  ;;  %v6182_v21 = vld [vmem:[#allocation17_spill] sm:$0xff] }
 0x23f   :  { %v3460_v13 = vpop.eup %3459  ;;  %3485 = vpow2.f32 %v2401_v52  ;;  %2609 = vadd.xlane.f32.xlu0 %v2608_v59  ;;  %v2249_v17 = vsub.f32 %v6175_v24, %v2100_v53  ;;  %v2250_v26 = vsub.f32 %v6176_v55, %v2100_v53  ;;  %v2415_v46 = vmul.f32 1.442695, %v2247_v49  ;;  %v6185_v24 = vld [vmem:[#allocation19_spill] sm:$0xff] }
 0x240   :  { %v3462_v20 = vpop.eup %3461  ;;  %3487 = vpow2.f32 %v2403_v11  ;;  %v2612_v15 = vadd.f32 %v3456_v5, %v2611_v12  ;;  %v2417_v42 = vmul.f32 1.442695, %v2248_v18  ;;  %v6181_v11 = vld [vmem:[#allocation15_spill] sm:$0xff] }
 0x241   :  { %v3464_v34 = vpop.eup %3463  ;;  %3489 = vpow2.f32 %v2405_v51  ;;  %v2105_v28 = vpop.permute.xlu1 %2104  ;;  %v2616_v29 = vadd.f32 %v3462_v20, %v3460_v13  ;;  %v2419_v63 = vmul.f32 1.442695, %v2249_v17  ;;  %v2421_v9 = vmul.f32 1.442695, %v2250_v26  ;;  %v6186_v26 = vld [vmem:[#allocation21_spill] sm:$0xff] }
 0x242   :  { %v3466_v44 = vpop.eup %3465  ;;  %3491 = vpow2.f32 %v2407_v8  ;;  %v2251_v31 = vsub.f32 %v6177_v16, %v2105_v28  ;;  %v2613_v58 = vadd.f32 %v3458_v25, %v2612_v15  ;;  %v2252_v32 = vsub.f32 %v6178_v30, %v2105_v28  ;;  %v6183_v8 = vld [vmem:[#allocation16_spill] sm:$0xff] }
 0x243   :  { %v3468_v37 = vpop.eup %3467  ;;  %3493 = vpow2.f32 %v2409_v41  ;;  %v2617_v22 = vadd.f32 %v3464_v34, %v2616_v29  ;;  %v2253_v14 = vsub.f32 %v6179_v47, %v2105_v28  ;;  %v2254_v52 = vsub.f32 %v6180_v50, %v2105_v28  ;;  %v6189_v47 = vld [vmem:[#allocation24_spill] sm:$0xff] }
 0x244   :  { %v3470_v62 = vpop.eup %3469  ;;  %3495 = vpow2.f32 %v2411_v40  ;;  %v2110_v3 = vpop.permute.xlu0 %2109  ;;  %2614 = vadd.xlane.f32.xlu1 %v2613_v58  ;;  %v2423_v2 = vmul.f32 1.442695, %v2251_v31  ;;  %v2425_v53 = vmul.f32 1.442695, %v2252_v32 }
 0x245   :  { %v3472_v1 = vpop.eup %3471  ;;  %3497 = vpow2.f32 %v2413_v45  ;;  %v2618_v60 = vadd.f32 %v3466_v44, %v2617_v22  ;;  %v2255_v57 = vsub.f32 %v6181_v11, %v2110_v3  ;;  %v2256_v48 = vsub.f32 %v6182_v21, %v2110_v3  ;;  %v6191_v11 = vld [vmem:[#allocation25_spill] sm:$0xff] }
 0x246   :  { %v3474_v4 = vpop.eup %3473  ;;  %3499 = vpow2.f32 %v2415_v46  ;;  %v2621_v5 = vadd.f32 %v3470_v62, %v3468_v37  ;;  %v2427_v59 = vmul.f32 1.442695, %v2253_v14  ;;  %v2429_v25 = vmul.f32 1.442695, %v2254_v52  ;;  %v6187_v46 = vld [vmem:[#allocation20_spill] sm:$0xff]  ;;  %v6188_v62 = vld [vmem:[#allocation22_spill] sm:$0xff] }
 0x247   :  { %v3476_v6 = vpop.eup %3475  ;;  %3501 = vpow2.f32 %v2417_v42  ;;  %2619 = vadd.xlane.f32.xlu0 %v2618_v60  ;;  %v2257_v61 = vsub.f32 %v6183_v8, %v2110_v3  ;;  %v2258_v18 = vsub.f32 %v6184_v39, %v2110_v3  ;;  %v2431_v40 = vmul.f32 1.442695, %v2255_v57  ;;  %v6190_v60 = vld [vmem:[#allocation23_spill] sm:$0xff] }
 0x248   :  { %v3478_v51 = vpop.eup %3477  ;;  %3503 = vpow2.f32 %v2419_v63  ;;  %v2622_v13 = vadd.f32 %v3472_v1, %v2621_v5  ;;  %v2433_v45 = vmul.f32 1.442695, %v2256_v48 }
 0x249   :  { %v3480_v49 = vpop.eup %3479  ;;  %3505 = vpow2.f32 %v2421_v9  ;;  %v2115_v41 = vpop.permute.xlu1 %2114  ;;  %v2626_v12 = vadd.f32 %v3478_v51, %v3476_v6  ;;  %v2435_v44 = vmul.f32 1.442695, %v2257_v61  ;;  %v2437_v58 = vmul.f32 1.442695, %v2258_v18 }
 0x24a   :  { %v3482_v20 = vpop.eup %3481  ;;  %3507 = vpow2.f32 %v2423_v2  ;;  %v2259_v17 = vsub.f32 %v6185_v24, %v2115_v41  ;;  %v2623_v55 = vadd.f32 %v3474_v4, %v2622_v13  ;;  %v2260_v15 = vsub.f32 %v6186_v26, %v2115_v41 }
 0x24b   :  { %v3484_v34 = vpop.eup %3483  ;;  %3509 = vpow2.f32 %v2425_v53  ;;  %v2627_v28 = vadd.f32 %v3480_v49, %v2626_v12  ;;  %v2261_v42 = vsub.f32 %v6187_v46, %v2115_v41  ;;  %v2262_v16 = vsub.f32 %v4679_v19, %v2115_v41  ;;  %v6193_v49 = vld [vmem:[#allocation28_spill] sm:$0xff]  ;;  %v6194_v12 = vld [vmem:[#allocation27_spill] sm:$0xff] }
 0x24c   :  { %v3486_v29 = vpop.eup %3485  ;;  %3511 = vpow2.f32 %v2427_v59  ;;  %v2120_v31 = vpop.permute.xlu0 %2119  ;;  %2624 = vadd.xlane.f32.xlu1 %v2623_v55  ;;  %v2439_v22 = vmul.f32 1.442695, %v2259_v17  ;;  %v2441_v52 = vmul.f32 1.442695, %v2260_v15  ;;  %v6192_v59 = vld [vmem:[#allocation26_spill] sm:$0xff] }
 0x24d   :  { %v3488_v37 = vpop.eup %3487  ;;  %3513 = vpow2.f32 %v2429_v25  ;;  %v2628_v30 = vadd.f32 %v3482_v20, %v2627_v28  ;;  %v2263_v63 = vsub.f32 %v6188_v62, %v2120_v31  ;;  %v2264_v14 = vsub.f32 %v6189_v47, %v2120_v31  ;;  %v6196_v28 = vld [vmem:[#allocation30_spill] sm:$0xff] }
 0x24e   :  { %v3490_v32 = vpop.eup %3489  ;;  %3515 = vpow2.f32 %v2431_v40  ;;  %v2631_v3 = vadd.f32 %v3486_v29, %v3484_v34  ;;  %v2443_v19 = vmul.f32 1.442695, %v2261_v42  ;;  %v2445_v9 = vmul.f32 1.442695, %v2262_v16  ;;  %v6195_v40 = vld [vmem:[#allocation29_spill] sm:$0xff] }
 0x24f   :  { %v3492_v50 = vpop.eup %3491  ;;  %3517 = vpow2.f32 %v2433_v45  ;;  %2629 = vadd.xlane.f32.xlu0 %v2628_v30  ;;  %v2265_v4 = vsub.f32 %v6190_v60, %v2120_v31  ;;  %v2266_v57 = vsub.f32 %v6191_v11, %v2120_v31  ;;  %v2447_v5 = vmul.f32 1.442695, %v2263_v63  ;;  %v6199_v63 = vld [vmem:[#allocation33_spill] sm:$0xff]  ;;  %v6201_v11 = vld [vmem:[#allocation36_spill] sm:$0xff] }
 0x250   :  { %v3494_v1 = vpop.eup %3493  ;;  %3519 = vpow2.f32 %v2435_v44  ;;  %v2632_v21 = vadd.f32 %v3488_v37, %v2631_v3  ;;  %v2449_v51 = vmul.f32 1.442695, %v2264_v14  ;;  %v6197_v44 = vld [vmem:[#allocation32_spill] sm:$0xff] }
 0x251   :  { %v3496_v2 = vpop.eup %3495  ;;  %3521 = vpow2.f32 %v2437_v58  ;;  %v2125_v48 = vpop.permute.xlu1 %2124  ;;  %v2636_v6 = vadd.f32 %v3494_v1, %v3492_v50  ;;  %v2451_v41 = vmul.f32 1.442695, %v2265_v4  ;;  %v2453_v34 = vmul.f32 1.442695, %v2266_v57 }
 0x252   :  { %v3498_v53 = vpop.eup %3497  ;;  %3523 = vpow2.f32 %v2439_v22  ;;  %v2267_v25 = vsub.f32 %v6192_v59, %v2125_v48  ;;  %v2633_v61 = vadd.f32 %v3490_v32, %v2632_v21  ;;  %v2268_v39 = vsub.f32 %v6193_v49, %v2125_v48  ;;  %v6198_v32 = vld [vmem:[#allocation31_spill] sm:$0xff] }
 0x253   :  { %v3500_v8 = vpop.eup %3499  ;;  %3525 = vpow2.f32 %v2441_v52  ;;  %v2637_v18 = vadd.f32 %v3496_v2, %v2636_v6  ;;  %v2269_v20 = vsub.f32 %v6194_v12, %v2125_v48  ;;  %v2270_v45 = vsub.f32 %v6195_v40, %v2125_v48  ;;  %v6205_v12 = vld [vmem:[#allocation40_spill] sm:$0xff] }
 0x254   :  { %v3502_v13 = vpop.eup %3501  ;;  %3527 = vpow2.f32 %v2443_v19  ;;  %v2130_v24 = vpop.permute.xlu0 %2129  ;;  %2634 = vadd.xlane.f32.xlu1 %v2633_v61  ;;  %v2455_v15 = vmul.f32 1.442695, %v2267_v25  ;;  %v2457_v16 = vmul.f32 1.442695, %v2268_v39 }
 0x255   :  { %v3504_v17 = vpop.eup %3503  ;;  %3529 = vpow2.f32 %v2445_v9  ;;  %v2638_v55 = vadd.f32 %v3498_v53, %v2637_v18  ;;  %v2271_v29 = vsub.f32 %v6196_v28, %v2130_v24  ;;  %v2272_v46 = vsub.f32 %v6197_v44, %v2130_v24  ;;  %v6200_v9 = vld [vmem:[#allocation34_spill] sm:$0xff]  ;;  %v6202_v53 = vld [vmem:[#allocation35_spill] sm:$0xff] }
 0x256   :  { %v3506_v26 = vpop.eup %3505  ;;  %3531 = vpow2.f32 %v2447_v5  ;;  %v2641_v31 = vadd.f32 %v3502_v13, %v3500_v8  ;;  %v2459_v58 = vmul.f32 1.442695, %v2269_v20  ;;  %v2461_v30 = vmul.f32 1.442695, %v2270_v45  ;;  %v6204_v13 = vld [vmem:[#allocation38_spill] sm:$0xff] }
 0x257   :  { %v3508_v42 = vpop.eup %3507  ;;  %3533 = vpow2.f32 %v2449_v51  ;;  %2639 = vadd.xlane.f32.xlu0 %v2638_v55  ;;  %v2273_v22 = vsub.f32 %v6198_v32, %v2130_v24  ;;  %v2274_v47 = vsub.f32 %v6199_v63, %v2130_v24  ;;  %v2463_v1 = vmul.f32 1.442695, %v2271_v29  ;;  %v6203_v51 = vld [vmem:[#allocation37_spill] sm:$0xff]  ;;  %v6209_v63 = vld [vmem:[#allocation44_spill] sm:$0xff] }
 0x258   :  { %v3510_v37 = vpop.eup %3509  ;;  %3535 = vpow2.f32 %v2451_v41  ;;  %v2642_v14 = vadd.f32 %v3504_v17, %v2641_v31  ;;  %v2465_v19 = vmul.f32 1.442695, %v2272_v46  ;;  %v6207_v29 = vld [vmem:[#allocation41_spill] sm:$0xff] }
 0x259   :  { %v3512_v62 = vpop.eup %3511  ;;  %3537 = vpow2.f32 %v2453_v34  ;;  %v2135_v50 = vpop.permute.xlu1 %2134  ;;  %v2646_v52 = vadd.f32 %v3510_v37, %v3508_v42  ;;  %v2467_v6 = vmul.f32 1.442695, %v2273_v22  ;;  %v2469_v61 = vmul.f32 1.442695, %v2274_v47 }
 0x25a   :  { %v3514_v3 = vpop.eup %3513  ;;  %3539 = vpow2.f32 %v2455_v15  ;;  %v2275_v60 = vsub.f32 %v6200_v9, %v2135_v50  ;;  %v2643_v2 = vadd.f32 %v3506_v26, %v2642_v14  ;;  %v2276_v57 = vsub.f32 %v6201_v11, %v2135_v50  ;;  %v6206_v26 = vld [vmem:[#allocation39_spill] sm:$0xff] }
 0x25b   :  { %v3516_v4 = vpop.eup %3515  ;;  %3541 = vpow2.f32 %v2457_v16  ;;  %v2647_v21 = vadd.f32 %v3512_v62, %v2646_v52  ;;  %v2277_v5 = vsub.f32 %v6202_v53, %v2135_v50  ;;  %v2278_v59 = vsub.f32 %v6203_v51, %v2135_v50  ;;  %v6213_v53 = vld [vmem:[#allocation48_spill] sm:$0xff] }
 0x25c   :  { %v3518_v48 = vpop.eup %3517  ;;  %3543 = vpow2.f32 %v2459_v58  ;;  %v2140_v25 = vpop.permute.xlu0 %2139  ;;  %2644 = vadd.xlane.f32.xlu1 %v2643_v2  ;;  %v2471_v18 = vmul.f32 1.442695, %v2275_v60  ;;  %v2473_v45 = vmul.f32 1.442695, %v2276_v57 }
 0x25d   :  { %v3520_v8 = vpop.eup %3519  ;;  %3545 = vpow2.f32 %v2461_v30  ;;  %v2648_v49 = vadd.f32 %v3514_v3, %v2647_v21  ;;  %v2279_v41 = vsub.f32 %v6204_v13, %v2140_v25  ;;  %v2280_v20 = vsub.f32 %v6205_v12, %v2140_v25  ;;  %v6208_v30 = vld [vmem:[#allocation42_spill] sm:$0xff]  ;;  %v6210_v3 = vld [vmem:[#allocation43_spill] sm:$0xff] }
 0x25e   :  { %v3522_v39 = vpop.eup %3521  ;;  %3547 = vpow2.f32 %v2463_v1  ;;  %v2651_v24 = vadd.f32 %v3518_v48, %v3516_v4  ;;  %v2475_v34 = vmul.f32 1.442695, %v2277_v5  ;;  %v2477_v55 = vmul.f32 1.442695, %v2278_v59  ;;  %v6212_v48 = vld [vmem:[#allocation46_spill] sm:$0xff] }
 0x25f   :  { %v3524_v40 = vpop.eup %3523  ;;  %3549 = vpow2.f32 %v2465_v19  ;;  %2649 = vadd.xlane.f32.xlu0 %v2648_v49  ;;  %v2281_v15 = vsub.f32 %v6206_v26, %v2140_v25  ;;  %v2282_v44 = vsub.f32 %v6207_v29, %v2140_v25  ;;  %v2479_v37 = vmul.f32 1.442695, %v2279_v41  ;;  %v6211_v19 = vld [vmem:[#allocation45_spill] sm:$0xff]  ;;  %v6217_v29 = vld [vmem:[#allocation52_spill] sm:$0xff] }
 0x260   :  { %v3526_v17 = vpop.eup %3525  ;;  %3551 = vpow2.f32 %v2467_v6  ;;  %v2652_v46 = vadd.f32 %v3520_v8, %v2651_v24  ;;  %v2481_v58 = vmul.f32 1.442695, %v2280_v20  ;;  %v6215_v41 = vld [vmem:[#allocation49_spill] sm:$0xff] }
 0x261   :  { %v3528_v28 = vpop.eup %3527  ;;  %3553 = vpow2.f32 %v2469_v61  ;;  %v2145_v42 = vpop.permute.xlu1 %2144  ;;  %v2656_v16 = vadd.f32 %v3526_v17, %v3524_v40  ;;  %v2483_v52 = vmul.f32 1.442695, %v2281_v15  ;;  %v2485_v2 = vmul.f32 1.442695, %v2282_v44 }
 0x262   :  { %v3530_v31 = vpop.eup %3529  ;;  %3555 = vpow2.f32 %v2471_v18  ;;  %v2283_v32 = vsub.f32 %v6208_v30, %v2145_v42  ;;  %v2653_v62 = vadd.f32 %v3522_v39, %v2652_v46  ;;  %v2284_v47 = vsub.f32 %v6209_v63, %v2145_v42  ;;  %v6214_v39 = vld [vmem:[#allocation47_spill] sm:$0xff] }
 0x263   :  { %v3532_v22 = vpop.eup %3531  ;;  %3557 = vpow2.f32 %v2473_v45  ;;  %v2657_v14 = vadd.f32 %v3528_v28, %v2656_v16  ;;  %v2285_v1 = vsub.f32 %v6210_v3, %v2145_v42  ;;  %v2286_v9 = vsub.f32 %v6211_v19, %v2145_v42  ;;  %v6221_v3 = vld [vmem:[#allocation56_spill] sm:$0xff] }
 0x264   :  { %v3534_v50 = vpop.eup %3533  ;;  %3559 = vpow2.f32 %v2475_v34  ;;  %v2150_v60 = vpop.permute.xlu0 %2149  ;;  %2654 = vadd.xlane.f32.xlu1 %v2653_v62  ;;  %v2487_v21 = vmul.f32 1.442695, %v2283_v32  ;;  %v2489_v59 = vmul.f32 1.442695, %v2284_v47 }
 0x265   :  { %v3536_v4 = vpop.eup %3535  ;;  %3561 = vpow2.f32 %v2477_v55  ;;  %v2658_v11 = vadd.f32 %v3530_v31, %v2657_v14  ;;  %v2287_v6 = vsub.f32 %v6212_v48, %v2150_v60  ;;  %v2288_v5 = vsub.f32 %v6213_v53, %v2150_v60  ;;  %v6216_v55 = vld [vmem:[#allocation50_spill] sm:$0xff]  ;;  %v6218_v31 = vld [vmem:[#allocation51_spill] sm:$0xff] }
 0x266   :  { %v3538_v57 = vpop.eup %3537  ;;  %3563 = vpow2.f32 %v2479_v37  ;;  %v2661_v25 = vadd.f32 %v3534_v50, %v3532_v22  ;;  %v2491_v61 = vmul.f32 1.442695, %v2285_v1  ;;  %v2493_v49 = vmul.f32 1.442695, %v2286_v9  ;;  %v6220_v50 = vld [vmem:[#allocation54_spill] sm:$0xff] }
 0x267   :  { %v3540_v51 = vpop.eup %3539  ;;  %3565 = vpow2.f32 %v2481_v58  ;;  %2659 = vadd.xlane.f32.xlu0 %v2658_v11  ;;  %v2289_v18 = vsub.f32 %v6214_v39, %v2150_v60  ;;  %v2290_v12 = vsub.f32 %v6215_v41, %v2150_v60  ;;  %v2495_v17 = vmul.f32 1.442695, %v2287_v6  ;;  %v6219_v58 = vld [vmem:[#allocation53_spill] sm:$0xff]  ;;  %v6225_v41 = vld [vmem:[#allocation60_spill] sm:$0xff] }
 0x268   :  { %v3542_v8 = vpop.eup %3541  ;;  %3567 = vpow2.f32 %v2483_v52  ;;  %v2662_v20 = vadd.f32 %v3536_v4, %v2661_v25  ;;  %v2497_v34 = vmul.f32 1.442695, %v2288_v5  ;;  %v6223_v6 = vld [vmem:[#allocation57_spill] sm:$0xff] }
 0x269   :  { %v3544_v13 = vpop.eup %3543  ;;  %3569 = vpow2.f32 %v2485_v2  ;;  %v2155_v40 = vpop.permute.xlu1 %2154  ;;  %v2666_v45 = vadd.f32 %v3542_v8, %v3540_v51  ;;  %v2499_v16 = vmul.f32 1.442695, %v2289_v18  ;;  %v2501_v62 = vmul.f32 1.442695, %v2290_v12 }
 0x26a   :  { %v3546_v24 = vpop.eup %3545  ;;  %3571 = vpow2.f32 %v2487_v21  ;;  %v2291_v26 = vsub.f32 %v6216_v55, %v2155_v40  ;;  %v2663_v28 = vadd.f32 %v3538_v57, %v2662_v20  ;;  %v2292_v44 = vsub.f32 %v6217_v29, %v2155_v40  ;;  %v6222_v57 = vld [vmem:[#allocation55_spill] sm:$0xff] }
 0x26b   :  { %v3548_v15 = vpop.eup %3547  ;;  %3573 = vpow2.f32 %v2489_v59  ;;  %v2667_v46 = vadd.f32 %v3544_v13, %v2666_v45  ;;  %v2293_v37 = vsub.f32 %v6218_v31, %v2155_v40  ;;  %v2294_v30 = vsub.f32 %v6219_v58, %v2155_v40  ;;  %v6229_v31 = vld [vmem:[#allocation64_spill] sm:$0xff] }
 0x26c   :  { %v3550_v42 = vpop.eup %3549  ;;  %3575 = vpow2.f32 %v2491_v61  ;;  %v2160_v32 = vpop.permute.xlu0 %2159  ;;  %2664 = vadd.xlane.f32.xlu1 %v2663_v28  ;;  %v2503_v14 = vmul.f32 1.442695, %v2291_v26  ;;  %v2505_v9 = vmul.f32 1.442695, %v2292_v44 }
 0x26d   :  { %v3552_v22 = vpop.eup %3551  ;;  %3577 = vpow2.f32 %v2493_v49  ;;  %v2668_v63 = vadd.f32 %v3546_v24, %v2667_v46  ;;  %v2295_v52 = vsub.f32 %v6220_v50, %v2160_v32  ;;  %v2296_v1 = vsub.f32 %v6221_v3, %v2160_v32  ;;  %v6224_v49 = vld [vmem:[#allocation58_spill] sm:$0xff]  ;;  %v6226_v24 = vld [vmem:[#allocation59_spill] sm:$0xff] }
 0x26e   :  { %v3554_v47 = vpop.eup %3553  ;;  %3579 = vpow2.f32 %v2495_v17  ;;  %v2671_v60 = vadd.f32 %v3550_v42, %v3548_v15  ;;  %v2507_v2 = vmul.f32 1.442695, %v2293_v37  ;;  %v2509_v11 = vmul.f32 1.442695, %v2294_v30  ;;  %v6228_v42 = vld [vmem:[#allocation62_spill] sm:$0xff] }
 0x26f   :  { %v3556_v19 = vpop.eup %3555  ;;  %3581 = vpow2.f32 %v2497_v34  ;;  %2669 = vadd.xlane.f32.xlu0 %v2668_v63  ;;  %v2297_v21 = vsub.f32 %v6222_v57, %v2160_v32  ;;  %v2298_v53 = vsub.f32 %v6223_v6, %v2160_v32  ;;  %v2511_v8 = vmul.f32 1.442695, %v2295_v52  ;;  %v6227_v34 = vld [vmem:[#allocation61_spill] sm:$0xff]  ;;  %v6233_v6 = vld [vmem:[#allocation68_spill] sm:$0xff] }
 0x270   :  { %v3558_v4 = vpop.eup %3557  ;;  %3583 = vpow2.f32 %v2499_v16  ;;  %v2672_v5 = vadd.f32 %v3552_v22, %v2671_v60  ;;  %v2513_v61 = vmul.f32 1.442695, %v2296_v1  ;;  %v6231_v52 = vld [vmem:[#allocation65_spill] sm:$0xff] }
 0x271   :  { %v3560_v48 = vpop.eup %3559  ;;  %3585 = vpow2.f32 %v2501_v62  ;;  %v2165_v51 = vpop.permute.xlu1 %2164  ;;  %v2676_v59 = vadd.f32 %v3558_v4, %v3556_v19  ;;  %v2515_v45 = vmul.f32 1.442695, %v2297_v21  ;;  %v2517_v28 = vmul.f32 1.442695, %v2298_v53 }
 0x272   :  { %v3562_v25 = vpop.eup %3561  ;;  %3587 = vpow2.f32 %v2503_v14  ;;  %v2299_v39 = vsub.f32 %v6224_v49, %v2165_v51  ;;  %v2673_v13 = vadd.f32 %v3554_v47, %v2672_v5  ;;  %v2300_v12 = vsub.f32 %v6225_v41, %v2165_v51  ;;  %v6230_v47 = vld [vmem:[#allocation63_spill] sm:$0xff] }
 0x273   :  { %v3564_v18 = vpop.eup %3563  ;;  %3589 = vpow2.f32 %v2505_v9  ;;  %v2677_v20 = vadd.f32 %v3560_v48, %v2676_v59  ;;  %v2301_v17 = vsub.f32 %v6226_v24, %v2165_v51  ;;  %v2302_v55 = vsub.f32 %v6227_v34, %v2165_v51  ;;  %v6237_v24 = vld [vmem:[#allocation72_spill] sm:$0xff] }
 0x274   :  { %v3566_v40 = vpop.eup %3565  ;;  %3591 = vpow2.f32 %v2507_v2  ;;  %v2170_v26 = vpop.permute.xlu0 %2169  ;;  %2674 = vadd.xlane.f32.xlu1 %v2673_v13  ;;  %v2519_v46 = vmul.f32 1.442695, %v2299_v39  ;;  %v2521_v30 = vmul.f32 1.442695, %v2300_v12 }
 0x275   :  { %v3568_v15 = vpop.eup %3567  ;;  %3593 = vpow2.f32 %v2509_v11  ;;  %v2678_v29 = vadd.f32 %v3562_v25, %v2677_v20  ;;  %v2303_v16 = vsub.f32 %v6228_v42, %v2170_v26  ;;  %v2304_v37 = vsub.f32 %v6229_v31, %v2170_v26  ;;  %v6232_v11 = vld [vmem:[#allocation66_spill] sm:$0xff]  ;;  %v6234_v25 = vld [vmem:[#allocation67_spill] sm:$0xff] }
 0x276   :  { %v3570_v44 = vpop.eup %3569  ;;  %3595 = vpow2.f32 %v2511_v8  ;;  %v2681_v32 = vadd.f32 %v3566_v40, %v3564_v18  ;;  %v2523_v62 = vmul.f32 1.442695, %v2301_v17  ;;  %v2525_v63 = vmul.f32 1.442695, %v2302_v55  ;;  %v6236_v40 = vld [vmem:[#allocation70_spill] sm:$0xff] }
 0x277   :  { %v3572_v58 = vpop.eup %3571  ;;  %3597 = vpow2.f32 %v2513_v61  ;;  %2679 = vadd.xlane.f32.xlu0 %v2678_v29  ;;  %v2305_v14 = vsub.f32 %v6230_v47, %v2170_v26  ;;  %v2306_v3 = vsub.f32 %v6231_v52, %v2170_v26  ;;  %v2527_v4 = vmul.f32 1.442695, %v2303_v16  ;;  %v6235_v61 = vld [vmem:[#allocation69_spill] sm:$0xff]  ;;  %v6241_v52 = vld [vmem:[#allocation76_spill] sm:$0xff] }
 0x278   :  { %v3574_v22 = vpop.eup %3573  ;;  %3599 = vpow2.f32 %v2515_v45  ;;  %v2682_v1 = vadd.f32 %v3568_v15, %v2681_v32  ;;  %v2529_v2 = vmul.f32 1.442695, %v2304_v37  ;;  %v6239_v16 = vld [vmem:[#allocation73_spill] sm:$0xff] }
 0x279   :  { %v3576_v50 = vpop.eup %3575  ;;  %3601 = vpow2.f32 %v2517_v28  ;;  %v2175_v19 = vpop.permute.xlu1 %2174  ;;  %v2686_v9 = vadd.f32 %v3574_v22, %v3572_v58  ;;  %v2531_v59 = vmul.f32 1.442695, %v2305_v14  ;;  %v2533_v13 = vmul.f32 1.442695, %v2306_v3 }
 0x27a   :  { %v3578_v60 = vpop.eup %3577  ;;  %3603 = vpow2.f32 %v2519_v46  ;;  %v2307_v57 = vsub.f32 %v6232_v11, %v2175_v19  ;;  %v2683_v48 = vadd.f32 %v3570_v44, %v2682_v1  ;;  %v2308_v53 = vsub.f32 %v6233_v6, %v2175_v19  ;;  %v6238_v44 = vld [vmem:[#allocation71_spill] sm:$0xff] }
 0x27b   :  { %v3580_v21 = vpop.eup %3579  ;;  %3605 = vpow2.f32 %v2521_v30  ;;  %v2687_v5 = vadd.f32 %v3576_v50, %v2686_v9  ;;  %v2309_v8 = vsub.f32 %v6234_v25, %v2175_v19  ;;  %v2310_v49 = vsub.f32 %v6235_v61, %v2175_v19  ;;  %v6245_v25 = vld [vmem:[#allocation80_spill] sm:$0xff] }
 0x27c   :  { %v3582_v51 = vpop.eup %3581  ;;  %3607 = vpow2.f32 %v2523_v62  ;;  %v2180_v39 = vpop.permute.xlu0 %2179  ;;  %2684 = vadd.xlane.f32.xlu1 %v2683_v48  ;;  %v2535_v20 = vmul.f32 1.442695, %v2307_v57  ;;  %v2537_v55 = vmul.f32 1.442695, %v2308_v53 }
 0x27d   :  { %v3584_v18 = vpop.eup %3583  ;;  %3609 = vpow2.f32 %v2525_v63  ;;  %v2688_v41 = vadd.f32 %v3578_v60, %v2687_v5  ;;  %v2311_v45 = vsub.f32 %v6236_v40, %v2180_v39  ;;  %v2312_v17 = vsub.f32 %v6237_v24, %v2180_v39  ;;  %v6240_v63 = vld [vmem:[#allocation74_spill] sm:$0xff]  ;;  %v6242_v60 = vld [vmem:[#allocation75_spill] sm:$0xff] }
 0x27e   :  { %v3586_v12 = vpop.eup %3585  ;;  %3611 = vpow2.f32 %v2527_v4  ;;  %v2691_v26 = vadd.f32 %v3582_v51, %v3580_v21  ;;  %v2539_v28 = vmul.f32 1.442695, %v2309_v8  ;;  %v2541_v29 = vmul.f32 1.442695, %v2310_v49  ;;  %v6244_v51 = vld [vmem:[#allocation78_spill] sm:$0xff] }
 0x27f   :  { %v3588_v34 = vpop.eup %3587  ;;  %3613 = vpow2.f32 %v2529_v2  ;;  %2689 = vadd.xlane.f32.xlu0 %v2688_v41  ;;  %v2313_v46 = vsub.f32 %v6238_v44, %v2180_v39  ;;  %v2314_v31 = vsub.f32 %v6239_v16, %v2180_v39  ;;  %v2543_v22 = vmul.f32 1.442695, %v2311_v45  ;;  %v6243_v2 = vld [vmem:[#allocation77_spill] sm:$0xff]  ;;  %v6249_v16 = vld [vmem:[#allocation84_spill] sm:$0xff] }
 0x280   :  { %v3590_v15 = vpop.eup %3589  ;;  %3615 = vpow2.f32 %v2531_v59  ;;  %v2692_v37 = vadd.f32 %v3584_v18, %v2691_v26  ;;  %v2545_v62 = vmul.f32 1.442695, %v2312_v17  ;;  %v6247_v45 = vld [vmem:[#allocation81_spill] sm:$0xff] }
 0x281   :  { %v3592_v42 = vpop.eup %3591  ;;  %3617 = vpow2.f32 %v2533_v13  ;;  %v2185_v58 = vpop.permute.xlu1 %2184  ;;  %v2696_v30 = vadd.f32 %v3590_v15, %v3588_v34  ;;  %v2547_v9 = vmul.f32 1.442695, %v2313_v46  ;;  %v2549_v48 = vmul.f32 1.442695, %v2314_v31 }
 0x282   :  { %v3594_v32 = vpop.eup %3593  ;;  %3619 = vpow2.f32 %v2535_v20  ;;  %v2315_v47 = vsub.f32 %v6240_v63, %v2185_v58  ;;  %v2693_v50 = vadd.f32 %v3586_v12, %v2692_v37  ;;  %v2316_v3 = vsub.f32 %v6241_v52, %v2185_v58  ;;  %v6246_v12 = vld [vmem:[#allocation79_spill] sm:$0xff] }
 0x283   :  { %v3596_v14 = vpop.eup %3595  ;;  %3621 = vpow2.f32 %v2537_v55  ;;  %v2697_v1 = vadd.f32 %v3592_v42, %v2696_v30  ;;  %v2317_v4 = vsub.f32 %v6242_v60, %v2185_v58  ;;  %v2318_v11 = vsub.f32 %v6243_v2, %v2185_v58 }
 0x284   :  { %v3598_v19 = vpop.eup %3597  ;;  %3623 = vpow2.f32 %v2539_v28  ;;  %v2190_v57 = vpop.permute.xlu0 %2189  ;;  %2694 = vadd.xlane.f32.xlu1 %v2693_v50  ;;  %v2551_v5 = vmul.f32 1.442695, %v2315_v47  ;;  %v2553_v49 = vmul.f32 1.442695, %v2316_v3 }
 0x285   :  { %v3600_v21 = vpop.eup %3599  ;;  %3625 = vpow2.f32 %v2541_v29  ;;  %v2698_v6 = vadd.f32 %v3594_v32, %v2697_v1  ;;  %v2319_v59 = vsub.f32 %v6244_v51, %v2190_v57  ;;  %v2320_v8 = vsub.f32 %v6245_v25, %v2190_v57  ;;  %v6248_v29 = vld [vmem:[#allocation82_spill] sm:$0xff]  ;;  %v6250_v32 = vld [vmem:[#allocation83_spill] sm:$0xff] }
 0x286   :  { %v3602_v53 = vpop.eup %3601  ;;  %3627 = vpow2.f32 %v2543_v22  ;;  %v2701_v39 = vadd.f32 %v3598_v19, %v3596_v14  ;;  %v2555_v13 = vmul.f32 1.442695, %v2317_v4  ;;  %v2557_v41 = vmul.f32 1.442695, %v2318_v11  ;;  %v6251_v19 = vld [vmem:[#allocation85_spill] sm:$0xff] }
 0x287   :  { %v3604_v61 = vpop.eup %3603  ;;  %3629 = vpow2.f32 %v2545_v62  ;;  %2699 = vadd.xlane.f32.xlu0 %v2698_v6  ;;  %v2321_v20 = vsub.f32 %v6246_v12, %v2190_v57  ;;  %v2322_v24 = vsub.f32 %v6247_v45, %v2190_v57  ;;  %v2559_v15 = vmul.f32 1.442695, %v2319_v59 }
 0x288   :  { %v3606_v18 = vpop.eup %3605  ;;  %3631 = vpow2.f32 %v2547_v9  ;;  %v2702_v17 = vadd.f32 %v3600_v21, %v2701_v39  ;;  %v2561_v28 = vmul.f32 1.442695, %v2320_v8  ;;  %v6252_v39 = vld [vmem:[#allocation86_spill] sm:$0xff] }
 0x289   :  { %v3608_v40 = vpop.eup %3607  ;;  %3633 = vpow2.f32 %v2549_v48  ;;  %v2195_v34 = vpop.permute.xlu1 %2194  ;;  %v2706_v55 = vadd.f32 %v3606_v18, %v3604_v61  ;;  %v2563_v30 = vmul.f32 1.442695, %v2321_v20  ;;  %v2565_v47 = vmul.f32 1.442695, %v2322_v24 }
 0x28a   :  { %v3610_v26 = vpop.eup %3609  ;;  %3635 = vpow2.f32 %v2551_v5  ;;  %v2323_v44 = vsub.f32 %v6248_v29, %v2195_v34  ;;  %v2703_v42 = vadd.f32 %v3602_v53, %v2702_v17  ;;  %v2324_v31 = vsub.f32 %v6249_v16, %v2195_v34 }
 0x28b   :  { %v3612_v46 = vpop.eup %3611  ;;  %3637 = vpow2.f32 %v2553_v49  ;;  %v2707_v37 = vadd.f32 %v3608_v40, %v2706_v55  ;;  %v2325_v22 = vsub.f32 %v6250_v32, %v2195_v34  ;;  %v2326_v14 = vsub.f32 %v5003_v23, %v2195_v34 }
 0x28c   :  { %v3614_v58 = vpop.eup %3613  ;;  %3639 = vpow2.f32 %v2555_v13  ;;  %v2200_v62 = vpop.permute.xlu0 %2199  ;;  %2704 = vadd.xlane.f32.xlu1 %v2703_v42  ;;  %v2567_v3 = vmul.f32 1.442695, %v2323_v44  ;;  %v2569_v4 = vmul.f32 1.442695, %v2324_v31 }
 0x28d   :  { %v3616_v63 = vpop.eup %3615  ;;  %3641 = vpow2.f32 %v2557_v41  ;;  %v2708_v50 = vadd.f32 %v3610_v26, %v2707_v37  ;;  %v2327_v1 = vsub.f32 %v5007_v7, %v2200_v62  ;;  %v2328_v9 = vsub.f32 %v6251_v19, %v2200_v62 }
 0x28e   :  { %v3618_v52 = vpop.eup %3617  ;;  %3643 = vpow2.f32 %v2559_v15  ;;  %v2711_v2 = vadd.f32 %v3614_v58, %v3612_v46  ;;  %v2571_v57 = vmul.f32 1.442695, %v2325_v22  ;;  %v2329_v21 = vsub.f32 %v5010_v27, %v2200_v62 }
 0x28f   :  { %v3620_v60 = vpop.eup %3619  ;;  %3645 = vpow2.f32 %v2561_v28  ;;  %2709 = vadd.xlane.f32.xlu0 %v2708_v50  ;;  %v2330_v23 = vsub.f32 %v5023_v33, %v2200_v62  ;;  %v2573_v6 = vmul.f32 1.442695, %v2326_v14  ;;  %v2575_v59 = vmul.f32 1.442695, %v2327_v1 }
 0x290   :  { %v3622_v11 = vpop.eup %3621  ;;  %3647 = vpow2.f32 %v2563_v30  ;;  %v2712_v53 = vadd.f32 %v3616_v63, %v2711_v2  ;;  %v2577_v25 = vmul.f32 1.442695, %v2328_v9  ;;  %v2579_v33 = vmul.f32 1.442695, %v2329_v21 }
 0x291   :  { %v3624_v48 = vpop.eup %3623  ;;  %3649 = vpow2.f32 %v2565_v47  ;;  %v2205_v5 = vpop.permute.xlu1 %2204  ;;  %v2716_v7 = vadd.f32 %v3622_v11, %v3620_v60  ;;  %v2581_v41 = vmul.f32 1.442695, %v2330_v23  ;;  %v6253_v11 = vsub.f32 %v5052_v36, %v5055_v43  ;;  %v6255_v36 = vld [vmem:[#allocation87_spill] sm:$0xff]  ;;  %v6256_v43 = vld [vmem:[#allocation88_spill] sm:$0xff] }
 0x292   :  { %v3626_v51 = vpop.eup %3625  ;;  %3651 = vpow2.f32 %v2567_v3  ;;  %v2331_v8 = vsub.f32 %v5027_v54, %v2205_v5  ;;  %v2713_v49 = vadd.f32 %v3618_v52, %v2712_v53  ;;  %v2332_v18 = vsub.f32 %v6252_v39, %v2205_v5  ;;  %v6258_v39 = vld [vmem:[#allocation89_spill] sm:$0xff] }
 0x293   :  { %v3628_v61 = vpop.eup %3627  ;;  %3653 = vpow2.f32 %v2569_v4  ;;  %v2717_v27 = vadd.f32 %v3624_v48, %v2716_v7  ;;  %v2333_v20 = vsub.f32 %v5030_v56, %v2205_v5  ;;  %v2334_v34 = vsub.f32 %v5045_v0, %v2205_v5 }
 0x294   :  { %v3630_v13 = vpop.eup %3629  ;;  %3655 = vpow2.f32 %v2571_v57  ;;  %2714 = vadd.xlane.f32.xlu1 %v2713_v49  ;;  %v2583_v54 = vmul.f32 1.442695, %v2331_v8  ;;  %v2585_v55 = vmul.f32 1.442695, %v2332_v18  ;;  %v1951_v57 = vmul.f32 1.442695, %v6253_v11 }
 0x295   :  { %v3632_v12 = vpop.eup %3631  ;;  %3657 = vpow2.f32 %v2573_v6  ;;  %v2718_v40 = vadd.f32 %v3626_v51, %v2717_v27  ;;  %v2721_v45 = vadd.f32 %v3630_v13, %v3628_v61  ;;  %v2587_v29 = vmul.f32 1.442695, %v2333_v20  ;;  %v6259_v18 = vld [vmem:[#allocation90_spill] sm:$0xff]  ;;  %v6262_v20 = vld [vmem:[#allocation92_spill] sm:$0xff]  ;;  %v1891_v11 = vld [vmem:[#allocation3 + $0x20] sm:$0xff] }
 0x296   :  { %v3634_v24 = vpop.eup %3633  ;;  %3659 = vpow2.f32 %v2575_v59  ;;  %v2589_v16 = vmul.f32 1.442695, %v2334_v34  ;;  %v6254_v59 = vsub.f32 %v5068_v35, %v5076_v10  ;;  %v6257_v61 = vsub.f32 %v6255_v36, %v6256_v43  ;;  %v6279_v43 = vld [vmem:[#allocation103_spill] sm:$0xff] }
 0x297   :  { %v3636_v17 = vpop.eup %3635  ;;  %3661 = vpow2.f32 %v2577_v25  ;;  %2719 = vadd.xlane.f32.xlu0 %v2718_v40  ;;  %v2722_v26 = vadd.f32 %v3632_v12, %v2721_v45  ;;  %v6260_v27 = vsub.f32 %v6258_v39, %v6259_v18  ;;  %v6261_v12 = vld [vmem:[#allocation91_spill] sm:$0xff]  ;;  %v6264_v45 = vld [vmem:[#allocation93_spill] sm:$0xff] }
 0x298   :  { %v3638_v15 = vpop.eup %3637  ;;  %3663 = vpow2.f32 %v2579_v33  ;;  %v1955_v25 = vmul.f32 1.442695, %v6254_v59  ;;  %v1953_v49 = vmul.f32 1.442695, %v6257_v61  ;;  %v6263_v40 = vsub.f32 %v6261_v12, %v6262_v20  ;;  %v6280_v61 = vld [vmem:[#allocation104_spill] sm:$0xff]  ;;  %v6282_v12 = vld [vmem:[#allocation105_spill] sm:$0xff] }
 0x299   :  { %v3640_v28 = vpop.eup %3639  ;;  %3665 = vpow2.f32 %v2581_v41  ;;  %v2723_v44 = vadd.f32 %v3634_v24, %v2722_v26  ;;  %v2726_v46 = vadd.f32 %v3638_v15, %v3636_v17  ;;  %v1957_v13 = vmul.f32 1.442695, %v6260_v27  ;;  %v1887_v41 = vld [vmem:[#allocation3] sm:$0xff]  ;;  %v6265_v24 = vld [vmem:[#allocation94_spill] sm:$0xff]  ;;  %v1889_v15 = vld [vmem:[#allocation3 + $0x10] sm:$0xff] }
 0x29a   :  { %v3642_v56 = vpop.eup %3641  ;;  %3667 = vpow2.f32 %v2583_v54  ;;  %v1959_v35 = vmul.f32 1.442695, %v6263_v40  ;;  %v6266_v54 = vsub.f32 %v6264_v45, %v6265_v24  ;;  %v6283_v20 = vld [vmem:[#allocation106_spill] sm:$0xff]  ;;  %v1894_v24 = vld [vmem:[#allocation3 + $0x38] sm:$0xff] }
 0x29b   :  { %v3644_v42 = vpop.eup %3643  ;;  %3669 = vpow2.f32 %v2585_v55  ;;  %2724 = vadd.xlane.f32.xlu1 %v2723_v44  ;;  %v2727_v31 = vadd.f32 %v3640_v28, %v2726_v46  ;;  %v6268_v44 = vld [vmem:[#allocation96_spill] sm:$0xff]  ;;  %v6284_v40 = vsub.f32 %v6282_v12, %v6283_v20  ;;  %v6294_v12 = vld [vmem:[#allocation113_spill] sm:$0xff]  ;;  %v6295_v20 = vld [vmem:[#allocation114_spill] sm:$0xff] }
 0x29c   :  { %v3646_v37 = vpop.eup %3645  ;;  %3671 = vpow2.f32 %v2587_v29  ;;  %v1961_v17 = vmul.f32 1.442695, %v6266_v54  ;;  %v6267_v29 = vld [vmem:[#allocation95_spill] sm:$0xff]  ;;  %v2850_v54 = vld [vmem:[#allocation2] sm:$0xff] }
 0x29d   :  { %v3648_v58 = vpop.eup %3647  ;;  %v2728_v0 = vadd.f32 %v3642_v56, %v2727_v31  ;;  %v2731_v30 = vadd.f32 %v3646_v37, %v3644_v42  ;;  %3673 = vpow2.f32 %v2589_v16  ;;  %v6269_v46 = vsub.f32 %v6267_v29, %v6268_v44  ;;  %v1888_v37 = vld [vmem:[#allocation3 + $0x8] sm:$0xff] }
 0x29e   :  { %v3650_v32 = vpop.eup %3649  ;;  %3675 = vpow2.f32 %v1951_v57  ;;  %v6276_v57 = vld [vmem:[#allocation101_spill] sm:$0xff] }
 0x29f   :  { %v3652_v22 = vpop.eup %3651  ;;  %2729 = vadd.xlane.f32.xlu0 %v2728_v0  ;;  %v2732_v62 = vadd.f32 %v3648_v58, %v2731_v30  ;;  %3677 = vpow2.f32 %v1955_v25  ;;  %v1963_v56 = vmul.f32 1.442695, %v6269_v46  ;;  %v6270_v58 = vld [vmem:[#allocation97_spill] sm:$0xff]  ;;  %v6271_v0 = vld [vmem:[#allocation98_spill] sm:$0xff] }
 0x2a0   :  { %v3654_v63 = vpop.eup %3653  ;;  %3679 = vpow2.f32 %v1953_v49  ;;  %v6272_v30 = vsub.f32 %v6270_v58, %v6271_v0  ;;  %v6281_v49 = vsub.f32 %v6279_v43, %v6280_v61 }
 0x2a1   :  { %v3656_v47 = vpop.eup %3655  ;;  %v2733_v14 = vadd.f32 %v3650_v32, %v2732_v62  ;;  %v2736_v50 = vadd.f32 %v3654_v63, %v3652_v22  ;;  %3681 = vpow2.f32 %v1957_v13  ;;  %v1890_v62 = vld [vmem:[#allocation3 + $0x18] sm:$0xff] }
 0x2a2   :  { %v3658_v52 = vpop.eup %3657  ;;  %3683 = vpow2.f32 %v1959_v35  ;;  %v1965_v32 = vmul.f32 1.442695, %v6272_v30  ;;  %v1971_v39 = vmul.f32 1.442695, %v6281_v49  ;;  %v1973_v35 = vmul.f32 1.442695, %v6284_v40 }
 0x2a3   :  { %v3660_v3 = vpop.eup %3659  ;;  %2734 = vadd.xlane.f32.xlu1 %v2733_v14  ;;  %v2737_v1 = vadd.f32 %v3656_v47, %v2736_v50  ;;  %3685 = vpow2.f32 %v1961_v17  ;;  %v6296_v40 = vsub.f32 %v6294_v12, %v6295_v20 }
 0x2a4   :  { %v3662_v19 = vpop.eup %3661  ;;  %3687 = vpow2.f32 %v1963_v56 }
 0x2a5   :  { %v3664_v9 = vpop.eup %3663  ;;  %v2738_v60 = vadd.f32 %v3658_v52, %v2737_v1  ;;  %v2741_v4 = vadd.f32 %v3662_v19, %v3660_v3  ;;  %v6273_v1 = vld [vmem:[#allocation99_spill] sm:$0xff]  ;;  %v6274_v19 = vld [vmem:[#allocation100_spill] sm:$0xff] }
 0x2a6   :  { %v3666_v2 = vpop.eup %3665 }
 0x2a7   :  { %v3668_v21 = vpop.eup %3667  ;;  %2739 = vadd.xlane.f32.xlu0 %v2738_v60  ;;  %v2742_v23 = vadd.f32 %v3664_v9, %v2741_v4  ;;  %v6275_v9 = vsub.f32 %v6273_v1, %v6274_v19 }
 0x2a8   :  { %v3670_v48 = vpop.eup %3669 }
 0x2a9   :  { %v2743_v6 = vadd.f32 %v3666_v2, %v2742_v23  ;;  %v2746_v53 = vadd.f32 %v3670_v48, %v3668_v21  ;;  %v3672_v5 = vpop.eup %3671  ;;  %v1967_v60 = vmul.f32 1.442695, %v6275_v9  ;;  %v6277_v21 = vld [vmem:[#allocation102_spill] sm:$0xff] }
 0x2aa   :  { %v3674_v51 = vpop.eup %3673  ;;  %v6278_v23 = vsub.f32 %v6276_v57, %v6277_v21  ;;  %v1896_v9 = vld [vmem:[#allocation3 + $0x48] sm:$0xff] }
 0x2ab   :  { %2744 = vadd.xlane.f32.xlu1 %v2743_v6  ;;  %v2747_v7 = vadd.f32 %v3672_v5, %v2746_v53  ;;  %v3676_v33 = vpop.eup %3675  ;;  %v1892_v5 = vld [vmem:[#allocation3 + $0x28] sm:$0xff] }
 0x2ac   :  { %v2015_v10 = vmul.f32 %v3676_v33, %v1887_v41  ;;  %v3678_v26 = vpop.eup %3677  ;;  %v1969_v48 = vmul.f32 1.442695, %v6278_v23  ;;  %v1893_v33 = vld [vmem:[#allocation3 + $0x30] sm:$0xff] }
 0x2ad   :  { %v2748_v8 = vadd.f32 %v3674_v51, %v2747_v7  ;;  %v2017_v28 = vmul.f32 %v3678_v26, %v1889_v15  ;;  %v3680_v16 = vpop.eup %3679  ;;  %v3803_v26 = vld [vmem:[%s5887_s0] sm:$0xff] }
 0x2ae   :  { %v3682_v22 = vpop.eup %3681  ;;  %v2016_v47 = vmul.f32 %v3680_v16, %v1888_v37  ;;  %vm3074_vm9 = vcmp.ne.s32.totalorder %v3803_v26, 4294967196  ;;  %v3010_v15 = vld [vmem:[#allocation4] sm:$0xff]  ;;  %v6285_v16 = vld [vmem:[#allocation107_spill] sm:$0xff] }
 0x2af   :  { %2749 = vadd.xlane.f32.xlu0 %v2748_v8  ;;  %v2018_v52 = vmul.f32 %v3682_v22, %v1890_v62  ;;  %v3684_v2 = vpop.eup %3683 }
 0x2b0   :  { %v3686_v53 = vpop.eup %3685  ;;  %v2019_v7 = vmul.f32 %v3684_v2, %v1891_v11 }
 0x2b1   :  { %v2020_v25 = vmul.f32 %v3686_v53, %v1892_v5  ;;  %v3688_v27 = vpop.eup %3687  ;;  %v2851_v5 = vld [vmem:[#allocation2 + $0x8] sm:$0xff] }
 0x2b2   :  { %v2021_v17 = vmul.f32 %v3688_v27, %v1893_v33  ;;  %v3011_v33 = vld [vmem:[#allocation4 + $0x8] sm:$0xff] }
 0x2b9   :  { %v2595_v34 = vpop.xlane.xlu0 %2594 }
 0x2ba   :  { %v2751_v55 = vadd.f32 %v2595_v34, %v2015_v10 }
 0x2bc   :  { %2783 = vst.msk [vmem:[#allocation3] sm:$0xff] %vm19_vm13, %v2751_v55 }
 0x2c0   :  { %v2605_v42 = vpop.xlane.xlu0 %2604 }
 0x2c1   :  { %v2753_v31 = vadd.f32 %v2605_v42, %v2017_v28 }
 0x2c3   :  { %2785 = vst.msk [vmem:[#allocation3 + $0x10] sm:$0xff] %vm19_vm13, %v2753_v31  ;;  %v2882_v63 = vld [vmem:[#allocation3] sm:$0xff]  ;;  %v6286_v31 = vld [vmem:[#allocation108_spill] sm:$0xff] }
 0x2c4   :  { %3689 = vlog2.f32 %v2882_v63  ;;  %v6287_v37 = vsub.f32 %v6285_v16, %v6286_v31  ;;  %v1895_v63 = vld [vmem:[#allocation3 + $0x40] sm:$0xff] }
 0x2c5   :  { %v2600_v14 = vpop.xlane.xlu1 %2599  ;;  %3691 = vpow2.f32 %v1965_v32 }
 0x2c6   :  { %v2752_v50 = vadd.f32 %v2600_v14, %v2016_v47  ;;  %v1975_v58 = vmul.f32 1.442695, %v6287_v37  ;;  %v2852_v47 = vld [vmem:[#allocation2 + $0x10] sm:$0xff]  ;;  %v6288_v14 = vld [vmem:[#allocation109_spill] sm:$0xff] }
 0x2c7   :  { %v2854_v37 = vld [vmem:[#allocation2 + $0x20] sm:$0xff] }
 0x2c8   :  { %v2610_v3 = vpop.xlane.xlu0 %2609  ;;  %2784 = vst.msk [vmem:[#allocation3 + $0x8] sm:$0xff] %vm19_vm13, %v2752_v50  ;;  %v6289_v50 = vld [vmem:[#allocation110_spill] sm:$0xff] }
 0x2c9   :  { %v2754_v4 = vadd.f32 %v2610_v3, %v2018_v52  ;;  %v6290_v52 = vsub.f32 %v6288_v14, %v6289_v50  ;;  %v1899_v50 = vld [vmem:[#allocation3 + $0x60] sm:$0xff] }
 0x2ca   :  { %v2884_v6 = vld [vmem:[#allocation3 + $0x10] sm:$0xff] }
 0x2cb   :  { %2786 = vst.msk [vmem:[#allocation3 + $0x18] sm:$0xff] %vm19_vm13, %v2754_v4  ;;  %3693 = vlog2.f32 %v2884_v6  ;;  %v1977_v3 = vmul.f32 1.442695, %v6290_v52  ;;  %v3012_v4 = vld [vmem:[#allocation4 + $0x10] sm:$0xff] }
 0x2cc   :  { %3695 = vpow2.f32 %v1967_v60  ;;  %v3804_v60 = vld [vmem:[%s5887_s0 + $0x10] sm:$0xff] }
 0x2cd   :  { %v2615_v51 = vpop.xlane.xlu1 %2614  ;;  %3697 = vpow2.f32 %v1969_v48  ;;  %vm3076_vm10 = vcmp.ne.s32.totalorder %v3804_v60, 4294967196  ;;  %v6301_v60 = vld [vmem:[#allocation118_spill] sm:$0xff] }
 0x2ce   :  { %v2755_v59 = vadd.f32 %v2615_v51, %v2019_v7  ;;  %v6291_v7 = vld [vmem:[#allocation111_spill] sm:$0xff]  ;;  %v6292_v51 = vld [vmem:[#allocation112_spill] sm:$0xff] }
 0x2cf   :  { %v2883_v8 = vld [vmem:[#allocation3 + $0x8] sm:$0xff] }
 0x2d0   :  { %v2620_v36 = vpop.xlane.xlu0 %2619  ;;  %3699 = vlog2.f32 %v2883_v8  ;;  %2787 = vst.msk [vmem:[#allocation3 + $0x20] sm:$0xff] %vm19_vm13, %v2755_v59  ;;  %v6293_v59 = vsub.f32 %v6291_v7, %v6292_v51 }
 0x2d1   :  { %v2756_v18 = vadd.f32 %v2620_v36, %v2020_v25  ;;  %v3690_v41 = vpop.eup %3689 }
 0x2d2   :  { %v2885_v13 = vld [vmem:[#allocation3 + $0x18] sm:$0xff]  ;;  %v3692_v10 = vpop.eup %3691  ;;  %v2915_v45 = vmul.f32 0.6931472, %v3690_v41  ;;  %v1979_v25 = vmul.f32 1.442695, %v6293_v59 }
 0x2d3   :  { %3701 = vlog2.f32 %v2885_v13  ;;  %2788 = vst.msk [vmem:[#allocation3 + $0x28] sm:$0xff] %vm19_vm13, %v2756_v18  ;;  %v2022_v29 = vmul.f32 %v3692_v10, %v1894_v24  ;;  %v1897_v18 = vld [vmem:[#allocation3 + $0x50] sm:$0xff]  ;;  %v3805_v13 = vld [vmem:[%s5887_s0 + $0x8] sm:$0xff]  ;;  %v2853_v41 = vld [vmem:[#allocation2 + $0x18] sm:$0xff] }
 0x2d4   :  { %3703 = vpow2.f32 %v1971_v39  ;;  %v2978_v34 = vadd.f32 %v2915_v45, %v2850_v54  ;;  %vm3075_vm11 = vcmp.ne.s32.totalorder %v3805_v13, 4294967196 }
 0x2d5   :  { %v2625_v55 = vpop.xlane.xlu1 %2624  ;;  %3705 = vpow2.f32 %v1973_v35  ;;  %v1981_v35 = vmul.f32 1.442695, %v6296_v40 }
 0x2d6   :  { %v2757_v28 = vadd.f32 %v2625_v55, %v2021_v17  ;;  %v3042_v44 = vsub.f32 %v2978_v34, %v3010_v15  ;;  %v3806_v17 = vld [vmem:[%s5887_s0 + $0x18] sm:$0xff] }
 0x2d7   :  { %v2886_v46 = vld [vmem:[#allocation3 + $0x20] sm:$0xff]  ;;  %vm3077_vm12 = vcmp.ne.s32.totalorder %v3806_v17, 4294967196  ;;  %v3013_v34 = vld [vmem:[#allocation4 + $0x18] sm:$0xff] }
 0x2d8   :  { %v2630_v56 = vpop.xlane.xlu0 %2629  ;;  %v3694_v42 = vpop.eup %3693  ;;  %3707 = vlog2.f32 %v2886_v46  ;;  %2789 = vst.msk [vmem:[#allocation3 + $0x30] sm:$0xff] %vm19_vm13, %v2757_v28  ;;  %v3106_v32 = vsel %vm3074_vm9, %v3042_v44, 0.0  ;;  %v1898_v55 = vld [vmem:[#allocation3 + $0x58] sm:$0xff] }
 0x2d9   :  { %v2758_v0 = vadd.f32 %v2630_v56, %v2022_v29  ;;  %v3696_v30 = vpop.eup %3695  ;;  %v2919_v22 = vmul.f32 0.6931472, %v3694_v42  ;;  %3138 = vst.msk [vmem:[%s5888_s3] sm:$0xff] %vm19_vm13, %v3106_v32  ;;  %v2857_v17 = vld [vmem:[#allocation2 + $0x38] sm:$0xff] }
 0x2da   :  { %v2887_v62 = vld [vmem:[#allocation3 + $0x28] sm:$0xff]  ;;  %v3698_v1 = vpop.eup %3697  ;;  %v2023_v2 = vmul.f32 %v3696_v30, %v1895_v63 }
 0x2db   :  { %3709 = vlog2.f32 %v2887_v62  ;;  %2790 = vst.msk [vmem:[#allocation3 + $0x38] sm:$0xff] %vm19_vm13, %v2758_v0  ;;  %v2980_v19 = vadd.f32 %v2919_v22, %v2852_v47  ;;  %v2024_v6 = vmul.f32 %v3698_v1, %v1896_v9  ;;  %v6298_v0 = vld [vmem:[#allocation116_spill] sm:$0xff]  ;;  %v3014_v1 = vld [vmem:[#allocation4 + $0x20] sm:$0xff] }
 0x2dc   :  { %3711 = vpow2.f32 %v1975_v58  ;;  %v6297_v58 = vld [vmem:[#allocation115_spill] sm:$0xff]  ;;  %v6300_v9 = vld [vmem:[#allocation117_spill] sm:$0xff] }
 0x2dd   :  { %v3700_v11 = vpop.eup %3699  ;;  %v3044_v57 = vsub.f32 %v2980_v19, %v3012_v4  ;;  %v2635_v21 = vpop.xlane.xlu1 %2634  ;;  %3713 = vpow2.f32 %v1977_v3  ;;  %v6299_v30 = vsub.f32 %v6297_v58, %v6298_v0  ;;  %v3807_v3 = vld [vmem:[%s5887_s0 + $0x20] sm:$0xff]  ;;  %v2855_v19 = vld [vmem:[#allocation2 + $0x28] sm:$0xff]  ;;  %v6302_v4 = vsub.f32 %v6300_v9, %v6301_v60 }
 0x2de   :  { %v2917_v23 = vmul.f32 0.6931472, %v3700_v11  ;;  %v2759_v48 = vadd.f32 %v2635_v21, %v2023_v2  ;;  %vm3078_vm14 = vcmp.ne.s32.totalorder %v3807_v3, 4294967196 }
 0x2df   :  { %v3108_v8 = vsel %vm3076_vm10, %v3044_v57, 0.0  ;;  %v2888_v36 = vld [vmem:[#allocation3 + $0x30] sm:$0xff]  ;;  %v1983_v32 = vmul.f32 1.442695, %v6299_v30  ;;  %v1985_v2 = vmul.f32 1.442695, %v6302_v4 }
 0x2e0   :  { %v3702_v53 = vpop.eup %3701  ;;  %v2640_v43 = vpop.xlane.xlu0 %2639  ;;  %3140 = vst.msk [vmem:[%s5888_s3 + $0x10] sm:$0xff] %vm19_vm13, %v3108_v8  ;;  %v2979_v61 = vadd.f32 %v2917_v23, %v2851_v5  ;;  %3715 = vlog2.f32 %v2888_v36  ;;  %2791 = vst.msk [vmem:[#allocation3 + $0x40] sm:$0xff] %vm19_vm13, %v2759_v48  ;;  %v3808_v48 = vld [vmem:[%s5887_s0 + $0x28] sm:$0xff] }
 0x2e1   :  { %v2921_v49 = vmul.f32 0.6931472, %v3702_v53  ;;  %v2760_v39 = vadd.f32 %v2640_v43, %v2024_v6  ;;  %v3704_v27 = vpop.eup %3703  ;;  %vm3079_vm15 = vcmp.ne.s32.totalorder %v3808_v48, 4294967196  ;;  %v3015_v6 = vld [vmem:[#allocation4 + $0x28] sm:$0xff] }
 0x2e2   :  { %v2889_v10 = vld [vmem:[#allocation3 + $0x38] sm:$0xff]  ;;  %v3043_v45 = vsub.f32 %v2979_v61, %v3011_v33  ;;  %v3706_v54 = vpop.eup %3705  ;;  %v2025_v28 = vmul.f32 %v3704_v27, %v1897_v18  ;;  %v1900_v53 = vld [vmem:[#allocation3 + $0x68] sm:$0xff]  ;;  %v6303_v18 = vld [vmem:[#allocation119_spill] sm:$0xff] }
 0x2e3   :  { %v2981_v24 = vadd.f32 %v2921_v49, %v2853_v41  ;;  %3717 = vlog2.f32 %v2889_v10  ;;  %2792 = vst.msk [vmem:[#allocation3 + $0x48] sm:$0xff] %vm19_vm13, %v2760_v39  ;;  %v2026_v16 = vmul.f32 %v3706_v54, %v1898_v55  ;;  %v2856_v39 = vld [vmem:[#allocation2 + $0x30] sm:$0xff]  ;;  %v6304_v27 = vld [vmem:[#allocation120_spill] sm:$0xff]  ;;  %v2859_v48 = vld [vmem:[#allocation2 + $0x48] sm:$0xff] }
 0x2e4   :  { %3719 = vpow2.f32 %v1979_v25  ;;  %v3107_v26 = vsel %vm3075_vm11, %v3043_v45, 0.0  ;;  %v6305_v13 = vsub.f32 %v6303_v18, %v6304_v27  ;;  %v1901_v10 = vld [vmem:[#allocation3 + $0x70] sm:$0xff] }
 0x2e5   :  { %v3045_v15 = vsub.f32 %v2981_v24, %v3013_v34  ;;  %v3708_v29 = vpop.eup %3707  ;;  %3721 = vpow2.f32 %v1981_v35  ;;  %3139 = vst.msk [vmem:[%s5888_s3 + $0x8] sm:$0xff] %vm19_vm13, %v3107_v26  ;;  %v2645_v44 = vpop.xlane.xlu1 %2644  ;;  %v3809_v24 = vld [vmem:[%s5887_s0 + $0x30] sm:$0xff]  ;;  %v6306_v26 = vld [vmem:[#allocation121_spill] sm:$0xff] }
 0x2e6   :  { %v2923_v56 = vmul.f32 0.6931472, %v3708_v29  ;;  %v2761_v42 = vadd.f32 %v2645_v44, %v2025_v28  ;;  %v1987_v33 = vmul.f32 1.442695, %v6305_v13  ;;  %vm3080_vm0 = vcmp.ne.s32.totalorder %v3809_v24, 4294967196  ;;  %v3016_v54 = vld [vmem:[#allocation4 + $0x30] sm:$0xff] }
 0x2e7   :  { %v3109_v46 = vsel %vm3077_vm12, %v3045_v15, 0.0  ;;  %v2890_v22 = vld [vmem:[#allocation3 + $0x40] sm:$0xff]  ;;  %v6307_v15 = vld [vmem:[#allocation122_spill] sm:$0xff] }
 0x2e8   :  { %v3710_v31 = vpop.eup %3709  ;;  %3141 = vst.msk [vmem:[%s5888_s3 + $0x18] sm:$0xff] %vm19_vm13, %v3109_v46  ;;  %v2650_v62 = vpop.xlane.xlu0 %2649  ;;  %v2982_v63 = vadd.f32 %v2923_v56, %v2854_v37  ;;  %3723 = vlog2.f32 %v2890_v22  ;;  %2793 = vst.msk [vmem:[#allocation3 + $0x50] sm:$0xff] %vm19_vm13, %v2761_v42  ;;  %v6308_v28 = vsub.f32 %v6306_v26, %v6307_v15  ;;  %v1902_v56 = vld [vmem:[#allocation3 + $0x78] sm:$0xff] }
 0x2e9   :  { %v2925_v47 = vmul.f32 0.6931472, %v3710_v31  ;;  %v2762_v14 = vadd.f32 %v2650_v62, %v2026_v16  ;;  %v3712_v52 = vpop.eup %3711  ;;  %v3810_v42 = vld [vmem:[%s5887_s0 + $0x38] sm:$0xff] }
 0x2ea   :  { %v2891_v11 = vld [vmem:[#allocation3 + $0x48] sm:$0xff]  ;;  %v3046_v57 = vsub.f32 %v2982_v63, %v3014_v1  ;;  %v3714_v23 = vpop.eup %3713  ;;  %v2027_v51 = vmul.f32 %v3712_v52, %v1899_v50  ;;  %v1989_v29 = vmul.f32 1.442695, %v6308_v28  ;;  %vm3081_vm1 = vcmp.ne.s32.totalorder %v3810_v42, 4294967196  ;;  %v3017_v16 = vld [vmem:[#allocation4 + $0x38] sm:$0xff]  ;;  %v6309_v50 = vld [vmem:[#allocation123_spill] sm:$0xff] }
 0x2eb   :  { %v2983_v21 = vadd.f32 %v2925_v47, %v2855_v19  ;;  %3725 = vlog2.f32 %v2891_v11  ;;  %2794 = vst.msk [vmem:[#allocation3 + $0x58] sm:$0xff] %vm19_vm13, %v2762_v14  ;;  %v2028_v61 = vmul.f32 %v3714_v23, %v1900_v53  ;;  %v2858_v14 = vld [vmem:[#allocation2 + $0x40] sm:$0xff]  ;;  %v6310_v52 = vld [vmem:[#allocation124_spill] sm:$0xff]  ;;  %v1905_v28 = vld [vmem:[#allocation3 + $0x90] sm:$0xff] }
 0x2ec   :  { %3727 = vpow2.f32 %v1983_v32  ;;  %v3110_v5 = vsel %vm3078_vm14, %v3046_v57, 0.0  ;;  %v6311_v3 = vsub.f32 %v6309_v50, %v6310_v52  ;;  %v1903_v11 = vld [vmem:[#allocation3 + $0x80] sm:$0xff] }
 0x2ed   :  { %v3047_v7 = vsub.f32 %v2983_v21, %v3015_v6  ;;  %v3716_v59 = vpop.eup %3715  ;;  %3729 = vpow2.f32 %v1985_v2  ;;  %3142 = vst.msk [vmem:[%s5888_s3 + $0x20] sm:$0xff] %vm19_vm13, %v3110_v5  ;;  %v2655_v25 = vpop.xlane.xlu1 %2654  ;;  %v3811_v21 = vld [vmem:[%s5887_s0 + $0x40] sm:$0xff] }
 0x2ee   :  { %v2927_v36 = vmul.f32 0.6931472, %v3716_v59  ;;  %v2763_v43 = vadd.f32 %v2655_v25, %v2027_v51  ;;  %v1991_v1 = vmul.f32 1.442695, %v6311_v3  ;;  %vm3082_vm2 = vcmp.ne.s32.totalorder %v3811_v21, 4294967196  ;;  %v3018_v23 = vld [vmem:[#allocation4 + $0x40] sm:$0xff] }
 0x2ef   :  { %v3111_v8 = vsel %vm3079_vm15, %v3047_v7, 0.0  ;;  %v2892_v41 = vld [vmem:[#allocation3 + $0x50] sm:$0xff]  ;;  %v6312_v5 = vld [vmem:[#allocation125_spill] sm:$0xff]  ;;  %v6313_v7 = vld [vmem:[#allocation126_spill] sm:$0xff] }
 0x2f0   :  { %v3718_v49 = vpop.eup %3717  ;;  %3143 = vst.msk [vmem:[%s5888_s3 + $0x28] sm:$0xff] %vm19_vm13, %v3111_v8  ;;  %v2660_v12 = vpop.xlane.xlu0 %2659  ;;  %v2984_v20 = vadd.f32 %v2927_v36, %v2856_v39  ;;  %3731 = vlog2.f32 %v2892_v41  ;;  %2795 = vst.msk [vmem:[#allocation3 + $0x60] sm:$0xff] %vm19_vm13, %v2763_v43  ;;  %v6314_v51 = vsub.f32 %v6312_v5, %v6313_v7  ;;  %v1904_v36 = vld [vmem:[#allocation3 + $0x88] sm:$0xff]  ;;  %v6318_v42 = vld [vmem:[#allocation129_spill] sm:$0xff] }
 0x2f1   :  { %v2929_v40 = vmul.f32 0.6931472, %v3718_v49  ;;  %v2764_v35 = vadd.f32 %v2660_v12, %v2028_v61  ;;  %v3720_v45 = vpop.eup %3719  ;;  %v3812_v43 = vld [vmem:[%s5887_s0 + $0x48] sm:$0xff] }
 0x2f2   :  { %v2893_v34 = vld [vmem:[#allocation3 + $0x58] sm:$0xff]  ;;  %v3722_v55 = vpop.eup %3721  ;;  %v3048_v44 = vsub.f32 %v2984_v20, %v3016_v54  ;;  %v2029_v58 = vmul.f32 %v3720_v45, %v1901_v10  ;;  %v1993_v59 = vmul.f32 1.442695, %v6314_v51  ;;  %vm3083_vm3 = vcmp.ne.s32.totalorder %v3812_v43, 4294967196  ;;  %v3019_v61 = vld [vmem:[#allocation4 + $0x48] sm:$0xff]  ;;  %v6315_v10 = vld [vmem:[#allocation127_spill] sm:$0xff] }
 0x2f3   :  { %v2985_v46 = vadd.f32 %v2929_v40, %v2857_v17  ;;  %3733 = vlog2.f32 %v2893_v34  ;;  %2796 = vst.msk [vmem:[#allocation3 + $0x68] sm:$0xff] %vm19_vm13, %v2764_v35  ;;  %v2030_v32 = vmul.f32 %v3722_v55, %v1902_v56  ;;  %v2860_v35 = vld [vmem:[#allocation2 + $0x50] sm:$0xff]  ;;  %v6316_v45 = vld [vmem:[#allocation128_spill] sm:$0xff]  ;;  %v1907_v51 = vld [vmem:[#allocation3 + $0xa0] sm:$0xff] }
 0x2f4   :  { %3735 = vpow2.f32 %v1987_v33  ;;  %v3112_v31 = vsel %vm3080_vm0, %v3048_v44, 0.0  ;;  %v6317_v24 = vsub.f32 %v6315_v10, %v6316_v45  ;;  %v3813_v44 = vld [vmem:[%s5887_s0 + $0x50] sm:$0xff]  ;;  %v2861_v56 = vld [vmem:[#allocation2 + $0x58] sm:$0xff]  ;;  %v6324_v43 = vld [vmem:[#allocation133_spill] sm:$0xff] }
 0x2f5   :  { %v3049_v37 = vsub.f32 %v2985_v46, %v3017_v16  ;;  %v3724_v0 = vpop.eup %3723  ;;  %3144 = vst.msk [vmem:[%s5888_s3 + $0x30] sm:$0xff] %vm19_vm13, %v3112_v31  ;;  %v2665_v30 = vpop.xlane.xlu1 %2664  ;;  %3737 = vpow2.f32 %v1989_v29  ;;  %vm3084_vm4 = vcmp.ne.s32.totalorder %v3813_v44, 4294967196  ;;  %v3020_v46 = vld [vmem:[#allocation4 + $0x50] sm:$0xff]  ;;  %v6319_v16 = vld [vmem:[#allocation130_spill] sm:$0xff] }
 0x2f6   :  { %v2931_v62 = vmul.f32 0.6931472, %v3724_v0  ;;  %v2765_v63 = vadd.f32 %v2665_v30, %v2029_v58  ;;  %v1995_v54 = vmul.f32 1.442695, %v6317_v24  ;;  %v6320_v31 = vsub.f32 %v6318_v42, %v6319_v16  ;;  %v6327_v24 = vld [vmem:[#allocation135_spill] sm:$0xff] }
 0x2f7   :  { %v3113_v22 = vsel %vm3081_vm1, %v3049_v37, 0.0  ;;  %v2894_v19 = vld [vmem:[#allocation3 + $0x60] sm:$0xff] }
 0x2f8   :  { %v3726_v47 = vpop.eup %3725  ;;  %3145 = vst.msk [vmem:[%s5888_s3 + $0x38] sm:$0xff] %vm19_vm13, %v3113_v22  ;;  %v2670_v9 = vpop.xlane.xlu0 %2669  ;;  %v2986_v60 = vadd.f32 %v2931_v62, %v2858_v14  ;;  %3739 = vlog2.f32 %v2894_v19  ;;  %2797 = vst.msk [vmem:[#allocation3 + $0x70] sm:$0xff] %vm19_vm13, %v2765_v63  ;;  %v1997_v37 = vmul.f32 1.442695, %v6320_v31  ;;  %v3814_v22 = vld [vmem:[%s5887_s0 + $0x58] sm:$0xff] }
 0x2f9   :  { %v2933_v4 = vmul.f32 0.6931472, %v3726_v47  ;;  %v2766_v2 = vadd.f32 %v2670_v9, %v2030_v32  ;;  %v3728_v57 = vpop.eup %3727  ;;  %vm3085_vm5 = vcmp.ne.s32.totalorder %v3814_v22, 4294967196  ;;  %v3021_v62 = vld [vmem:[#allocation4 + $0x58] sm:$0xff] }
 0x2fa   :  { %v2895_v6 = vld [vmem:[#allocation3 + $0x68] sm:$0xff]  ;;  %v3730_v53 = vpop.eup %3729  ;;  %v3050_v25 = vsub.f32 %v2986_v60, %v3018_v23  ;;  %v2031_v18 = vmul.f32 %v3728_v57, %v1903_v11  ;;  %v1906_v63 = vld [vmem:[#allocation3 + $0x98] sm:$0xff]  ;;  %v6321_v11 = vld [vmem:[#allocation131_spill] sm:$0xff] }
 0x2fb   :  { %v2987_v8 = vadd.f32 %v2933_v4, %v2859_v48  ;;  %3741 = vlog2.f32 %v2895_v6  ;;  %2798 = vst.msk [vmem:[#allocation3 + $0x78] sm:$0xff] %vm19_vm13, %v2766_v2  ;;  %v2032_v33 = vmul.f32 %v3730_v53, %v1904_v36  ;;  %v2862_v2 = vld [vmem:[#allocation2 + $0x60] sm:$0xff]  ;;  %v6322_v57 = vld [vmem:[#allocation132_spill] sm:$0xff]  ;;  %v2863_v36 = vld [vmem:[#allocation2 + $0x68] sm:$0xff] }
 0x2fc   :  { %3743 = vpow2.f32 %v1991_v1  ;;  %v3114_v49 = vsel %vm3082_vm2, %v3050_v25, 0.0  ;;  %v6323_v21 = vsub.f32 %v6321_v11, %v6322_v57  ;;  %v3815_v25 = vld [vmem:[%s5887_s0 + $0x60] sm:$0xff]  ;;  %v2865_v22 = vld [vmem:[#allocation2 + $0x78] sm:$0xff] }
 0x2fd   :  { %v3051_v39 = vsub.f32 %v2987_v8, %v3019_v61  ;;  %v3732_v27 = vpop.eup %3731  ;;  %3146 = vst.msk [vmem:[%s5888_s3 + $0x40] sm:$0xff] %vm19_vm13, %v3114_v49  ;;  %v2675_v13 = vpop.xlane.xlu1 %2674  ;;  %3745 = vpow2.f32 %v1993_v59  ;;  %vm3086_vm6 = vcmp.ne.s32.totalorder %v3815_v25, 4294967196  ;;  %v3022_v8 = vld [vmem:[#allocation4 + $0x60] sm:$0xff]  ;;  %v6325_v61 = vld [vmem:[#allocation134_spill] sm:$0xff] }
 0x2fe   :  { %v2935_v12 = vmul.f32 0.6931472, %v3732_v27  ;;  %v2767_v20 = vadd.f32 %v2675_v13, %v2031_v18  ;;  %v1999_v23 = vmul.f32 1.442695, %v6323_v21  ;;  %v6326_v49 = vsub.f32 %v6324_v43, %v6325_v61  ;;  %v6333_v21 = vld [vmem:[#allocation139_spill] sm:$0xff] }
 0x2ff   :  { %v3115_v41 = vsel %vm3083_vm3, %v3051_v39, 0.0  ;;  %v2896_v17 = vld [vmem:[#allocation3 + $0x70] sm:$0xff] }
 0x300   :  { %v3734_v40 = vpop.eup %3733  ;;  %3147 = vst.msk [vmem:[%s5888_s3 + $0x48] sm:$0xff] %vm19_vm13, %v3115_v41  ;;  %v2680_v34 = vpop.xlane.xlu0 %2679  ;;  %v2988_v55 = vadd.f32 %v2935_v12, %v2860_v35  ;;  %3747 = vlog2.f32 %v2896_v17  ;;  %2799 = vst.msk [vmem:[#allocation3 + $0x80] sm:$0xff] %vm19_vm13, %v2767_v20  ;;  %v2001_v39 = vmul.f32 1.442695, %v6326_v49  ;;  %v3816_v41 = vld [vmem:[%s5887_s0 + $0x68] sm:$0xff] }
 0x301   :  { %v2937_v26 = vmul.f32 0.6931472, %v3734_v40  ;;  %v2768_v15 = vadd.f32 %v2680_v34, %v2032_v33  ;;  %v3736_v29 = vpop.eup %3735  ;;  %vm3087_vm7 = vcmp.ne.s32.totalorder %v3816_v41, 4294967196  ;;  %v3023_v12 = vld [vmem:[#allocation4 + $0x68] sm:$0xff] }
 0x302   :  { %v2897_v58 = vld [vmem:[#allocation3 + $0x78] sm:$0xff]  ;;  %v3052_v0 = vsub.f32 %v2988_v55, %v3020_v46  ;;  %v3738_v32 = vpop.eup %3737  ;;  %v2033_v50 = vmul.f32 %v3736_v29, %v1905_v28  ;;  %v1908_v20 = vld [vmem:[#allocation3 + $0xa8] sm:$0xff]  ;;  %v2864_v46 = vld [vmem:[#allocation2 + $0x70] sm:$0xff] }
 0x303   :  { %v2989_v30 = vadd.f32 %v2937_v26, %v2861_v56  ;;  %3749 = vlog2.f32 %v2897_v58  ;;  %2800 = vst.msk [vmem:[#allocation3 + $0x88] sm:$0xff] %vm19_vm13, %v2768_v15  ;;  %v2034_v60 = vmul.f32 %v3738_v32, %v1906_v63  ;;  %v1909_v58 = vld [vmem:[#allocation3 + $0xb0] sm:$0xff]  ;;  %v2867_v41 = vld [vmem:[#allocation2 + $0x88] sm:$0xff] }
 0x304   :  { %3751 = vpow2.f32 %v1995_v54  ;;  %v3116_v47 = vsel %vm3084_vm4, %v3052_v0, 0.0  ;;  %v6328_v54 = vld [vmem:[#allocation136_spill] sm:$0xff]  ;;  %v3024_v32 = vld [vmem:[#allocation4 + $0x70] sm:$0xff] }
 0x305   :  { %v3053_v14 = vsub.f32 %v2989_v30, %v3021_v62  ;;  %v3740_v52 = vpop.eup %3739  ;;  %3753 = vpow2.f32 %v1997_v37  ;;  %3148 = vst.msk [vmem:[%s5888_s3 + $0x50] sm:$0xff] %vm19_vm13, %v3116_v47  ;;  %v2685_v3 = vpop.xlane.xlu1 %2684  ;;  %v6329_v17 = vsub.f32 %v6327_v24, %v6328_v54  ;;  %v3817_v30 = vld [vmem:[%s5887_s0 + $0x70] sm:$0xff]  ;;  %v6330_v47 = vld [vmem:[#allocation137_spill] sm:$0xff] }
 0x306   :  { %v2939_v19 = vmul.f32 0.6931472, %v3740_v52  ;;  %v2769_v9 = vadd.f32 %v2685_v3, %v2033_v50  ;;  %vm3088_vm8 = vcmp.ne.s32.totalorder %v3817_v30, 4294967196 }
 0x307   :  { %v3117_v1 = vsel %vm3085_vm5, %v3053_v14, 0.0  ;;  %v2898_v48 = vld [vmem:[#allocation3 + $0x80] sm:$0xff]  ;;  %v2003_v34 = vmul.f32 1.442695, %v6329_v17  ;;  %v6331_v14 = vld [vmem:[#allocation138_spill] sm:$0xff] }
 0x308   :  { %v3742_v4 = vpop.eup %3741  ;;  %3149 = vst.msk [vmem:[%s5888_s3 + $0x58] sm:$0xff] %vm19_vm13, %v3117_v1  ;;  %v2690_v6 = vpop.xlane.xlu0 %2689  ;;  %v2990_v53 = vadd.f32 %v2939_v19, %v2862_v2  ;;  %3755 = vlog2.f32 %v2898_v48  ;;  %2801 = vst.msk [vmem:[#allocation3 + $0x90] sm:$0xff] %vm19_vm13, %v2769_v9  ;;  %v6332_v50 = vsub.f32 %v6330_v47, %v6331_v14  ;;  %v1910_v19 = vld [vmem:[#allocation3 + $0xb8] sm:$0xff]  ;;  %v1912_v17 = vld [vmem:[#allocation3 + $0xc8] sm:$0xff] }
 0x309   :  { %v2941_v5 = vmul.f32 0.6931472, %v3742_v4  ;;  %v2770_v7 = vadd.f32 %v2690_v6, %v2034_v60  ;;  %v3744_v59 = vpop.eup %3743  ;;  %v3818_v9 = vld [vmem:[%s5887_s0 + $0x78] sm:$0xff] }
 0x30a   :  { %v2899_v18 = vld [vmem:[#allocation3 + $0x88] sm:$0xff]  ;;  %v3054_v27 = vsub.f32 %v2990_v53, %v3022_v8  ;;  %v3746_v33 = vpop.eup %3745  ;;  %v2035_v10 = vmul.f32 %v3744_v59, %v1907_v51  ;;  %v2005_v52 = vmul.f32 1.442695, %v6332_v50  ;;  %vm3089_vm9 = vcmp.ne.s32.totalorder %v3818_v9, 4294967196  ;;  %v3025_v60 = vld [vmem:[#allocation4 + $0x78] sm:$0xff]  ;;  %v2866_v8 = vld [vmem:[#allocation2 + $0x80] sm:$0xff] }
 0x30b   :  { %v2991_v13 = vadd.f32 %v2941_v5, %v2863_v36  ;;  %3757 = vlog2.f32 %v2899_v18  ;;  %2802 = vst.msk [vmem:[#allocation3 + $0x98] sm:$0xff] %vm19_vm13, %v2770_v7  ;;  %v2036_v29 = vmul.f32 %v3746_v33, %v1908_v20  ;;  %v1911_v18 = vld [vmem:[#allocation3 + $0xc0] sm:$0xff] }
 0x30c   :  { %3759 = vpow2.f32 %v1999_v23  ;;  %v3118_v40 = vsel %vm3086_vm6, %v3054_v27, 0.0  ;;  %v6334_v23 = vld [vmem:[#allocation140_spill] sm:$0xff]  ;;  %v3026_v33 = vld [vmem:[#allocation4 + $0x80] sm:$0xff] }
 0x30d   :  { %v3055_v35 = vsub.f32 %v2991_v13, %v3023_v12  ;;  %v3748_v45 = vpop.eup %3747  ;;  %3761 = vpow2.f32 %v2001_v39  ;;  %3150 = vst.msk [vmem:[%s5888_s3 + $0x60] sm:$0xff] %vm19_vm13, %v3118_v40  ;;  %v2695_v55 = vpop.xlane.xlu1 %2694  ;;  %v6335_v48 = vsub.f32 %v6333_v21, %v6334_v23  ;;  %v3819_v13 = vld [vmem:[%s5887_s0 + $0x80] sm:$0xff] }
 0x30e   :  { %v2943_v15 = vmul.f32 0.6931472, %v3748_v45  ;;  %v2771_v28 = vadd.f32 %v2695_v55, %v2035_v10  ;;  %vm3090_vm10 = vcmp.ne.s32.totalorder %v3819_v13, 4294967196  ;;  %v6336_v40 = vld [vmem:[#allocation141_spill] sm:$0xff]  ;;  %v3027_v55 = vld [vmem:[#allocation4 + $0x88] sm:$0xff] }
 0x30f   :  { %v3119_v26 = vsel %vm3087_vm7, %v3055_v35, 0.0  ;;  %v2900_v56 = vld [vmem:[#allocation3 + $0x90] sm:$0xff]  ;;  %v2007_v6 = vmul.f32 1.442695, %v6335_v48  ;;  %v6337_v35 = vld [vmem:[#allocation142_spill] sm:$0xff]  ;;  %v3822_v48 = vld [vmem:[%s5887_s0 + $0x98] sm:$0xff] }
 0x310   :  { %v3750_v44 = vpop.eup %3749  ;;  %3151 = vst.msk [vmem:[%s5888_s3 + $0x68] sm:$0xff] %vm19_vm13, %v3119_v26  ;;  %v2700_v42 = vpop.xlane.xlu0 %2699  ;;  %v2992_v16 = vadd.f32 %v2943_v15, %v2864_v46  ;;  %3763 = vlog2.f32 %v2900_v56  ;;  %2803 = vst.msk [vmem:[#allocation3 + $0xa0] sm:$0xff] %vm19_vm13, %v2771_v28  ;;  %v6338_v10 = vsub.f32 %v6336_v40, %v6337_v35  ;;  %v6340_v46 = vld [vmem:[#allocation144_spill] sm:$0xff]  ;;  %vm3093_vm14 = vcmp.ne.s32.totalorder %v3822_v48, 4294967196  ;;  %v2871_v40 = vld [vmem:[#allocation2 + $0xa8] sm:$0xff] }
 0x311   :  { %v2945_v31 = vmul.f32 0.6931472, %v3750_v44  ;;  %v2772_v37 = vadd.f32 %v2700_v42, %v2036_v29  ;;  %v3752_v0 = vpop.eup %3751  ;;  %3765 = vpow2.f32 %v2003_v34  ;;  %v3820_v34 = vld [vmem:[%s5887_s0 + $0x88] sm:$0xff]  ;;  %v6339_v44 = vld [vmem:[#allocation143_spill] sm:$0xff] }
 0x312   :  { %v2901_v62 = vld [vmem:[#allocation3 + $0x98] sm:$0xff]  ;;  %v3754_v63 = vpop.eup %3753  ;;  %v3056_v3 = vsub.f32 %v2992_v16, %v3024_v32  ;;  %v2037_v11 = vmul.f32 %v3752_v0, %v1909_v58  ;;  %v2009_v45 = vmul.f32 1.442695, %v6338_v10  ;;  %vm3091_vm11 = vcmp.ne.s32.totalorder %v3820_v34, 4294967196  ;;  %v1913_v32 = vld [vmem:[#allocation3 + $0xd0] sm:$0xff]  ;;  %v3031_v34 = vld [vmem:[#allocation4 + $0xa8] sm:$0xff] }
 0x313   :  { %v2993_v1 = vadd.f32 %v2945_v31, %v2865_v22  ;;  %3767 = vlog2.f32 %v2901_v62  ;;  %2804 = vst.msk [vmem:[#allocation3 + $0xa8] sm:$0xff] %vm19_vm13, %v2772_v37  ;;  %v2038_v5 = vmul.f32 %v3754_v63, %v1910_v19  ;;  %v6341_v56 = vsub.f32 %v6339_v44, %v6340_v46  ;;  %v2868_v62 = vld [vmem:[#allocation2 + $0x90] sm:$0xff]  ;;  %v2869_v19 = vld [vmem:[#allocation2 + $0x98] sm:$0xff] }
 0x314   :  { %v3120_v4 = vsel %vm3088_vm8, %v3056_v3, 0.0  ;;  %3769 = vpow2.f32 %v2005_v52  ;;  %v3821_v3 = vld [vmem:[%s5887_s0 + $0x90] sm:$0xff] }
 0x315   :  { %v3057_v2 = vsub.f32 %v2993_v1, %v3025_v60  ;;  %v3756_v57 = vpop.eup %3755  ;;  %3152 = vst.msk [vmem:[%s5888_s3 + $0x70] sm:$0xff] %vm19_vm13, %v3120_v4  ;;  %v2705_v53 = vpop.xlane.xlu1 %2704  ;;  %v2011_v42 = vmul.f32 1.442695, %v6341_v56  ;;  %vm3092_vm12 = vcmp.ne.s32.totalorder %v3821_v3, 4294967196  ;;  %v3028_v1 = vld [vmem:[#allocation4 + $0x90] sm:$0xff]  ;;  %v6342_v4 = vld [vmem:[#allocation145_spill] sm:$0xff] }
 0x316   :  { %v2947_v51 = vmul.f32 0.6931472, %v3756_v57  ;;  %v2773_v59 = vadd.f32 %v2705_v53, %v2037_v11 }
 0x317   :  { %v3121_v7 = vsel %vm3089_vm9, %v3057_v2, 0.0  ;;  %v2902_v36 = vld [vmem:[#allocation3 + $0xa0] sm:$0xff]  ;;  %v6343_v2 = vsub.f32 %v6342_v4, %v5395_v38 }
 0x318   :  { %v3758_v25 = vpop.eup %3757  ;;  %3153 = vst.msk [vmem:[%s5888_s3 + $0x78] sm:$0xff] %vm19_vm13, %v3121_v7  ;;  %v2710_v43 = vpop.xlane.xlu0 %2709  ;;  %v2994_v61 = vadd.f32 %v2947_v51, %v2866_v8  ;;  %3771 = vlog2.f32 %v2902_v36  ;;  %2805 = vst.msk [vmem:[#allocation3 + $0xb0] sm:$0xff] %vm19_vm13, %v2773_v59 }
 0x319   :  { %v2949_v49 = vmul.f32 0.6931472, %v3758_v25  ;;  %v2774_v39 = vadd.f32 %v2710_v43, %v2038_v5  ;;  %v3760_v27 = vpop.eup %3759  ;;  %3773 = vpow2.f32 %v2007_v6  ;;  %v2013_v11 = vmul.f32 1.442695, %v6343_v2  ;;  %v3029_v6 = vld [vmem:[#allocation4 + $0x98] sm:$0xff] }
 0x31a   :  { %v2903_v12 = vld [vmem:[#allocation3 + $0xa8] sm:$0xff]  ;;  %v3762_v20 = vpop.eup %3761  ;;  %v3058_v24 = vsub.f32 %v2994_v61, %v3026_v33  ;;  %v2039_v28 = vmul.f32 %v3760_v27, %v1911_v18  ;;  %v1914_v5 = vld [vmem:[#allocation3 + $0xd8] sm:$0xff]  ;;  %v1915_v27 = vld [vmem:[#allocation3 + $0xe0] sm:$0xff] }
 0x31b   :  { %v2995_v54 = vadd.f32 %v2949_v49, %v2867_v41  ;;  %3775 = vlog2.f32 %v2903_v12  ;;  %2806 = vst.msk [vmem:[#allocation3 + $0xb8] sm:$0xff] %vm19_vm13, %v2774_v39  ;;  %v2040_v31 = vmul.f32 %v3762_v20, %v1912_v17  ;;  %v2870_v49 = vld [vmem:[#allocation2 + $0xa0] sm:$0xff]  ;;  %v3824_v17 = vld [vmem:[%s5887_s0 + $0xa8] sm:$0xff]  ;;  %v1918_v2 = vld [vmem:[#allocation3 + $0xf8] sm:$0xff] }
 0x31c   :  { %v3122_v26 = vsel %vm3090_vm10, %v3058_v24, 0.0  ;;  %3777 = vpow2.f32 %v2009_v45  ;;  %v3823_v12 = vld [vmem:[%s5887_s0 + $0xa0] sm:$0xff]  ;;  %vm3095_vm0 = vcmp.ne.s32.totalorder %v3824_v17, 4294967196  ;;  %v3036_v17 = vld [vmem:[#allocation4 + $0xd0] sm:$0xff] }
 0x31d   :  { %v3059_v15 = vsub.f32 %v2995_v54, %v3027_v55  ;;  %v3764_v29 = vpop.eup %3763  ;;  %3154 = vst.msk [vmem:[%s5888_s3 + $0x80] sm:$0xff] %vm19_vm13, %v3122_v26  ;;  %v2715_v16 = vpop.xlane.xlu1 %2714  ;;  %vm3094_vm15 = vcmp.ne.s32.totalorder %v3823_v12, 4294967196  ;;  %v3030_v20 = vld [vmem:[#allocation4 + $0xa0] sm:$0xff]  ;;  %v1916_v26 = vld [vmem:[#allocation3 + $0xe8] sm:$0xff] }
 0x31e   :  { %v3766_v37 = vpop.eup %3765  ;;  %v2951_v0 = vmul.f32 0.6931472, %v3764_v29  ;;  %v2775_v30 = vadd.f32 %v2715_v16, %v2039_v28 }
 0x31f   :  { %v3123_v58 = vsel %vm3091_vm11, %v3059_v15, 0.0  ;;  %v2904_v63 = vld [vmem:[#allocation3 + $0xb0] sm:$0xff]  ;;  %v2041_v60 = vmul.f32 %v3766_v37, %v1913_v32 }
 0x320   :  { %v3768_v22 = vpop.eup %3767  ;;  %3155 = vst.msk [vmem:[%s5888_s3 + $0x88] sm:$0xff] %vm19_vm13, %v3123_v58  ;;  %v2720_v47 = vpop.xlane.xlu0 %2719  ;;  %v2996_v14 = vadd.f32 %v2951_v0, %v2868_v62  ;;  %3779 = vlog2.f32 %v2904_v63  ;;  %2807 = vst.msk [vmem:[#allocation3 + $0xc0] sm:$0xff] %vm19_vm13, %v2775_v30  ;;  %v2872_v58 = vld [vmem:[#allocation2 + $0xb0] sm:$0xff] }
 0x321   :  { %v2953_v50 = vmul.f32 0.6931472, %v3768_v22  ;;  %v2776_v52 = vadd.f32 %v2720_v47, %v2040_v31  ;;  %3781 = vpow2.f32 %v2011_v42  ;;  %v3770_v23 = vpop.eup %3769  ;;  %v1917_v30 = vld [vmem:[#allocation3 + $0xf0] sm:$0xff] }
 0x322   :  { %v2905_v9 = vld [vmem:[#allocation3 + $0xb8] sm:$0xff]  ;;  %v3060_v57 = vsub.f32 %v2996_v14, %v3028_v1  ;;  %v2042_v43 = vmul.f32 %v3770_v23, %v1914_v5  ;;  %v3825_v63 = vld [vmem:[%s5887_s0 + $0xb0] sm:$0xff] }
 0x323   :  { %v2997_v21 = vadd.f32 %v2953_v50, %v2869_v19  ;;  %3783 = vlog2.f32 %v2905_v9  ;;  %2808 = vst.msk [vmem:[#allocation3 + $0xc8] sm:$0xff] %vm19_vm13, %v2776_v52  ;;  %vm3096_vm1 = vcmp.ne.s32.totalorder %v3825_v63, 4294967196  ;;  %v3032_v47 = vld [vmem:[#allocation4 + $0xb0] sm:$0xff]  ;;  %v2873_v14 = vld [vmem:[#allocation2 + $0xb8] sm:$0xff]  ;;  %v2879_v63 = vld [vmem:[#allocation2 + $0xe8] sm:$0xff] }
 0x324   :  { %v2725_v53 = vpop.xlane.xlu1 %2724  ;;  %v3124_v7 = vsel %vm3092_vm12, %v3060_v57, 0.0  ;;  %3785 = vpow2.f32 %v2013_v11  ;;  %v3826_v9 = vld [vmem:[%s5887_s0 + $0xb8] sm:$0xff] }
 0x325   :  { %v3061_v51 = vsub.f32 %v2997_v21, %v3029_v6  ;;  %v2777_v59 = vadd.f32 %v2725_v53, %v2041_v60  ;;  %v3772_v38 = vpop.eup %3771  ;;  %3156 = vst.msk [vmem:[%s5888_s3 + $0x90] sm:$0xff] %vm19_vm13, %v3124_v7  ;;  %vm3097_vm2 = vcmp.ne.s32.totalorder %v3826_v9, 4294967196  ;;  %v3033_v60 = vld [vmem:[#allocation4 + $0xb8] sm:$0xff]  ;;  %v2880_v9 = vld [vmem:[#allocation2 + $0xf0] sm:$0xff] }
 0x326   :  { %v3774_v25 = vpop.eup %3773  ;;  %v2955_v36 = vmul.f32 0.6931472, %v3772_v38 }
 0x327   :  { %v3125_v8 = vsel %vm3093_vm14, %v3061_v51, 0.0  ;;  %2809 = vst.msk [vmem:[#allocation3 + $0xd0] sm:$0xff] %vm19_vm13, %v2777_v59  ;;  %v2906_v39 = vld [vmem:[#allocation3 + $0xc0] sm:$0xff]  ;;  %v2043_v24 = vmul.f32 %v3774_v25, %v1915_v27 }
 0x328   :  { %v3776_v61 = vpop.eup %3775  ;;  %3157 = vst.msk [vmem:[%s5888_s3 + $0x98] sm:$0xff] %vm19_vm13, %v3125_v8  ;;  %v2730_v18 = vpop.xlane.xlu0 %2729  ;;  %v2998_v13 = vadd.f32 %v2955_v36, %v2870_v49  ;;  %3787 = vlog2.f32 %v2906_v39  ;;  %v2874_v51 = vld [vmem:[#allocation2 + $0xc0] sm:$0xff] }
 0x329   :  { %v2957_v33 = vmul.f32 0.6931472, %v3776_v61  ;;  %v2778_v41 = vadd.f32 %v2730_v18, %v2042_v43  ;;  %v3778_v54 = vpop.eup %3777  ;;  %v3827_v36 = vld [vmem:[%s5887_s0 + $0xc0] sm:$0xff]  ;;  %v2875_v61 = vld [vmem:[#allocation2 + $0xc8] sm:$0xff] }
 0x32a   :  { %v2907_v35 = vld [vmem:[#allocation3 + $0xc8] sm:$0xff]  ;;  %v3062_v10 = vsub.f32 %v2998_v13, %v3030_v20  ;;  %v2044_v31 = vmul.f32 %v3778_v54, %v1916_v26  ;;  %vm3098_vm3 = vcmp.ne.s32.totalorder %v3827_v36, 4294967196  ;;  %v3034_v43 = vld [vmem:[#allocation4 + $0xc0] sm:$0xff]  ;;  %v3829_v54 = vld [vmem:[%s5887_s0 + $0xd0] sm:$0xff] }
 0x32b   :  { %v2999_v45 = vadd.f32 %v2957_v33, %v2871_v40  ;;  %3789 = vlog2.f32 %v2907_v35  ;;  %2810 = vst.msk [vmem:[#allocation3 + $0xd8] sm:$0xff] %vm19_vm13, %v2778_v41  ;;  %v3828_v13 = vld [vmem:[%s5887_s0 + $0xc8] sm:$0xff]  ;;  %v2876_v40 = vld [vmem:[#allocation2 + $0xd0] sm:$0xff]  ;;  %vm3100_vm5 = vcmp.ne.s32.totalorder %v3829_v54, 4294967196  ;;  %v2877_v26 = vld [vmem:[#allocation2 + $0xd8] sm:$0xff] }
 0x32c   :  { %v2735_v55 = vpop.xlane.xlu1 %2734  ;;  %v3126_v15 = vsel %vm3094_vm15, %v3062_v10, 0.0  ;;  %vm3099_vm4 = vcmp.ne.s32.totalorder %v3828_v13, 4294967196  ;;  %v3035_v33 = vld [vmem:[#allocation4 + $0xc8] sm:$0xff] }
 0x32d   :  { %v3063_v28 = vsub.f32 %v2999_v45, %v3031_v34  ;;  %v2779_v29 = vadd.f32 %v2735_v55, %v2043_v24  ;;  %v3780_v44 = vpop.eup %3779  ;;  %3158 = vst.msk [vmem:[%s5888_s3 + $0xa0] sm:$0xff] %vm19_vm13, %v3126_v15 }
 0x32e   :  { %v2908_v46 = vld [vmem:[#allocation3 + $0xd0] sm:$0xff]  ;;  %v3782_v56 = vpop.eup %3781  ;;  %v2959_v16 = vmul.f32 0.6931472, %v3780_v44 }
 0x32f   :  { %v3127_v42 = vsel %vm3095_vm0, %v3063_v28, 0.0  ;;  %3791 = vlog2.f32 %v2908_v46  ;;  %2811 = vst.msk [vmem:[#allocation3 + $0xe0] sm:$0xff] %vm19_vm13, %v2779_v29  ;;  %v2045_v1 = vmul.f32 %v3782_v56, %v1917_v30  ;;  %v3830_v46 = vld [vmem:[%s5887_s0 + $0xd8] sm:$0xff]  ;;  %v3831_v30 = vld [vmem:[%s5887_s0 + $0xe0] sm:$0xff] }
 0x330   :  { %v3784_v37 = vpop.eup %3783  ;;  %3159 = vst.msk [vmem:[%s5888_s3 + $0xa8] sm:$0xff] %vm19_vm13, %v3127_v42  ;;  %v2740_v0 = vpop.xlane.xlu0 %2739  ;;  %v3000_v32 = vadd.f32 %v2959_v16, %v2872_v58  ;;  %vm3101_vm6 = vcmp.ne.s32.totalorder %v3830_v46, 4294967196  ;;  %v3037_v56 = vld [vmem:[#allocation4 + $0xd8] sm:$0xff]  ;;  %vm3102_vm7 = vcmp.ne.s32.totalorder %v3831_v30, 4294967196 }
 0x331   :  { %v2961_v22 = vmul.f32 0.6931472, %v3784_v37  ;;  %v2780_v62 = vadd.f32 %v2740_v0, %v2044_v31  ;;  %v3786_v19 = vpop.eup %3785  ;;  %v2878_v31 = vld [vmem:[#allocation2 + $0xe0] sm:$0xff] }
 0x332   :  { %v2909_v50 = vld [vmem:[#allocation3 + $0xd8] sm:$0xff]  ;;  %v3064_v52 = vsub.f32 %v3000_v32, %v3032_v47  ;;  %v2046_v5 = vmul.f32 %v3786_v19, %v1918_v2  ;;  %v3038_v32 = vld [vmem:[#allocation4 + $0xe0] sm:$0xff] }
 0x333   :  { %v3001_v3 = vadd.f32 %v2961_v22, %v2873_v14  ;;  %3793 = vlog2.f32 %v2909_v50  ;;  %2812 = vst.msk [vmem:[#allocation3 + $0xe8] sm:$0xff] %vm19_vm13, %v2780_v62 }
 0x334   :  { %v2745_v4 = vpop.xlane.xlu1 %2744  ;;  %v3128_v11 = vsel %vm3096_vm1, %v3064_v52, 0.0  ;;  %v3832_v52 = vld [vmem:[%s5887_s0 + $0xe8] sm:$0xff] }
 0x335   :  { %v3065_v57 = vsub.f32 %v3001_v3, %v3033_v60  ;;  %v2781_v21 = vadd.f32 %v2745_v4, %v2045_v1  ;;  %v3788_v23 = vpop.eup %3787  ;;  %3160 = vst.msk [vmem:[%s5888_s3 + $0xb0] sm:$0xff] %vm19_vm13, %v3128_v11  ;;  %vm3103_vm8 = vcmp.ne.s32.totalorder %v3832_v52, 4294967196  ;;  %v3039_v3 = vld [vmem:[#allocation4 + $0xe8] sm:$0xff]  ;;  %v3833_v11 = vld [vmem:[%s5887_s0 + $0xf0] sm:$0xff] }
 0x336   :  { %v2910_v48 = vld [vmem:[#allocation3 + $0xe0] sm:$0xff]  ;;  %v2963_v53 = vmul.f32 0.6931472, %v3788_v23  ;;  %vm3104_vm9 = vcmp.ne.s32.totalorder %v3833_v11, 4294967196 }
 0x337   :  { %v3129_v6 = vsel %vm3097_vm2, %v3065_v57, 0.0  ;;  %3795 = vlog2.f32 %v2910_v48  ;;  %2813 = vst.msk [vmem:[#allocation3 + $0xf0] sm:$0xff] %vm19_vm13, %v2781_v21  ;;  %v3040_v57 = vld [vmem:[#allocation4 + $0xf0] sm:$0xff]  ;;  %v2881_v48 = vld [vmem:[#allocation2 + $0xf8] sm:$0xff] }
 0x338   :  { %v3790_v7 = vpop.eup %3789  ;;  %3161 = vst.msk [vmem:[%s5888_s3 + $0xb8] sm:$0xff] %vm19_vm13, %v3129_v6  ;;  %v2750_v59 = vpop.xlane.xlu0 %2749  ;;  %v3002_v38 = vadd.f32 %v2963_v53, %v2874_v51 }
 0x339   :  { %v2965_v25 = vmul.f32 0.6931472, %v3790_v7  ;;  %v2782_v8 = vadd.f32 %v2750_v59, %v2046_v5  ;;  %v3834_v5 = vld [vmem:[%s5887_s0 + $0xf8] sm:$0xff] }
 0x33a   :  { %v2911_v49 = vld [vmem:[#allocation3 + $0xe8] sm:$0xff]  ;;  %v3066_v39 = vsub.f32 %v3002_v38, %v3034_v43  ;;  %vm3105_vm10 = vcmp.ne.s32.totalorder %v3834_v5, 4294967196  ;;  %v3041_v7 = vld [vmem:[#allocation4 + $0xf8] sm:$0xff] }
 0x33b   :  { %v3003_v18 = vadd.f32 %v2965_v25, %v2875_v61  ;;  %3797 = vlog2.f32 %v2911_v49  ;;  %2814 = vst.msk [vmem:[#allocation3 + $0xf8] sm:$0xff] %vm19_vm13, %v2782_v8 }
 0x33c   :  { %v3792_v27 = vpop.eup %3791  ;;  %v3130_v41 = vsel %vm3098_vm3, %v3066_v39, 0.0 }
 0x33d   :  { %v3067_v12 = vsub.f32 %v3003_v18, %v3035_v33  ;;  %v2967_v20 = vmul.f32 0.6931472, %v3792_v27  ;;  %3162 = vst.msk [vmem:[%s5888_s3 + $0xc0] sm:$0xff] %vm19_vm13, %v3130_v41 }
 0x33e   :  { %v2912_v35 = vld [vmem:[#allocation3 + $0xf0] sm:$0xff] }
 0x33f   :  { %v3131_v10 = vsel %vm3099_vm4, %v3067_v12, 0.0  ;;  %v3004_v45 = vadd.f32 %v2967_v20, %v2876_v40  ;;  %3799 = vlog2.f32 %v2912_v35 }
 0x340   :  { %v3794_v24 = vpop.eup %3793  ;;  %3163 = vst.msk [vmem:[%s5888_s3 + $0xc8] sm:$0xff] %vm19_vm13, %v3131_v10 }
 0x341   :  { %v3068_v34 = vsub.f32 %v3004_v45, %v3036_v17  ;;  %v2969_v55 = vmul.f32 0.6931472, %v3794_v24 }
 0x342   :  { %v2913_v15 = vld [vmem:[#allocation3 + $0xf8] sm:$0xff] }
 0x343   :  { %v3132_v28 = vsel %vm3100_vm5, %v3068_v34, 0.0  ;;  %v3005_v29 = vadd.f32 %v2969_v55, %v2877_v26  ;;  %3801 = vlog2.f32 %v2913_v15 }
 0x344   :  { %v3796_v44 = vpop.eup %3795  ;;  %3164 = vst.msk [vmem:[%s5888_s3 + $0xd0] sm:$0xff] %vm19_vm13, %v3132_v28 }
 0x345   :  { %v3069_v42 = vsub.f32 %v3005_v29, %v3037_v56  ;;  %v2971_v16 = vmul.f32 0.6931472, %v3796_v44 }
 0x347   :  { %v3133_v37 = vsel %vm3101_vm6, %v3069_v42, 0.0  ;;  %v3006_v58 = vadd.f32 %v2971_v16, %v2878_v31 }
 0x348   :  { %v3798_v0 = vpop.eup %3797  ;;  %3165 = vst.msk [vmem:[%s5888_s3 + $0xd8] sm:$0xff] %vm19_vm13, %v3133_v37 }
 0x349   :  { %v3070_v22 = vsub.f32 %v3006_v58, %v3038_v32  ;;  %v2973_v62 = vmul.f32 0.6931472, %v3798_v0 }
 0x34b   :  { %v3134_v47 = vsel %vm3102_vm7, %v3070_v22, 0.0  ;;  %v3007_v14 = vadd.f32 %v2973_v62, %v2879_v63 }
 0x34c   :  { %v3800_v50 = vpop.eup %3799  ;;  %3166 = vst.msk [vmem:[%s5888_s3 + $0xe0] sm:$0xff] %vm19_vm13, %v3134_v47 }
 0x34d   :  { %v3071_v1 = vsub.f32 %v3007_v14, %v3039_v3  ;;  %v2975_v19 = vmul.f32 0.6931472, %v3800_v50 }
 0x34f   :  { %v3135_v60 = vsel %vm3103_vm8, %v3071_v1, 0.0  ;;  %v3008_v4 = vadd.f32 %v2975_v19, %v2880_v9 }
 0x350   :  { %v3802_v2 = vpop.eup %3801  ;;  %3167 = vst.msk [vmem:[%s5888_s3 + $0xe8] sm:$0xff] %vm19_vm13, %v3135_v60 }
 0x351   :  { %v3072_v21 = vsub.f32 %v3008_v4, %v3040_v57  ;;  %v2977_v23 = vmul.f32 0.6931472, %v3802_v2 }
 0x353   :  { %v3136_v6 = vsel %vm3104_vm9, %v3072_v21, 0.0  ;;  %v3009_v53 = vadd.f32 %v2977_v23, %v2881_v48 }
 0x354   :  { %3168 = vst.msk [vmem:[%s5888_s3 + $0xf0] sm:$0xff] %vm19_vm13, %v3136_v6 }
 0x355   :  { %v3073_v51 = vsub.f32 %v3009_v53, %v3041_v7 }
 0x357   :  { %v3137_v59 = vsel %vm3105_vm10, %v3073_v51, 0.0 }
 0x358   :  { %3169 = vst.msk [vmem:[%s5888_s3 + $0xf8] sm:$0xff] %vm19_vm13, %v3137_v59 }

</bundles_post_ra>
